<compile_context>
chip_gen: v6e
topology: v6e:2x2x1
jax: 0.10.0
libtpu: 0.0.40
codegen_flags: <defaults>
</compile_context>

<pallas_src>
import functools

import jax
import jax.numpy as jnp
from jax.experimental import pallas as pl
from jax.experimental.pallas import tpu as pltpu


# -----------------------------------------------------------------------------
# Pallas kernel: fused 1x1-conv head, C-major layout (pixels on the lane axis)
# -----------------------------------------------------------------------------
def _head_kernel(x_ref, w1_ref, b1_ref, w2_ref, b2_ref, o_ref):
    # x_ref:  (1, C, TM)    bf16 feature columns (one batch item, TM pixels)
    # w1_ref: (HID, C)      bf16 first 1x1 conv weight (PyTorch layout)
    # b1_ref: (HID, 1)      f32
    # w2_ref: (NC, HID)     bf16 second 1x1 conv weight (PyTorch layout)
    # b2_ref: (NC, 1)       f32
    # o_ref:  (1, NC, TM)   f32 sigmoid outputs (lane-dense on TM)
    x = x_ref[0]                                             # (C, TM) bf16
    h = jnp.dot(w1_ref[...], x,
                preferred_element_type=jnp.float32)          # (HID, TM) f32
    h = jnp.maximum(h + b1_ref[...], 0.0)                    # bias + ReLU
    # Dropout2d(p=0.5): identity in eval/inference mode.
    h = h.astype(jnp.bfloat16)
    logits = jnp.dot(w2_ref[...], h,
                     preferred_element_type=jnp.float32)     # (NC, TM) f32
    logits = logits + b2_ref[...]
    o_ref[0] = jax.nn.sigmoid(logits).astype(o_ref.dtype)


@functools.partial(jax.jit, static_argnames=("tm",))
def wsod_point_head(x_nchw, w1, b1, w2, b2, *, tm=512):
    """Pallas implementation of WSODPointModel.forward(x, isFeatureVector=True).

    Args:
      x_nchw: (N, C, H, W) float32 feature map (C = 512 for resnet18).
      w1: (HID, C)   first 1x1 conv weight (PyTorch (out, in, 1, 1) squeezed).
      b1: (HID,)
      w2: (NC, HID)  second 1x1 conv weight.
      b2: (NC,)
      tm: pixel (lane) tile size; clamped to H*W.
    Returns:
      (N, NC, H, W) float32 sigmoid class maps (matches PyTorch NCHW output).
    """
    N, C, H, W = x_nchw.shape
    HID = w1.shape[0]
    NC = w2.shape[0]
    HW = H * W

    tm_eff = min(tm, HW)
    assert HW % tm_eff == 0, "H*W must be divisible by the pixel tile size"
    assert tm_eff == HW or tm_eff % 128 == 0, "pixel tile must be lane-aligned"

    # NCHW -> (N, C, HW): pure reshape, no transpose. bf16 for MXU-native dots.
    x3d = x_nchw.reshape(N, C, HW).astype(jnp.bfloat16)
    w1_b = w1.astype(jnp.bfloat16)
    w2_b = w2.astype(jnp.bfloat16)
    b1_r = b1.reshape(HID, 1).astype(jnp.float32)
    b2_r = b2.reshape(NC, 1).astype(jnp.float32)

    out3d = pl.pallas_call(
        _head_kernel,
        out_shape=jax.ShapeDtypeStruct((N, NC, HW), jnp.float32),
        grid_spec=pltpu.PrefetchScalarGridSpec(
            num_scalar_prefetch=0,
            grid=(N, HW // tm_eff),
            in_specs=[
                pl.BlockSpec((1, C, tm_eff), lambda n, i: (n, 0, i)),  # x
                pl.BlockSpec((HID, C), lambda n, i: (0, 0)),           # w1
                pl.BlockSpec((HID, 1), lambda n, i: (0, 0)),           # b1
                pl.BlockSpec((NC, HID), lambda n, i: (0, 0)),          # w2
                pl.BlockSpec((NC, 1), lambda n, i: (0, 0)),            # b2
            ],
            out_specs=pl.BlockSpec((1, NC, tm_eff), lambda n, i: (n, 0, i)),
        ),
        compiler_params=pltpu.CompilerParams(
            dimension_semantics=("parallel", "parallel"),
        ),
    )(x3d, w1_b, b1_r, w2_b, b2_r)

    # (N, NC, HW) -> (N, NC, H, W): pure reshape, no transpose.
    return out3d.reshape(N, NC, H, W)


# -----------------------------------------------------------------------------
# Deterministic parameter setup + reference + smoke test
# -----------------------------------------------------------------------------
def init_params(key, in_channels=512, hidden=1024, num_classes=4):
    k1, k2, k3, k4 = jax.random.split(key, 4)
    # Deterministic synthetic init (scaled like PyTorch's fan-in uniform).
    s1 = 1.0 / jnp.sqrt(in_channels)
    s2 = 1.0 / jnp.sqrt(hidden)
    w1 = jax.random.uniform(k1, (hidden, in_channels), jnp.float32, -s1, s1)
    b1 = jax.random.uniform(k2, (hidden,), jnp.float32, -s1, s1)
    w2 = jax.random.uniform(k3, (num_classes, hidden), jnp.float32, -s2, s2)
    b2 = jax.random.uniform(k4, (num_classes,), jnp.float32, -s2, s2)
    return w1, b1, w2, b2


def reference_head(x_nchw, w1, b1, w2, b2):
    # Plain-JAX f32 reference of the classifier head (eval mode).
    N, C, H, W = x_nchw.shape
    x2d = jnp.transpose(x_nchw, (0, 2, 3, 1)).reshape(-1, C)
    h = jnp.maximum(x2d @ w1.T + b1, 0.0)
    o = jax.nn.sigmoid(h @ w2.T + b2)
    return jnp.transpose(o.reshape(N, H, W, -1), (0, 3, 1, 2))


if __name__ == "__main__":
    key = jax.random.PRNGKey(0)
    k_x, k_p = jax.random.split(key)

    # Small shapes: batch=2, C=512 (resnet18 feature channels), spatial=16x16,
    # numClasses=4.  H*W = 256 -> tm_eff = 256, grid = (2, 1) (2 parallel steps).
    N, C, H, W = 2, 512, 16, 16
    NUM_CLASSES = 4

    x = jax.random.normal(k_x, (N, C, H, W), jnp.float32)
    w1, b1, w2, b2 = init_params(k_p, in_channels=C, hidden=1024,
                                 num_classes=NUM_CLASSES)

    out = wsod_point_head(x, w1, b1, w2, b2, tm=512)
    out = jax.block_until_ready(out)

    ref = jax.block_until_ready(reference_head(x, w1, b1, w2, b2))
    assert out.shape == (N, NUM_CLASSES, H, W), out.shape
    # bf16 matmul inputs with f32 accumulation vs. pure-f32 reference:
    # sigmoid outputs in [0, 1]; observed error << 2e-2.
    max_err = float(jnp.max(jnp.abs(out - ref)))
    assert max_err < 2e-2, max_err

    print("KERNEL_OK")
</pallas_src>

<mosaic_0001>
module attributes {stable_mosaic.version = 11 : i64} {
  func.func @_head_kernel(%arg0: i32, %arg1: i32, %arg2: memref<1x512x256xbf16, #tpu.memory_space<vmem>>, %arg3: memref<1024x512xbf16, #tpu.memory_space<vmem>>, %arg4: memref<1024x1xf32, #tpu.memory_space<vmem>>, %arg5: memref<4x1024xbf16, #tpu.memory_space<vmem>>, %arg6: memref<4x1xf32, #tpu.memory_space<vmem>>, %arg7: memref<1x4x256xf32, #tpu.memory_space<vmem>>) attributes {dimension_semantics = [#tpu.dimension_semantics<parallel>, #tpu.dimension_semantics<parallel>], iteration_bounds = array<i64: 2, 1>, scalar_prefetch = 0 : i64, scratch_operands = 0 : i64, tpu.core_type = #tpu.core_type<tc>, window_params = [{transform_indices = @transform_0, window_bounds = array<i64: 1, 512, 256>}, {pipeline_mode = #tpu.pipeline_mode<synchronous>, transform_indices = @transform_1, window_bounds = array<i64: 1024, 512>}, {pipeline_mode = #tpu.pipeline_mode<synchronous>, transform_indices = @transform_2, window_bounds = array<i64: 1024, 1>}, {pipeline_mode = #tpu.pipeline_mode<synchronous>, transform_indices = @transform_3, window_bounds = array<i64: 4, 1024>}, {pipeline_mode = #tpu.pipeline_mode<synchronous>, transform_indices = @transform_4, window_bounds = array<i64: 4, 1>}, {transform_indices = @transform_5, window_bounds = array<i64: 1, 4, 256>}]} {
    %c0 = arith.constant 0 : index
    %c0_0 = arith.constant 0 : index
    %c0_1 = arith.constant 0 : index
    %0 = vector.load %arg2[%c0, %c0_0, %c0_1] : memref<1x512x256xbf16, #tpu.memory_space<vmem>>, vector<1x512x256xbf16>
    %1 = vector.shape_cast %0 : vector<1x512x256xbf16> to vector<512x256xbf16>
    %c0_2 = arith.constant 0 : index
    %c0_3 = arith.constant 0 : index
    %2 = vector.load %arg3[%c0_2, %c0_3] : memref<1024x512xbf16, #tpu.memory_space<vmem>>, vector<1024x512xbf16>
    %cst = arith.constant dense<0.000000e+00> : vector<1024x256xf32>
    %3 = tpu.matmul %2, %1, %cst {dimension_numbers = #tpu.dot_dimension_numbers<[1], [0], [0], [1], [0, 0, 1, 1], [], []>} : vector<1024x512xbf16>, vector<512x256xbf16>, vector<1024x256xf32> -> vector<1024x256xf32>
    %c0_4 = arith.constant 0 : index
    %c0_5 = arith.constant 0 : index
    %4 = vector.load %arg4[%c0_4, %c0_5] : memref<1024x1xf32, #tpu.memory_space<vmem>>, vector<1024x1xf32>
    %5 = vector.broadcast %4 : vector<1024x1xf32> to vector<1024x256xf32>
    %6 = arith.addf %3, %5 : vector<1024x256xf32>
    %cst_6 = arith.constant 0.000000e+00 : f32
    %7 = vector.broadcast %cst_6 : f32 to vector<1024x256xf32>
    %8 = arith.maximumf %6, %7 : vector<1024x256xf32>
    %9 = arith.truncf %8 : vector<1024x256xf32> to vector<1024x256xbf16>
    %c0_7 = arith.constant 0 : index
    %c0_8 = arith.constant 0 : index
    %10 = vector.load %arg5[%c0_7, %c0_8] : memref<4x1024xbf16, #tpu.memory_space<vmem>>, vector<4x1024xbf16>
    %cst_9 = arith.constant dense<0.000000e+00> : vector<4x256xf32>
    %11 = tpu.matmul %10, %9, %cst_9 {dimension_numbers = #tpu.dot_dimension_numbers<[1], [0], [0], [1], [0, 0, 1, 1], [], []>} : vector<4x1024xbf16>, vector<1024x256xbf16>, vector<4x256xf32> -> vector<4x256xf32>
    %c0_10 = arith.constant 0 : index
    %c0_11 = arith.constant 0 : index
    %12 = vector.load %arg6[%c0_10, %c0_11] : memref<4x1xf32, #tpu.memory_space<vmem>>, vector<4x1xf32>
    %13 = vector.broadcast %12 : vector<4x1xf32> to vector<4x256xf32>
    %14 = arith.addf %11, %13 : vector<4x256xf32>
    %15 = arith.negf %14 : vector<4x256xf32>
    %16 = math.exp %15 : vector<4x256xf32>
    %cst_12 = arith.constant 1.000000e+00 : f32
    %17 = vector.broadcast %cst_12 : f32 to vector<4x256xf32>
    %18 = arith.addf %17, %16 : vector<4x256xf32>
    %19 = arith.divf %17, %18 : vector<4x256xf32>
    %c0_13 = arith.constant 0 : index
    %c0_14 = arith.constant 0 : index
    %c0_15 = arith.constant 0 : index
    %20 = vector.load %arg7[%c0_13, %c0_14, %c0_15] : memref<1x4x256xf32, #tpu.memory_space<vmem>>, vector<1x4x256xf32>
    %21 = vector.shape_cast %20 : vector<1x4x256xf32> to vector<4x256xf32>
    %22 = vector.shape_cast %19 : vector<4x256xf32> to vector<1x4x256xf32>
    tpu.vector_store %arg7[%c0_13, %c0_14, %c0_15], %22 {strides = array<i32>} : memref<1x4x256xf32, #tpu.memory_space<vmem>>, vector<1x4x256xf32>,
    return
  }
  func.func @transform_0(%arg0: i32, %arg1: i32) -> (i32, i32, i32) {
    %c0_i32 = arith.constant 0 : i32
    %c0_i32_0 = arith.constant 0 : i32
    return %arg0, %c0_i32, %arg1 : i32, i32, i32
  }
  func.func @transform_1(%arg0: i32, %arg1: i32) -> (i32, i32) {
    %c0_i32 = arith.constant 0 : i32
    %c0_i32_0 = arith.constant 0 : i32
    %c0_i32_1 = arith.constant 0 : i32
    return %c0_i32, %c0_i32_0 : i32, i32
  }
  func.func @transform_2(%arg0: i32, %arg1: i32) -> (i32, i32) {
    %c0_i32 = arith.constant 0 : i32
    %c0_i32_0 = arith.constant 0 : i32
    %c0_i32_1 = arith.constant 0 : i32
    return %c0_i32, %c0_i32_0 : i32, i32
  }
  func.func @transform_3(%arg0: i32, %arg1: i32) -> (i32, i32) {
    %c0_i32 = arith.constant 0 : i32
    %c0_i32_0 = arith.constant 0 : i32
    %c0_i32_1 = arith.constant 0 : i32
    return %c0_i32, %c0_i32_0 : i32, i32
  }
  func.func @transform_4(%arg0: i32, %arg1: i32) -> (i32, i32) {
    %c0_i32 = arith.constant 0 : i32
    %c0_i32_0 = arith.constant 0 : i32
    %c0_i32_1 = arith.constant 0 : i32
    return %c0_i32, %c0_i32_0 : i32, i32
  }
  func.func @transform_5(%arg0: i32, %arg1: i32) -> (i32, i32, i32) {
    %c0_i32 = arith.constant 0 : i32
    %c0_i32_0 = arith.constant 0 : i32
    return %arg0, %c0_i32, %arg1 : i32, i32, i32
  }
}

</mosaic_0001>

<bundles_post_ra>
// kernel: wsod_point_head.1
= control target key start
LH: loop header
LB: loop body
LE: loop exit
PB: predicated region body
PF: predicated region fallthrough
CT: control target
= control target key end

     0   :  { %s5911_s18 = smov 0   ;;  %s5913_s19 = smov 0   ;;  %s8595_s0 = inlined_call_operand.vmem [shape: bf16[2,512,256], index: 0, kind: input, shape index: {}]   ;;  %s8596_s1 = inlined_call_operand.vmem [shape: bf16[1024,512], index: 1, kind: input, shape index: {}]   ;;  %s8597_s2 = inlined_call_operand.vmem [shape: f32[1024,1], index: 2, kind: input, shape index: {}]   ;;  %s8598_s3 = inlined_call_operand.vmem [shape: bf16[4,1024], index: 3, kind: input, shape index: {}]   ;;  %s8599_s4 = inlined_call_operand.vmem [shape: f32[4,1], index: 4, kind: input, shape index: {}]   ;;  %s8600_s5 = inlined_call_operand.vmem [shape: f32[2,4,256], index: 5, kind: output, shape index: {}]  }
   0x1   :  { %s5915_s20 = smov 0  }
   0x2 LB: > { %s27_s21 = sadd.s32 1, %s5873_s19  ;;  %p5006_p0 = scmp.ge.s32.totalorder %s5877_s20, 1  ;;  %s5877_s20 = sphi %s5915_s20, %s15_s20   ;;  %s5873_s19 = sphi %s5913_s19, %s8939_s19   ;;  %s5869_s18 = sphi %s5911_s18, %s8938_s18  }
   0x3   : > { %p29_p1 = scmp.ge.s32.totalorder %s27_s21, 2  ;;  %p208_p2 = scmp.lt.s32.totalorder %s5877_s20, 3 }
   0x5   : > { %s8941_s21 = smov (%p29_p1, %s27_s21), 0  ;;  %p209_p3 = pnand %p5006_p0, %p208_p2 }
   0x7   : > { %212 = sbr.rel (%p209_p3) target bundleno = 1058 (0x422), region = 40 }
   0xc   : > { %p245_p4 = scmp.lt.s32.totalorder %s5869_s18, 1  ;;  %v584_v0 = vld [vmem:[%s8597_s2] sm:$0xff]  ;;  %v586_v1 = vld [vmem:[%s8597_s2 + $0x10] sm:$0xff]  ;;  %v5879_v2 = vmov 0   ;;  %v585_v3 = vld [vmem:[%s8597_s2 + $0x8] sm:$0xff] }
   0xd   : > { %5363 = vset.pattern.permute.xlu0 %v5879_v2  ;;  %5364 = vset.pattern.permute.xlu1 %v5879_v2  ;;  %v587_v4 = vld [vmem:[%s8597_s2 + $0x18] sm:$0xff]  ;;  %v588_v6 = vld [vmem:[%s8597_s2 + $0x20] sm:$0xff]  ;;  %v589_v8 = vld [vmem:[%s8597_s2 + $0x28] sm:$0xff] }
   0xe   : > { %s8943_s18 = smov (!%p245_p4, %s5869_s18), 1  ;;  %714 = vperm.xlu0 %5363, %v584_v0   ;;  %724 = vperm.xlu1 %5364, %v586_v1   ;;  %v590_v15 = vld [vmem:[%s8597_s2 + $0x30] sm:$0xff]  ;;  %v591_v16 = vld [vmem:[%s8597_s2 + $0x38] sm:$0xff]  ;;  %v592_v23 = vld [vmem:[%s8597_s2 + $0x40] sm:$0xff] }
   0xf   : > { %s5335_s30 = sshll.u32 %s8943_s18, 9  ;;  %v593_v24 = vld [vmem:[%s8597_s2 + $0x48] sm:$0xff]  ;;  %v594_v29 = vld [vmem:[%s8597_s2 + $0x50] sm:$0xff]  ;;  %v595_v32 = vld [vmem:[%s8597_s2 + $0x58] sm:$0xff]  ;;  %s5336_s25 = sshll.u32 %s8943_s18, 3 }
  0x10   : > { %s5947_s8 = scalar_lea.vmem %s8595_s0, %s5335_s30  ;;  %v596_v35 = vld [vmem:[%s8597_s2 + $0x60] sm:$0xff]  ;;  %v597_v36 = vld [vmem:[%s8597_s2 + $0x68] sm:$0xff]  ;;  %v598_v41 = vld [vmem:[%s8597_s2 + $0x70] sm:$0xff]  ;;  %s262_s28 = scalar_lea.vmem %s8600_s5, %s5336_s25 }
  0x11   : > { %v5365_v5 = vld [vmem:[%s5947_s8 + $0x74] ss:$8 sps:$4 sm:$0xff]   ;;  %v5369_v9 = vld [vmem:[%s5947_s8 + $0x70] ss:$8 sps:$4 sm:$0xff]   ;;  %v5371_v11 = vld [vmem:[%s5947_s8 + $0x64] ss:$8 sps:$4 sm:$0xff]  }
  0x12   : > { %719 = vperm.xlu0 %5363, %v585_v3   ;;  %729 = vperm.xlu1 %5364, %v587_v4   ;;  %v5367_v7 = vld [vmem:[%s5947_s8 + $0x174] ss:$8 sps:$4 sm:$0xff]   ;;  %v5370_v10 = vld [vmem:[%s5947_s8 + $0x170] ss:$8 sps:$4 sm:$0xff]   ;;  %v5373_v12 = vld [vmem:[%s5947_s8 + $0x164] ss:$8 sps:$4 sm:$0xff]  }
  0x13   : > { %2952 = vmatprep.subr.bf16.mxu0 %v5365_v5  ;;  %3625 = vmatprep.subr.bf16.mxu1 %v5367_v7  ;;  %v5375_v13 = vld [vmem:[%s5947_s8 + $0x60] ss:$8 sps:$4 sm:$0xff]   ;;  %v5377_v17 = vld [vmem:[%s5947_s8 + $0x54] ss:$8 sps:$4 sm:$0xff]   ;;  %v5381_v19 = vld [vmem:[%s5947_s8 + $0x50] ss:$8 sps:$4 sm:$0xff]  }
  0x14   : > { %2953 = vmatpush1.bf16.msra.mxu0 %v5369_v9  ;;  %3626 = vmatpush1.bf16.msra.mxu1 %v5370_v10  ;;  %v5376_v14 = vld [vmem:[%s5947_s8 + $0x160] ss:$8 sps:$4 sm:$0xff]   ;;  %v5379_v18 = vld [vmem:[%s5947_s8 + $0x154] ss:$8 sps:$4 sm:$0xff]   ;;  %v5382_v20 = vld [vmem:[%s5947_s8 + $0x150] ss:$8 sps:$4 sm:$0xff]  }
  0x15   : > { %2954 = vmatprep.subr.bf16.mxu0 %v5371_v11  ;;  %3627 = vmatprep.subr.bf16.mxu1 %v5373_v12  ;;  %v5383_v21 = vld [vmem:[%s5947_s8 + $0x44] ss:$8 sps:$4 sm:$0xff]   ;;  %v5387_v25 = vld [vmem:[%s5947_s8 + $0x40] ss:$8 sps:$4 sm:$0xff]   ;;  %v5389_v27 = vld [vmem:[%s5947_s8 + $0x34] ss:$8 sps:$4 sm:$0xff]  }
  0x16   : > { %734 = vperm.xlu0 %5363, %v588_v6   ;;  %739 = vperm.xlu1 %5364, %v589_v8   ;;  %v5385_v22 = vld [vmem:[%s5947_s8 + $0x144] ss:$8 sps:$4 sm:$0xff]   ;;  %v5388_v26 = vld [vmem:[%s5947_s8 + $0x140] ss:$8 sps:$4 sm:$0xff]   ;;  %v5391_v28 = vld [vmem:[%s5947_s8 + $0x134] ss:$8 sps:$4 sm:$0xff]  }
  0x17   : > { %v5393_v30 = vld [vmem:[%s5947_s8 + $0x30] ss:$8 sps:$4 sm:$0xff]   ;;  %v5395_v33 = vld [vmem:[%s5947_s8 + $0x24] ss:$8 sps:$4 sm:$0xff]   ;;  %v5399_v37 = vld [vmem:[%s5947_s8 + $0x20] ss:$8 sps:$4 sm:$0xff]  }
  0x18   : > { %2955 = vmatpush1.bf16.msra.mxu0 %v5375_v13  ;;  %3628 = vmatpush1.bf16.msra.mxu1 %v5376_v14  ;;  %v5394_v31 = vld [vmem:[%s5947_s8 + $0x130] ss:$8 sps:$4 sm:$0xff]   ;;  %v5397_v34 = vld [vmem:[%s5947_s8 + $0x124] ss:$8 sps:$4 sm:$0xff]   ;;  %v5400_v38 = vld [vmem:[%s5947_s8 + $0x120] ss:$8 sps:$4 sm:$0xff]  }
  0x19   : > { %2956 = vmatprep.subr.bf16.mxu0 %v5377_v17  ;;  %3629 = vmatprep.subr.bf16.mxu1 %v5379_v18  ;;  %v5401_v39 = vld [vmem:[%s5947_s8 + $0x14] ss:$8 sps:$4 sm:$0xff]   ;;  %v5405_v42 = vld [vmem:[%s5947_s8 + $0x10] ss:$8 sps:$4 sm:$0xff]   ;;  %v5407_v45 = vld [vmem:[%s5947_s8 + $0x4] ss:$8 sps:$4 sm:$0xff]  }
  0x1a   : > { %744 = vperm.xlu0 %5363, %v590_v15   ;;  %749 = vperm.xlu1 %5364, %v591_v16   ;;  %v5403_v40 = vld [vmem:[%s5947_s8 + $0x114] ss:$8 sps:$4 sm:$0xff]   ;;  %v5406_v43 = vld [vmem:[%s5947_s8 + $0x110] ss:$8 sps:$4 sm:$0xff]   ;;  %v5409_v46 = vld [vmem:[%s5947_s8 + $0x104] ss:$8 sps:$4 sm:$0xff]  }
  0x1b   : > { %v599_v44 = vld [vmem:[%s8597_s2 + $0x78] sm:$0xff]  ;;  %v600_v47 = vld [vmem:[%s8597_s2 + $0x80] sm:$0xff]  ;;  %v601_v48 = vld [vmem:[%s8597_s2 + $0x88] sm:$0xff] }
  0x1c   : > { %2957 = vmatpush1.bf16.msra.mxu0 %v5381_v19  ;;  %3630 = vmatpush1.bf16.msra.mxu1 %v5382_v20  ;;  %v5411_v49 = vld [vmem:[%s5947_s8] ss:$8 sps:$4 sm:$0xff]   ;;  %v5413_v51 = vld [vmem:[%s5947_s8 + $0xf4] ss:$8 sps:$4 sm:$0xff]   ;;  %v5417_v53 = vld [vmem:[%s5947_s8 + $0xf0] ss:$8 sps:$4 sm:$0xff]  }
  0x1d   : > { %2958 = vmatprep.subr.bf16.mxu0 %v5383_v21  ;;  %3631 = vmatprep.subr.bf16.mxu1 %v5385_v22  ;;  %v5412_v50 = vld [vmem:[%s5947_s8 + $0x100] ss:$8 sps:$4 sm:$0xff]   ;;  %v5415_v52 = vld [vmem:[%s5947_s8 + $0x1f4] ss:$8 sps:$4 sm:$0xff]   ;;  %v5418_v54 = vld [vmem:[%s5947_s8 + $0x1f0] ss:$8 sps:$4 sm:$0xff]  }
  0x1e   : > { %754 = vperm.xlu0 %5363, %v592_v23   ;;  %759 = vperm.xlu1 %5364, %v593_v24   ;;  %v5419_v55 = vld [vmem:[%s5947_s8 + $0xe4] ss:$8 sps:$4 sm:$0xff]   ;;  %v5423_v57 = vld [vmem:[%s5947_s8 + $0xe0] ss:$8 sps:$4 sm:$0xff]   ;;  %v5425_v59 = vld [vmem:[%s5947_s8 + $0xd4] ss:$8 sps:$4 sm:$0xff]  }
  0x1f   : > { %v5421_v56 = vld [vmem:[%s5947_s8 + $0x1e4] ss:$8 sps:$4 sm:$0xff]   ;;  %v5424_v58 = vld [vmem:[%s5947_s8 + $0x1e0] ss:$8 sps:$4 sm:$0xff]   ;;  %v5427_v60 = vld [vmem:[%s5947_s8 + $0x1d4] ss:$8 sps:$4 sm:$0xff]  }
  0x20   : > { %2959 = vmatpush1.bf16.msra.mxu0 %v5387_v25  ;;  %3632 = vmatpush1.bf16.msra.mxu1 %v5388_v26  ;;  %v5429_v61 = vld [vmem:[%s5947_s8 + $0xd0] ss:$8 sps:$4 sm:$0xff]   ;;  %v5431_v63 = vld [vmem:[%s5947_s8 + $0xc4] ss:$8 sps:$4 sm:$0xff]   ;;  %v5435_v2 = vld [vmem:[%s5947_s8 + $0xc0] ss:$8 sps:$4 sm:$0xff]  }
  0x21   : > { %2960 = vmatprep.subr.bf16.mxu0 %v5389_v27  ;;  %3633 = vmatprep.subr.bf16.mxu1 %v5391_v28  ;;  %v5430_v62 = vld [vmem:[%s5947_s8 + $0x1d0] ss:$8 sps:$4 sm:$0xff]   ;;  %v5433_v1 = vld [vmem:[%s5947_s8 + $0x1c4] ss:$8 sps:$4 sm:$0xff]   ;;  %v5436_v3 = vld [vmem:[%s5947_s8 + $0x1c0] ss:$8 sps:$4 sm:$0xff]  }
  0x22   : > { %764 = vperm.xlu0 %5363, %v594_v29   ;;  %769 = vperm.xlu1 %5364, %v595_v32   ;;  %v602_v0 = vld [vmem:[%s8597_s2 + $0x90] sm:$0xff]  ;;  %v603_v4 = vld [vmem:[%s8597_s2 + $0x98] sm:$0xff]  ;;  %v604_v5 = vld [vmem:[%s8597_s2 + $0xa0] sm:$0xff] }
  0x23   : > { %v5437_v6 = vld [vmem:[%s5947_s8 + $0xb4] ss:$8 sps:$4 sm:$0xff]   ;;  %v5441_v9 = vld [vmem:[%s5947_s8 + $0xb0] ss:$8 sps:$4 sm:$0xff]   ;;  %v605_v12 = vld [vmem:[%s8597_s2 + $0xa8] sm:$0xff] }
  0x24   : > { %2961 = vmatpush1.bf16.msra.mxu0 %v5393_v30  ;;  %3634 = vmatpush1.bf16.msra.mxu1 %v5394_v31  ;;  %v5463_v7 = vld [vmem:[%s8596_s1 + $0x4] ss:$16 sps:$4 sm:$0xff]   ;;  %v5466_v10 = vld [vmem:[%s8596_s1 + $0xc] ss:$16 sps:$4 sm:$0xff]   ;;  %v5442_v11 = vld [vmem:[%s5947_s8 + $0x1b0] ss:$8 sps:$4 sm:$0xff]  }
  0x25   : > { %2962 = vmatprep.subr.bf16.mxu0 %v5395_v33  ;;  %3635 = vmatprep.subr.bf16.mxu1 %v5397_v34  ;;  %v5439_v8 = vld [vmem:[%s5947_s8 + $0x1b4] ss:$8 sps:$4 sm:$0xff]   ;;  %v5443_v14 = vld [vmem:[%s5947_s8 + $0xa4] ss:$8 sps:$4 sm:$0xff]   ;;  %v5447_v16 = vld [vmem:[%s5947_s8 + $0xa0] ss:$8 sps:$4 sm:$0xff]  }
  0x26   : > { %774 = vperm.xlu0 %5363, %v596_v35   ;;  %779 = vperm.xlu1 %5364, %v597_v36   ;;  %v630_v13 = vld [vmem:[%s8597_s2 + $0x170] sm:$0xff]  ;;  %v5445_v15 = vld [vmem:[%s5947_s8 + $0x1a4] ss:$8 sps:$4 sm:$0xff]   ;;  %v5448_v17 = vld [vmem:[%s5947_s8 + $0x1a0] ss:$8 sps:$4 sm:$0xff]  }
  0x27   : > { %2984 = vmatprep.mubr.bf16.mxu0 %v5463_v7  ;;  %3657 = vmatprep.mubr.bf16.mxu1 %v5466_v10  ;;  %v631_v18 = vld [vmem:[%s8597_s2 + $0x178] sm:$0xff]  ;;  %v628_v19 = vld [vmem:[%s8597_s2 + $0x160] sm:$0xff]  ;;  %v629_v24 = vld [vmem:[%s8597_s2 + $0x168] sm:$0xff] }
  0x28   : > { %2963 = vmatpush1.bf16.msra.mxu0 %v5399_v37  ;;  %3636 = vmatpush1.bf16.msra.mxu1 %v5400_v38  ;;  %v5449_v20 = vld [vmem:[%s5947_s8 + $0x94] ss:$8 sps:$4 sm:$0xff]   ;;  %v5453_v22 = vld [vmem:[%s5947_s8 + $0x90] ss:$8 sps:$4 sm:$0xff]   ;;  %v5455_v26 = vld [vmem:[%s5947_s8 + $0x84] ss:$8 sps:$4 sm:$0xff]  }
  0x29   : > { %2964 = vmatprep.subr.bf16.mxu0 %v5401_v39  ;;  %3637 = vmatprep.subr.bf16.mxu1 %v5403_v40  ;;  %v5451_v21 = vld [vmem:[%s5947_s8 + $0x194] ss:$8 sps:$4 sm:$0xff]   ;;  %v5454_v23 = vld [vmem:[%s5947_s8 + $0x190] ss:$8 sps:$4 sm:$0xff]   ;;  %v5457_v27 = vld [vmem:[%s5947_s8 + $0x184] ss:$8 sps:$4 sm:$0xff]  }
  0x2a   : > { %784 = vperm.xlu0 %5363, %v598_v41   ;;  %789 = vperm.xlu1 %5364, %v599_v44   ;;  %v626_v25 = vld [vmem:[%s8597_s2 + $0x150] sm:$0xff]  ;;  %v5459_v28 = vld [vmem:[%s5947_s8 + $0x80] ss:$8 sps:$4 sm:$0xff]   ;;  %v627_v30 = vld [vmem:[%s8597_s2 + $0x158] sm:$0xff] }
  0x2b   : > { %v5460_v29 = vld [vmem:[%s5947_s8 + $0x180] ss:$8 sps:$4 sm:$0xff]   ;;  %v5467_v34 = vld [vmem:[%s8596_s1 + $0x24] ss:$16 sps:$4 sm:$0xff]   ;;  %v5469_v36 = vld [vmem:[%s8596_s1 + $0x2c] ss:$16 sps:$4 sm:$0xff]  }
  0x2c   : > { %2965 = vmatpush1.bf16.msra.mxu0 %v5405_v42  ;;  %3638 = vmatpush1.bf16.msra.mxu1 %v5406_v43  ;;  %v624_v31 = vld [vmem:[%s8597_s2 + $0x140] sm:$0xff]  ;;  %v5464_v33 = vld [vmem:[%s8596_s1 + $0x8] ss:$16 sps:$4 sm:$0xff]   ;;  %v622_v37 = vld [vmem:[%s8597_s2 + $0x130] sm:$0xff] }
  0x2d   : > { %2966 = vmatprep.subr.bf16.mxu0 %v5407_v45  ;;  %3639 = vmatprep.subr.bf16.mxu1 %v5409_v46  ;;  %v5461_v32 = vld [vmem:[%s8596_s1] ss:$16 sps:$4 sm:$0xff]   ;;  %v625_v35 = vld [vmem:[%s8597_s2 + $0x148] sm:$0xff]  ;;  %v623_v38 = vld [vmem:[%s8597_s2 + $0x138] sm:$0xff] }
  0x2e   : > { %794 = vperm.xlu0 %5363, %v600_v47   ;;  %799 = vperm.xlu1 %5364, %v601_v48   ;;  %v5471_v39 = vld [vmem:[%s8596_s1 + $0x20] ss:$16 sps:$4 sm:$0xff]   ;;  %v5472_v40 = vld [vmem:[%s8596_s1 + $0x28] ss:$16 sps:$4 sm:$0xff]   ;;  %v5473_v42 = vld [vmem:[%s8596_s1 + $0x44] ss:$16 sps:$4 sm:$0xff]  }
  0x2f   : > { %v620_v41 = vld [vmem:[%s8597_s2 + $0x120] sm:$0xff]  ;;  %v621_v43 = vld [vmem:[%s8597_s2 + $0x128] sm:$0xff]  ;;  %v618_v45 = vld [vmem:[%s8597_s2 + $0x110] sm:$0xff] }
  0x30   : > { %2967 = vmatpush1.bf16.msra.mxu0 %v5411_v49  ;;  %3640 = vmatpush1.bf16.msra.mxu1 %v5412_v50  ;;  %v5475_v44 = vld [vmem:[%s8596_s1 + $0x4c] ss:$16 sps:$4 sm:$0xff]   ;;  %v5477_v47 = vld [vmem:[%s8596_s1 + $0x40] ss:$16 sps:$4 sm:$0xff]   ;;  %v5478_v48 = vld [vmem:[%s8596_s1 + $0x48] ss:$16 sps:$4 sm:$0xff]  }
  0x31   : > { %2968 = vmatprep.subr.bf16.mxu0 %v5413_v51  ;;  %3641 = vmatprep.subr.bf16.mxu1 %v5415_v52  ;;  %v619_v46 = vld [vmem:[%s8597_s2 + $0x118] sm:$0xff]  ;;  %v616_v49 = vld [vmem:[%s8597_s2 + $0x100] sm:$0xff]  ;;  %v617_v51 = vld [vmem:[%s8597_s2 + $0x108] sm:$0xff] }
  0x32   : > { %804 = vperm.xlu0 %5363, %v602_v0   ;;  %809 = vperm.xlu1 %5364, %v603_v4   ;;  %v5479_v50 = vld [vmem:[%s8596_s1 + $0x64] ss:$16 sps:$4 sm:$0xff]   ;;  %v5481_v52 = vld [vmem:[%s8596_s1 + $0x6c] ss:$16 sps:$4 sm:$0xff]   ;;  %v5490_v0 = vld [vmem:[%s8596_s1 + $0x88] ss:$16 sps:$4 sm:$0xff]  }
  0x33   : > { %v5493_v4 = vld [vmem:[%s8596_s1 + $0xac] ss:$16 sps:$4 sm:$0xff]   ;;  %v5495_v7 = vld [vmem:[%s8596_s1 + $0xa0] ss:$16 sps:$4 sm:$0xff]   ;;  %v5497_v10 = vld [vmem:[%s8596_s1 + $0xc4] ss:$16 sps:$4 sm:$0xff]  }
  0x34   : > { %2969 = vmatpush2.bf16.msra.mxu0 %v5417_v53  ;;  %3642 = vmatpush2.bf16.msra.mxu1 %v5418_v54  ;;  %v614_v53 = vld [vmem:[%s8597_s2 + $0xf0] sm:$0xff]  ;;  %v615_v54 = vld [vmem:[%s8597_s2 + $0xf8] sm:$0xff] }
  0x35   : > { %2970 = vmatprep.subr.bf16.mxu0 %v5419_v55  ;;  %3643 = vmatprep.subr.bf16.mxu1 %v5421_v56  ;;  %v5483_v55 = vld [vmem:[%s8596_s1 + $0x60] ss:$16 sps:$4 sm:$0xff]   ;;  %v5484_v56 = vld [vmem:[%s8596_s1 + $0x68] ss:$16 sps:$4 sm:$0xff]  }
  0x36   : > { %814 = vperm.xlu0 %5363, %v604_v5   ;;  %819 = vperm.xlu1 %5364, %v605_v12   ;;  %v610_v5 = vld [vmem:[%s8597_s2 + $0xd0] sm:$0xff]  ;;  %v5499_v12 = vld [vmem:[%s8596_s1 + $0xcc] ss:$16 sps:$4 sm:$0xff]  }
  0x38   : > { %2971 = vmatpush2.bf16.msra.mxu0 %v5423_v57  ;;  %3644 = vmatpush2.bf16.msra.mxu1 %v5424_v58  ;;  %v646_v57 = vld [vmem:[%s8597_s2 + $0x1f0] sm:$0xff] }
  0x39   : > { %2972 = vmatprep.subr.bf16.mxu0 %v5425_v59  ;;  %3645 = vmatprep.subr.bf16.mxu1 %v5427_v60  ;;  %v5485_v58 = vld [vmem:[%s8596_s1 + $0x84] ss:$16 sps:$4 sm:$0xff]   ;;  %v647_v59 = vld [vmem:[%s8597_s2 + $0x1f8] sm:$0xff] }
  0x3a   : > { %944 = vperm.xlu0 %5363, %v630_v13   ;;  %949 = vperm.xlu1 %5364, %v631_v18   ;;  %v5487_v60 = vld [vmem:[%s8596_s1 + $0x8c] ss:$16 sps:$4 sm:$0xff]   ;;  %v608_v13 = vld [vmem:[%s8597_s2 + $0xc0] sm:$0xff] }
  0x3b   : > { %v5503_v18 = vld [vmem:[%s8596_s1 + $0xe4] ss:$16 sps:$4 sm:$0xff]  }
  0x3c   : > { %2973 = vmatpush2.bf16.msra.mxu0 %v5429_v61  ;;  %3646 = vmatpush2.bf16.msra.mxu1 %v5430_v62  ;;  %v612_v61 = vld [vmem:[%s8597_s2 + $0xe0] sm:$0xff]  ;;  %v613_v62 = vld [vmem:[%s8597_s2 + $0xe8] sm:$0xff] }
  0x3d   : > { %2974 = vmatprep.subr.bf16.mxu0 %v5431_v63  ;;  %3647 = vmatprep.subr.bf16.mxu1 %v5433_v1  ;;  %v5489_v63 = vld [vmem:[%s8596_s1 + $0x80] ss:$16 sps:$4 sm:$0xff]  }
  0x3e   : > { %934 = vperm.xlu0 %5363, %v628_v19   ;;  %939 = vperm.xlu1 %5364, %v629_v24   ;;  %v644_v1 = vld [vmem:[%s8597_s2 + $0x1e0] sm:$0xff]  ;;  %v641_v19 = vld [vmem:[%s8597_s2 + $0x1c8] sm:$0xff] }
  0x3f   : > { %v5508_v24 = vld [vmem:[%s8596_s1 + $0xe8] ss:$16 sps:$4 sm:$0xff]  }
  0x40   : > { %2975 = vmatpush2.bf16.msra.mxu0 %v5435_v2  ;;  %3648 = vmatpush2.bf16.msra.mxu1 %v5436_v3  ;;  %v5491_v2 = vld [vmem:[%s8596_s1 + $0xa4] ss:$16 sps:$4 sm:$0xff]   ;;  %v645_v3 = vld [vmem:[%s8597_s2 + $0x1e8] sm:$0xff] }
  0x41   : > { %2976 = vmatprep.subr.bf16.mxu0 %v5437_v6  ;;  %3649 = vmatprep.subr.bf16.mxu1 %v5439_v8  ;;  %v611_v6 = vld [vmem:[%s8597_s2 + $0xd8] sm:$0xff] }
  0x42   : > { %924 = vperm.xlu0 %5363, %v626_v25   ;;  %929 = vperm.xlu1 %5364, %v627_v30   ;;  %v5496_v8 = vld [vmem:[%s8596_s1 + $0xa8] ss:$16 sps:$4 sm:$0xff]   ;;  %v638_v25 = vld [vmem:[%s8597_s2 + $0x1b0] sm:$0xff] }
  0x43   : > { %v637_v30 = vld [vmem:[%s8597_s2 + $0x1a8] sm:$0xff] }
  0x44   : > { %2977 = vmatpush2.bf16.msra.mxu0 %v5441_v9  ;;  %3650 = vmatpush2.bf16.msra.mxu1 %v5442_v11  ;;  %v642_v9 = vld [vmem:[%s8597_s2 + $0x1d0] sm:$0xff]  ;;  %v643_v11 = vld [vmem:[%s8597_s2 + $0x1d8] sm:$0xff] }
  0x45   : > { %2978 = vmatprep.subr.bf16.mxu0 %v5443_v14  ;;  %3651 = vmatprep.subr.bf16.mxu1 %v5445_v15  ;;  %v609_v14 = vld [vmem:[%s8597_s2 + $0xc8] sm:$0xff]  ;;  %v5501_v15 = vld [vmem:[%s8596_s1 + $0xc0] ss:$16 sps:$4 sm:$0xff]  }
  0x46   : > { %914 = vperm.xlu0 %5363, %v624_v31   ;;  %919 = vperm.xlu1 %5364, %v625_v35   ;;  %v5513_v31 = vld [vmem:[%s8596_s1 + $0x100] ss:$16 sps:$4 sm:$0xff]   ;;  %v635_v35 = vld [vmem:[%s8597_s2 + $0x198] sm:$0xff] }
  0x48   : > { %2979 = vmatpush2.bf16.msra.mxu0 %v5447_v16  ;;  %3652 = vmatpush2.bf16.msra.mxu1 %v5448_v17  ;;  %v5502_v16 = vld [vmem:[%s8596_s1 + $0xc8] ss:$16 sps:$4 sm:$0xff]   ;;  %v640_v17 = vld [vmem:[%s8597_s2 + $0x1c0] sm:$0xff] }
  0x49   : > { %2980 = vmatprep.subr.bf16.mxu0 %v5449_v20  ;;  %3653 = vmatprep.subr.bf16.mxu1 %v5451_v21  ;;  %v5505_v20 = vld [vmem:[%s8596_s1 + $0xec] ss:$16 sps:$4 sm:$0xff]   ;;  %v606_v21 = vld [vmem:[%s8597_s2 + $0xb0] sm:$0xff] }
  0x4a   : > { %904 = vperm.xlu0 %5363, %v622_v37   ;;  %909 = vperm.xlu1 %5364, %v623_v38   ;;  %v632_v37 = vld [vmem:[%s8597_s2 + $0x180] sm:$0xff]  ;;  %v633_v38 = vld [vmem:[%s8597_s2 + $0x188] sm:$0xff] }
  0x4c   : > { %2981 = vmatpush2.bf16.msra.mxu0 %v5453_v22  ;;  %3654 = vmatpush2.bf16.msra.mxu1 %v5454_v23  ;;  %v607_v22 = vld [vmem:[%s8597_s2 + $0xb8] sm:$0xff]  ;;  %v5507_v23 = vld [vmem:[%s8596_s1 + $0xe0] ss:$16 sps:$4 sm:$0xff]  }
  0x4d   : > { %2982 = vmatprep.subr.bf16.mxu0 %v5455_v26  ;;  %3655 = vmatprep.subr.bf16.mxu1 %v5457_v27  ;;  %v5509_v26 = vld [vmem:[%s8596_s1 + $0x104] ss:$16 sps:$4 sm:$0xff]   ;;  %v639_v27 = vld [vmem:[%s8597_s2 + $0x1b8] sm:$0xff] }
  0x4e   : > { %894 = vperm.xlu0 %5363, %v620_v41   ;;  %899 = vperm.xlu1 %5364, %v621_v43   ;;  %v662_v41 = vld [vmem:[%s8597_s2 + $0x270] sm:$0xff]  ;;  %v663_v43 = vld [vmem:[%s8597_s2 + $0x278] sm:$0xff] }
  0x50   : > { %2983 = vmatpush2.bf16.msra.mxu0 %v5459_v28  ;;  %3656 = vmatpush2.bf16.msra.mxu1 %v5460_v29  ;;  %v5511_v28 = vld [vmem:[%s8596_s1 + $0x10c] ss:$16 sps:$4 sm:$0xff]   ;;  %v636_v29 = vld [vmem:[%s8597_s2 + $0x1a0] sm:$0xff] }
  0x52   : > { %884 = vperm.xlu0 %5363, %v618_v45   ;;  %889 = vperm.xlu1 %5364, %v619_v46   ;;  %v694_v45 = vld [vmem:[%s8597_s2 + $0x370] sm:$0xff]  ;;  %v695_v46 = vld [vmem:[%s8597_s2 + $0x378] sm:$0xff] }
  0x53   : > { %2985 = vmatmul.mubr.bf16.vlgmr.msra.gmra.mxu0 %v5461_v32  ;;  %3658 = vmatmul.mubr.bf16.vlgmr.msra.gmra.mxu1 %v5464_v33  ;;  %v5514_v32 = vld [vmem:[%s8596_s1 + $0x108] ss:$16 sps:$4 sm:$0xff]   ;;  %v634_v33 = vld [vmem:[%s8597_s2 + $0x190] sm:$0xff] }
  0x54   : > { %2994 = vmatprep.mubr.bf16.mxu0 %v5467_v34  ;;  %3667 = vmatprep.mubr.bf16.mxu1 %v5469_v36  ;;  %v5515_v34 = vld [vmem:[%s8596_s1 + $0x124] ss:$16 sps:$4 sm:$0xff]   ;;  %v5517_v36 = vld [vmem:[%s8596_s1 + $0x12c] ss:$16 sps:$4 sm:$0xff]  }
  0x56   : > { %874 = vperm.xlu0 %5363, %v616_v49   ;;  %879 = vperm.xlu1 %5364, %v617_v51   ;;  %v5526_v49 = vld [vmem:[%s8596_s1 + $0x148] ss:$16 sps:$4 sm:$0xff]   ;;  %v5527_v51 = vld [vmem:[%s8596_s1 + $0x164] ss:$16 sps:$4 sm:$0xff]  }
  0x5a   : > { %864 = vperm.xlu0 %5363, %v614_v53   ;;  %869 = vperm.xlu1 %5364, %v615_v54   ;;  %v692_v53 = vld [vmem:[%s8597_s2 + $0x360] sm:$0xff]  ;;  %v693_v54 = vld [vmem:[%s8597_s2 + $0x368] sm:$0xff] }
  0x5b   : > { %2995 = vmatmul.mubr.bf16.gmra.mxu0 %v5471_v39  ;;  %3668 = vmatmul.mubr.bf16.gmra.mxu1 %v5472_v40  ;;  %v5519_v39 = vld [vmem:[%s8596_s1 + $0x120] ss:$16 sps:$4 sm:$0xff]   ;;  %v5520_v40 = vld [vmem:[%s8596_s1 + $0x128] ss:$16 sps:$4 sm:$0xff]  }
  0x5c   : > { %3004 = vmatprep.mubr.bf16.mxu0 %v5473_v42  ;;  %3677 = vmatprep.mubr.bf16.mxu1 %v5475_v44  ;;  %v5521_v42 = vld [vmem:[%s8596_s1 + $0x144] ss:$16 sps:$4 sm:$0xff]   ;;  %v5523_v44 = vld [vmem:[%s8596_s1 + $0x14c] ss:$16 sps:$4 sm:$0xff]  }
  0x5e   : > { %1024 = vperm.xlu0 %5363, %v646_v57   ;;  %1029 = vperm.xlu1 %5364, %v647_v59   ;;  %v658_v57 = vld [vmem:[%s8597_s2 + $0x250] sm:$0xff] }
  0x5f   : > { %v5533_v59 = vld [vmem:[%s8596_s1 + $0x184] ss:$16 sps:$4 sm:$0xff]  }
  0x62   : > { %854 = vperm.xlu0 %5363, %v612_v61   ;;  %859 = vperm.xlu1 %5364, %v613_v62   ;;  %v690_v61 = vld [vmem:[%s8597_s2 + $0x350] sm:$0xff]  ;;  %v691_v62 = vld [vmem:[%s8597_s2 + $0x358] sm:$0xff] }
  0x63   : > { %3005 = vmatmul.mubr.bf16.gmra.mxu0 %v5477_v47  ;;  %3678 = vmatmul.mubr.bf16.gmra.mxu1 %v5478_v48  ;;  %v5525_v47 = vld [vmem:[%s8596_s1 + $0x140] ss:$16 sps:$4 sm:$0xff]  }
  0x64   : > { %3014 = vmatprep.mubr.bf16.mxu0 %v5479_v50  ;;  %3687 = vmatprep.mubr.bf16.mxu1 %v5481_v52  ;;  %v660_v48 = vld [vmem:[%s8597_s2 + $0x260] sm:$0xff]  ;;  %v661_v50 = vld [vmem:[%s8597_s2 + $0x268] sm:$0xff] }
  0x65   : > { %v5529_v52 = vld [vmem:[%s8596_s1 + $0x16c] ss:$16 sps:$4 sm:$0xff]  }
  0x66   : > { %1014 = vperm.xlu0 %5363, %v644_v1   ;;  %1019 = vperm.xlu1 %5364, %v645_v3   ;;  %v656_v1 = vld [vmem:[%s8597_s2 + $0x240] sm:$0xff] }
  0x67   : > { %v5539_v3 = vld [vmem:[%s8596_s1 + $0x1a4] ss:$16 sps:$4 sm:$0xff]  }
  0x6a   : > { %844 = vperm.xlu0 %5363, %v610_v5   ;;  %849 = vperm.xlu1 %5364, %v611_v6   ;;  %v688_v5 = vld [vmem:[%s8597_s2 + $0x340] sm:$0xff]  ;;  %v689_v6 = vld [vmem:[%s8597_s2 + $0x348] sm:$0xff] }
  0x6b   : > { %3015 = vmatmul.mubr.bf16.gmra.mxu0 %v5483_v55  ;;  %3688 = vmatmul.mubr.bf16.gmra.mxu1 %v5484_v56  ;;  %v5531_v55 = vld [vmem:[%s8596_s1 + $0x160] ss:$16 sps:$4 sm:$0xff]   ;;  %v5532_v56 = vld [vmem:[%s8596_s1 + $0x168] ss:$16 sps:$4 sm:$0xff]  }
  0x6c   : > { %3024 = vmatprep.mubr.bf16.mxu0 %v5485_v58  ;;  %3697 = vmatprep.mubr.bf16.mxu1 %v5487_v60  ;;  %v659_v58 = vld [vmem:[%s8597_s2 + $0x258] sm:$0xff] }
  0x6d   : > { %v5535_v60 = vld [vmem:[%s8596_s1 + $0x18c] ss:$16 sps:$4 sm:$0xff]  }
  0x6e   : > { %1004 = vperm.xlu0 %5363, %v642_v9   ;;  %1009 = vperm.xlu1 %5364, %v643_v11   ;;  %v5544_v9 = vld [vmem:[%s8596_s1 + $0x1a8] ss:$16 sps:$4 sm:$0xff]   ;;  %v5545_v11 = vld [vmem:[%s8596_s1 + $0x1c4] ss:$16 sps:$4 sm:$0xff]  }
  0x72   : > { %834 = vperm.xlu0 %5363, %v608_v13   ;;  %839 = vperm.xlu1 %5364, %v609_v14   ;;  %v686_v13 = vld [vmem:[%s8597_s2 + $0x330] sm:$0xff]  ;;  %v687_v14 = vld [vmem:[%s8597_s2 + $0x338] sm:$0xff] }
  0x73   : > { %3025 = vmatmul.mubr.bf16.gmra.mxu0 %v5489_v63  ;;  %3698 = vmatmul.mubr.bf16.gmra.mxu1 %v5490_v0  ;;  %v5537_v63 = vld [vmem:[%s8596_s1 + $0x180] ss:$16 sps:$4 sm:$0xff]   ;;  %v5538_v0 = vld [vmem:[%s8596_s1 + $0x188] ss:$16 sps:$4 sm:$0xff]  }
  0x74   : > { %3034 = vmatprep.mubr.bf16.mxu0 %v5491_v2  ;;  %3707 = vmatprep.mubr.bf16.mxu1 %v5493_v4  ;;  %v657_v2 = vld [vmem:[%s8597_s2 + $0x248] sm:$0xff] }
  0x75   : > { %v5541_v4 = vld [vmem:[%s8596_s1 + $0x1ac] ss:$16 sps:$4 sm:$0xff]  }
  0x76   : > { %994 = vperm.xlu0 %5363, %v640_v17   ;;  %999 = vperm.xlu1 %5364, %v641_v19   ;;  %v5550_v17 = vld [vmem:[%s8596_s1 + $0x1c8] ss:$16 sps:$4 sm:$0xff]  }
  0x7a   : > { %824 = vperm.xlu0 %5363, %v606_v21   ;;  %829 = vperm.xlu1 %5364, %v607_v22   ;;  %v5553_v21 = vld [vmem:[%s8596_s1 + $0x1ec] ss:$16 sps:$4 sm:$0xff]   ;;  %v684_v22 = vld [vmem:[%s8597_s2 + $0x320] sm:$0xff] }
  0x7b   : > { %3035 = vmatmul.mubr.bf16.gmra.mxu0 %v5495_v7  ;;  %3708 = vmatmul.mubr.bf16.gmra.mxu1 %v5496_v8  ;;  %v654_v7 = vld [vmem:[%s8597_s2 + $0x230] sm:$0xff] }
  0x7c   : > { %3044 = vmatprep.mubr.bf16.mxu0 %v5497_v10  ;;  %3717 = vmatprep.mubr.bf16.mxu1 %v5499_v12  ;;  %v5543_v8 = vld [vmem:[%s8596_s1 + $0x1a0] ss:$16 sps:$4 sm:$0xff]   ;;  %v655_v10 = vld [vmem:[%s8597_s2 + $0x238] sm:$0xff] }
  0x7d   : > { %v5547_v12 = vld [vmem:[%s8596_s1 + $0x1cc] ss:$16 sps:$4 sm:$0xff]  }
  0x7e   : > { %984 = vperm.xlu0 %5363, %v638_v25   ;;  %989 = vperm.xlu1 %5364, %v639_v27   ;;  %v5555_v27 = vld [vmem:[%s8596_s1 + $0x1e0] ss:$16 sps:$4 sm:$0xff]  }
  0x82   : > { %974 = vperm.xlu0 %5363, %v636_v29   ;;  %979 = vperm.xlu1 %5364, %v637_v30   ;;  %v651_v29 = vld [vmem:[%s8597_s2 + $0x218] sm:$0xff] }
  0x83   : > { %3045 = vmatmul.mubr.bf16.gmra.mxu0 %v5501_v15  ;;  %3718 = vmatmul.mubr.bf16.gmra.mxu1 %v5502_v16  ;;  %v652_v15 = vld [vmem:[%s8597_s2 + $0x220] sm:$0xff] }
  0x84   : > { %3054 = vmatprep.mubr.bf16.mxu0 %v5503_v18  ;;  %3727 = vmatprep.mubr.bf16.mxu1 %v5505_v20  ;;  %v5549_v16 = vld [vmem:[%s8596_s1 + $0x1c0] ss:$16 sps:$4 sm:$0xff]   ;;  %v653_v18 = vld [vmem:[%s8597_s2 + $0x228] sm:$0xff]  ;;  %v5551_v20 = vld [vmem:[%s8596_s1 + $0x1e4] ss:$16 sps:$4 sm:$0xff]  }
  0x86   : > { %964 = vperm.xlu0 %5363, %v634_v33   ;;  %969 = vperm.xlu1 %5364, %v635_v35   ;;  %v682_v33 = vld [vmem:[%s8597_s2 + $0x310] sm:$0xff] }
  0x89   : > { %v6439_v19 = vpop.permute.xlu0 %714 }
  0x8a   : > { %954 = vperm.xlu0 %5363, %v632_v37   ;;  %959 = vperm.xlu1 %5364, %v633_v38   ;;  %v5561_v37 = vld [vmem:[%s8596_s1 + $0x200] ss:$16 sps:$4 sm:$0xff]   ;;  %v5562_v38 = vld [vmem:[%s8596_s1 + $0x208] ss:$16 sps:$4 sm:$0xff]  }
  0x8b   : > { %3055 = vmatmul.mubr.bf16.gmra.mxu0 %v5507_v23  ;;  %3728 = vmatmul.mubr.bf16.gmra.mxu1 %v5508_v24  ;;  %v685_v23 = vld [vmem:[%s8597_s2 + $0x328] sm:$0xff]  ;;  %v6453_v24 = vpop.permute.xlu1 %724 }
  0x8c   : > { %3064 = vmatprep.mubr.bf16.mxu0 %v5509_v26  ;;  %3737 = vmatprep.mubr.bf16.mxu1 %v5511_v28  ;;  %v650_v26 = vld [vmem:[%s8597_s2 + $0x210] sm:$0xff]  ;;  %v5556_v28 = vld [vmem:[%s8596_s1 + $0x1e8] ss:$16 sps:$4 sm:$0xff]  }
  0x8d   : > { %v6455_v25 = vpop.permute.xlu0 %719 }
  0x8e   : > { %1104 = vperm.xlu0 %5363, %v662_v41   ;;  %1109 = vperm.xlu1 %5364, %v663_v43   ;;  %v5565_v43 = vld [vmem:[%s8596_s1 + $0x22c] ss:$16 sps:$4 sm:$0xff]  }
  0x8f   : > { %v6469_v30 = vpop.permute.xlu1 %729 }
  0x91   : > { %v6483_v35 = vpop.permute.xlu0 %734 }
  0x92   : > { %1264 = vperm.xlu0 %5363, %v694_v45   ;;  %1269 = vperm.xlu1 %5364, %v695_v46   ;;  %v681_v45 = vld [vmem:[%s8597_s2 + $0x308] sm:$0xff] }
  0x93   : > { %3065 = vmatmul.mubr.bf16.gmra.mxu0 %v5513_v31  ;;  %3738 = vmatmul.mubr.bf16.gmra.mxu1 %v5514_v32  ;;  %v5557_v31 = vld [vmem:[%s8596_s1 + $0x204] ss:$16 sps:$4 sm:$0xff]   ;;  %v5559_v32 = vld [vmem:[%s8596_s1 + $0x20c] ss:$16 sps:$4 sm:$0xff]  }
  0x94   : > { %3074 = vmatprep.mubr.bf16.mxu0 %v5515_v34  ;;  %3747 = vmatprep.mubr.bf16.mxu1 %v5517_v36  ;;  %v683_v34 = vld [vmem:[%s8597_s2 + $0x318] sm:$0xff]  ;;  %v648_v36 = vld [vmem:[%s8597_s2 + $0x200] sm:$0xff] }
  0x95   : > { %v6499_v41 = vpop.permute.xlu0 %744 }
  0x96   : > { %1094 = vperm.xlu0 %5363, %v660_v48   ;;  %1099 = vperm.xlu1 %5364, %v661_v50   ;;  %v5567_v48 = vld [vmem:[%s8596_s1 + $0x220] ss:$16 sps:$4 sm:$0xff]   ;;  %v679_v50 = vld [vmem:[%s8597_s2 + $0x2f8] sm:$0xff] }
  0x9a   : > { %1254 = vperm.xlu0 %5363, %v692_v53   ;;  %1259 = vperm.xlu1 %5364, %v693_v54   ;;  %v5571_v53 = vld [vmem:[%s8596_s1 + $0x24c] ss:$16 sps:$4 sm:$0xff]   ;;  %v710_v54 = vld [vmem:[%s8597_s2 + $0x3f0] sm:$0xff] }
  0x9b   : > { %3075 = vmatmul.mubr.bf16.gmra.mxu0 %v5519_v39  ;;  %3748 = vmatmul.mubr.bf16.gmra.mxu1 %v5520_v40  ;;  %v649_v39 = vld [vmem:[%s8597_s2 + $0x208] sm:$0xff]  ;;  %v6497_v40 = vpop.permute.xlu1 %739 }
  0x9c   : > { %3084 = vmatprep.mubr.bf16.mxu0 %v5521_v42  ;;  %3757 = vmatprep.mubr.bf16.mxu1 %v5523_v44  ;;  %v5563_v42 = vld [vmem:[%s8596_s1 + $0x224] ss:$16 sps:$4 sm:$0xff]  }
  0x9d   : > { %v680_v44 = vld [vmem:[%s8597_s2 + $0x300] sm:$0xff] }
  0x9e   : > { %1084 = vperm.xlu0 %5363, %v658_v57   ;;  %1089 = vperm.xlu1 %5364, %v659_v58   ;;  %v676_v58 = vld [vmem:[%s8597_s2 + $0x2e0] sm:$0xff] }
  0x9f   : > { %v6513_v46 = vpop.permute.xlu1 %749 }
  0xa2   : > { %1244 = vperm.xlu0 %5363, %v690_v61   ;;  %1249 = vperm.xlu1 %5364, %v691_v62   ;;  %v677_v61 = vld [vmem:[%s8597_s2 + $0x2e8] sm:$0xff]  ;;  %v5575_v62 = vld [vmem:[%s8596_s1 + $0x264] ss:$16 sps:$4 sm:$0xff]  }
  0xa3   : > { %3085 = vmatmul.mubr.bf16.gmra.mxu0 %v5525_v47  ;;  %3758 = vmatmul.mubr.bf16.gmra.mxu1 %v5526_v49  ;;  %v678_v47 = vld [vmem:[%s8597_s2 + $0x2f0] sm:$0xff]  ;;  %v5568_v49 = vld [vmem:[%s8596_s1 + $0x228] ss:$16 sps:$4 sm:$0xff]  }
  0xa4   : > { %3094 = vmatprep.mubr.bf16.mxu0 %v5527_v51  ;;  %3767 = vmatprep.mubr.bf16.mxu1 %v5529_v52  ;;  %v6527_v51 = vpop.permute.xlu0 %754  ;;  %v5569_v52 = vld [vmem:[%s8596_s1 + $0x244] ss:$16 sps:$4 sm:$0xff]  }
  0xa6   : > { %1074 = vperm.xlu0 %5363, %v656_v1   ;;  %1079 = vperm.xlu1 %5364, %v657_v2   ;;  %v708_v2 = vld [vmem:[%s8597_s2 + $0x3e0] sm:$0xff] }
  0xa8   : > { %v6543_v57 = vpop.permute.xlu0 %764 }
  0xaa   : > { %1234 = vperm.xlu0 %5363, %v688_v5   ;;  %1239 = vperm.xlu1 %5364, %v689_v6   ;;  %v674_v5 = vld [vmem:[%s8597_s2 + $0x2d0] sm:$0xff] }
  0xab   : > { %3095 = vmatmul.mubr.bf16.gmra.mxu0 %v5531_v55  ;;  %3768 = vmatmul.mubr.bf16.gmra.mxu1 %v5532_v56  ;;  %v6538_v55 = vpop.permute.xlu1 %759  ;;  %v711_v56 = vld [vmem:[%s8597_s2 + $0x3f8] sm:$0xff]  ;;  %v5579_v6 = vld [vmem:[%s8596_s1 + $0x260] ss:$16 sps:$4 sm:$0xff]  }
  0xac   : > { %3104 = vmatprep.mubr.bf16.mxu0 %v5533_v59  ;;  %3777 = vmatprep.mubr.bf16.mxu1 %v5535_v60  ;;  %v5573_v59 = vld [vmem:[%s8596_s1 + $0x240] ss:$16 sps:$4 sm:$0xff]   ;;  %v5574_v60 = vld [vmem:[%s8596_s1 + $0x248] ss:$16 sps:$4 sm:$0xff]   ;;  %v6565_v1 = vpop.permute.xlu0 %774 }
  0xae   : > { %1064 = vperm.xlu0 %5363, %v654_v7   ;;  %1069 = vperm.xlu1 %5364, %v655_v10   ;;  %v5580_v7 = vld [vmem:[%s8596_s1 + $0x268] ss:$16 sps:$4 sm:$0xff]   ;;  %v5581_v10 = vld [vmem:[%s8596_s1 + $0x284] ss:$16 sps:$4 sm:$0xff]  }
  0xb2   : > { %1224 = vperm.xlu0 %5363, %v686_v13   ;;  %1229 = vperm.xlu1 %5364, %v687_v14   ;;  %v707_v13 = vld [vmem:[%s8597_s2 + $0x3d8] sm:$0xff] }
  0xb3   : > { %3105 = vmatmul.mubr.bf16.gmra.mxu0 %v5537_v63  ;;  %3778 = vmatmul.mubr.bf16.gmra.mxu1 %v5538_v0  ;;  %v5577_v63 = vld [vmem:[%s8596_s1 + $0x26c] ss:$16 sps:$4 sm:$0xff]   ;;  %v6563_v0 = vpop.permute.xlu1 %769 }
  0xb4   : > { %3114 = vmatprep.mubr.bf16.mxu0 %v5539_v3  ;;  %3787 = vmatprep.mubr.bf16.mxu1 %v5541_v4  ;;  %v709_v3 = vld [vmem:[%s8597_s2 + $0x3e8] sm:$0xff] }
  0xb6   : > { %1054 = vperm.xlu0 %5363, %v652_v15   ;;  %1059 = vperm.xlu1 %5364, %v653_v18   ;;  %v5586_v18 = vld [vmem:[%s8596_s1 + $0x288] ss:$16 sps:$4 sm:$0xff]  }
  0xb7   : > { %v6573_v4 = vpop.permute.xlu1 %779 }
  0xba   : > { %1214 = vperm.xlu0 %5363, %v684_v22   ;;  %1219 = vperm.xlu1 %5364, %v685_v23   ;;  %v5589_v22 = vld [vmem:[%s8596_s1 + $0x2ac] ss:$16 sps:$4 sm:$0xff]  }
  0xbb   : > { %3115 = vmatmul.mubr.bf16.gmra.mxu0 %v5543_v8  ;;  %3788 = vmatmul.mubr.bf16.gmra.mxu1 %v5544_v9  ;;  %v675_v8 = vld [vmem:[%s8597_s2 + $0x2d8] sm:$0xff]  ;;  %v6587_v9 = vpop.permute.xlu0 %784  ;;  %v6601_v14 = vpop.permute.xlu1 %789 }
  0xbc   : > { %3124 = vmatprep.mubr.bf16.mxu0 %v5545_v11  ;;  %3797 = vmatprep.mubr.bf16.mxu1 %v5547_v12  ;;  %v5583_v11 = vld [vmem:[%s8596_s1 + $0x28c] ss:$16 sps:$4 sm:$0xff]   ;;  %v706_v12 = vld [vmem:[%s8597_s2 + $0x3d0] sm:$0xff] }
  0xbe   : > { %1044 = vperm.xlu0 %5363, %v650_v26   ;;  %1049 = vperm.xlu1 %5364, %v651_v29   ;;  %v704_v26 = vld [vmem:[%s8597_s2 + $0x3c0] sm:$0xff]  ;;  %v670_v29 = vld [vmem:[%s8597_s2 + $0x2b0] sm:$0xff] }
  0xbf   : > { %v6603_v15 = vpop.permute.xlu0 %794  ;;  %v6623_v23 = vpop.permute.xlu1 %799 }
  0xc2   : > { %1204 = vperm.xlu0 %5363, %v682_v33   ;;  %1209 = vperm.xlu1 %5364, %v683_v34   ;;  %v671_v33 = vld [vmem:[%s8597_s2 + $0x2b8] sm:$0xff] }
  0xc3   : > { %3125 = vmatmul.mubr.bf16.gmra.mxu0 %v5549_v16  ;;  %3798 = vmatmul.mubr.bf16.gmra.mxu1 %v5550_v17  ;;  %v672_v16 = vld [vmem:[%s8597_s2 + $0x2c0] sm:$0xff]  ;;  %v6645_v34 = vpop.permute.xlu1 %809 }
  0xc4   : > { %3134 = vmatprep.mubr.bf16.mxu0 %v5551_v20  ;;  %3807 = vmatprep.mubr.bf16.mxu1 %v5553_v21  ;;  %v5585_v17 = vld [vmem:[%s8596_s1 + $0x280] ss:$16 sps:$4 sm:$0xff]   ;;  %v673_v20 = vld [vmem:[%s8597_s2 + $0x2c8] sm:$0xff]  ;;  %v5587_v21 = vld [vmem:[%s8596_s1 + $0x2a4] ss:$16 sps:$4 sm:$0xff]  }
  0xc6   : > { %1034 = vperm.xlu0 %5363, %v648_v36   ;;  %1039 = vperm.xlu1 %5364, %v649_v39   ;;  %v5593_v36 = vld [vmem:[%s8596_s1 + $0x2c4] ss:$16 sps:$4 sm:$0xff]  }
  0xc7   : > { %v702_v39 = vld [vmem:[%s8597_s2 + $0x3b0] sm:$0xff] }
  0xca   : > { %1194 = vperm.xlu0 %5363, %v680_v44   ;;  %1199 = vperm.xlu1 %5364, %v681_v45   ;;  %v668_v44 = vld [vmem:[%s8597_s2 + $0x2a0] sm:$0xff] }
  0xcb   : > { %3135 = vmatmul.mubr.bf16.gmra.mxu0 %v5555_v27  ;;  %3808 = vmatmul.mubr.bf16.gmra.mxu1 %v5556_v28  ;;  %v705_v27 = vld [vmem:[%s8597_s2 + $0x3c8] sm:$0xff]  ;;  %v6631_v28 = vpop.permute.xlu0 %804  ;;  %v5597_v45 = vld [vmem:[%s8596_s1 + $0x2c0] ss:$16 sps:$4 sm:$0xff]  }
  0xcc   : > { %3144 = vmatprep.mubr.bf16.mxu0 %v5557_v31  ;;  %3817 = vmatprep.mubr.bf16.mxu1 %v5559_v32  ;;  %v5591_v31 = vld [vmem:[%s8596_s1 + $0x2a0] ss:$16 sps:$4 sm:$0xff]   ;;  %v5592_v32 = vld [vmem:[%s8596_s1 + $0x2a8] ss:$16 sps:$4 sm:$0xff]  }
  0xce   : > { %1184 = vperm.xlu0 %5363, %v678_v47   ;;  %1189 = vperm.xlu1 %5364, %v679_v50   ;;  %v5598_v47 = vld [vmem:[%s8596_s1 + $0x2c8] ss:$16 sps:$4 sm:$0xff]   ;;  %v5599_v50 = vld [vmem:[%s8596_s1 + $0x2e4] ss:$16 sps:$4 sm:$0xff]  }
  0xd2   : > { %1344 = vperm.xlu0 %5363, %v710_v54   ;;  %1349 = vperm.xlu1 %5364, %v711_v56   ;;  %v701_v54 = vld [vmem:[%s8597_s2 + $0x3a8] sm:$0xff] }
  0xd3   : > { %3145 = vmatmul.mubr.bf16.gmra.mxu0 %v5561_v37  ;;  %3818 = vmatmul.mubr.bf16.gmra.mxu1 %v5562_v38  ;;  %v5595_v37 = vld [vmem:[%s8596_s1 + $0x2cc] ss:$16 sps:$4 sm:$0xff]   ;;  %v6653_v38 = vpop.permute.xlu0 %814 }
  0xd4   : > { %3154 = vmatprep.mubr.bf16.mxu0 %v5563_v42  ;;  %3827 = vmatprep.mubr.bf16.mxu1 %v5565_v43  ;;  %8690 = vst [vmem:[#allocation2_spill] sm:$0xff] %v6653_v38  ;;  %v703_v42 = vld [vmem:[%s8597_s2 + $0x3b8] sm:$0xff]  ;;  %v6661_v43 = vpop.permute.xlu1 %819 }
  0xd5   : > { %8691 = vst [vmem:[#allocation3_spill] sm:$0xff] %v6661_v43 }
  0xd6   : > { %1174 = vperm.xlu0 %5363, %v676_v58   ;;  %1179 = vperm.xlu1 %5364, %v677_v61   ;;  %v5604_v61 = vld [vmem:[%s8596_s1 + $0x2e8] ss:$16 sps:$4 sm:$0xff]  }
  0xd8   : > { %v6689_v56 = vpop.permute.xlu1 %949 }
  0xd9   : > { %8693 = vst [vmem:[#allocation5_spill] sm:$0xff] %v6689_v56 }
  0xda   : > { %1334 = vperm.xlu0 %5363, %v708_v2   ;;  %1339 = vperm.xlu1 %5364, %v709_v3   ;;  %v5608_v2 = vld [vmem:[%s8596_s1 + $0x30c] ss:$16 sps:$4 sm:$0xff]  }
  0xdb   : > { %3155 = vmatmul.mubr.bf16.gmra.mxu0 %v5567_v48  ;;  %3828 = vmatmul.mubr.bf16.gmra.mxu1 %v5568_v49  ;;  %v669_v48 = vld [vmem:[%s8597_s2 + $0x2a8] sm:$0xff]  ;;  %v6675_v49 = vpop.permute.xlu0 %944 }
  0xdc   : > { %3164 = vmatprep.mubr.bf16.mxu0 %v5569_v52  ;;  %3837 = vmatprep.mubr.bf16.mxu1 %v5571_v53  ;;  %8692 = vst [vmem:[#allocation4_spill] sm:$0xff] %v6675_v49  ;;  %v5601_v52 = vld [vmem:[%s8596_s1 + $0x2ec] ss:$16 sps:$4 sm:$0xff]   ;;  %v700_v53 = vld [vmem:[%s8597_s2 + $0x3a0] sm:$0xff]  ;;  %v6711_v3 = vpop.permute.xlu1 %939 }
  0xdd   : > { %8695 = vst [vmem:[#allocation7_spill] sm:$0xff] %v6711_v3 }
  0xde   : > { %1164 = vperm.xlu0 %5363, %v674_v5   ;;  %1169 = vperm.xlu1 %5364, %v675_v8   ;;  %v698_v5 = vld [vmem:[%s8597_s2 + $0x390] sm:$0xff]  ;;  %v664_v8 = vld [vmem:[%s8597_s2 + $0x280] sm:$0xff] }
  0xdf   : > { %v6691_v58 = vpop.permute.xlu0 %934 }
  0xe0   : > { %8694 = vst [vmem:[#allocation6_spill] sm:$0xff] %v6691_v58 }
  0xe2   : > { %1324 = vperm.xlu0 %5363, %v706_v12   ;;  %1329 = vperm.xlu1 %5364, %v707_v13   ;;  %v665_v12 = vld [vmem:[%s8597_s2 + $0x288] sm:$0xff]  ;;  %v6733_v13 = vpop.permute.xlu1 %929 }
  0xe3   : > { %3165 = vmatmul.mubr.bf16.gmra.mxu0 %v5573_v59  ;;  %3838 = vmatmul.mubr.bf16.gmra.mxu1 %v5574_v60  ;;  %v666_v59 = vld [vmem:[%s8597_s2 + $0x290] sm:$0xff]  ;;  %8697 = vst [vmem:[#allocation9_spill] sm:$0xff] %v6733_v13 }
  0xe4   : > { %3174 = vmatprep.mubr.bf16.mxu0 %v5575_v62  ;;  %3847 = vmatprep.mubr.bf16.mxu1 %v5577_v63  ;;  %v5603_v60 = vld [vmem:[%s8596_s1 + $0x2e0] ss:$16 sps:$4 sm:$0xff]   ;;  %v667_v62 = vld [vmem:[%s8597_s2 + $0x298] sm:$0xff]  ;;  %v5605_v63 = vld [vmem:[%s8596_s1 + $0x304] ss:$16 sps:$4 sm:$0xff]  }
  0xe6   : > { %1154 = vperm.xlu0 %5363, %v672_v16   ;;  %1159 = vperm.xlu1 %5364, %v673_v20   ;;  %v5611_v16 = vld [vmem:[%s8596_s1 + $0x324] ss:$16 sps:$4 sm:$0xff]  }
  0xe7   : > { %v696_v20 = vld [vmem:[%s8597_s2 + $0x380] sm:$0xff] }
  0xea   : > { %1314 = vperm.xlu0 %5363, %v704_v26   ;;  %1319 = vperm.xlu1 %5364, %v705_v27   ;;  %v697_v26 = vld [vmem:[%s8597_s2 + $0x388] sm:$0xff] }
  0xeb   : > { %3175 = vmatmul.mubr.bf16.gmra.mxu0 %v5579_v6  ;;  %3848 = vmatmul.mubr.bf16.gmra.mxu1 %v5580_v7  ;;  %v699_v6 = vld [vmem:[%s8597_s2 + $0x398] sm:$0xff]  ;;  %v6719_v7 = vpop.permute.xlu0 %924 }
  0xec   : > { %3184 = vmatprep.mubr.bf16.mxu0 %v5581_v10  ;;  %3857 = vmatprep.mubr.bf16.mxu1 %v5583_v11  ;;  %8696 = vst [vmem:[#allocation8_spill] sm:$0xff] %v6719_v7  ;;  %v5607_v10 = vld [vmem:[%s8596_s1 + $0x300] ss:$16 sps:$4 sm:$0xff]   ;;  %v5610_v11 = vld [vmem:[%s8596_s1 + $0x308] ss:$16 sps:$4 sm:$0xff]  }
  0xee   : > { %1144 = vperm.xlu0 %5363, %v670_v29   ;;  %1149 = vperm.xlu1 %5364, %v671_v33  }
  0xf2   : > { %1304 = vperm.xlu0 %5363, %v702_v39   ;;  %1309 = vperm.xlu1 %5364, %v703_v42  }
  0xf3   : > { %3185 = vmatmul.mubr.bf16.gmra.mxu0 %v5585_v17  ;;  %3858 = vmatmul.mubr.bf16.gmra.mxu1 %v5586_v18  ;;  %v5614_v17 = vld [vmem:[%s8596_s1 + $0x32c] ss:$16 sps:$4 sm:$0xff]   ;;  %v6741_v18 = vpop.permute.xlu0 %914 }
  0xf4   : > { %3194 = vmatprep.mubr.bf16.mxu0 %v5587_v21  ;;  %3867 = vmatprep.mubr.bf16.mxu1 %v5589_v22  ;;  %8698 = vst [vmem:[#allocation10_spill] sm:$0xff] %v6741_v18 }
  0xf6   : > { %1134 = vperm.xlu0 %5363, %v668_v44   ;;  %1139 = vperm.xlu1 %5364, %v669_v48   ;;  %v5613_v44 = vld [vmem:[%s8596_s1 + $0x320] ss:$16 sps:$4 sm:$0xff]  }
  0xfa   : > { %1294 = vperm.xlu0 %5363, %v700_v53   ;;  %1299 = vperm.xlu1 %5364, %v701_v54  }
  0xfb   : > { %3195 = vmatmul.mubr.bf16.gmra.mxu0 %v5591_v31  ;;  %3868 = vmatmul.mubr.bf16.gmra.mxu1 %v5592_v32  ;;  %v6750_v32 = vpop.permute.xlu1 %919 }
  0xfc   : > { %3204 = vmatprep.mubr.bf16.mxu0 %v5593_v36  ;;  %3877 = vmatprep.mubr.bf16.mxu1 %v5595_v37  ;;  %8699 = vst [vmem:[#allocation11_spill] sm:$0xff] %v6750_v32  ;;  %v4684_v37 = vld [vmem:[%s8599_s4] sm:$0xf] }
  0xfe   : > { %1124 = vperm.xlu0 %5363, %v666_v59   ;;  %1129 = vperm.xlu1 %5364, %v667_v62  }
 0x102   : > { %1284 = vperm.xlu0 %5363, %v698_v5   ;;  %1289 = vperm.xlu1 %5364, %v699_v6  }
 0x103   : > { %3205 = vmatmul.mubr.bf16.gmra.mxu0 %v5597_v45  ;;  %3878 = vmatmul.mubr.bf16.gmra.mxu1 %v5598_v47  ;;  %v5616_v45 = vld [vmem:[%s8596_s1 + $0x328] ss:$16 sps:$4 sm:$0xff]   ;;  %v6762_v47 = vpop.permute.xlu0 %904 }
 0x104   : > { %3214 = vmatprep.mubr.bf16.mxu0 %v5599_v50  ;;  %3887 = vmatprep.mubr.bf16.mxu1 %v5601_v52  ;;  %8700 = vst [vmem:[#allocation12_spill] sm:$0xff] %v6762_v47  ;;  %v5617_v50 = vld [vmem:[%s8596_s1 + $0x344] ss:$16 sps:$4 sm:$0xff]   ;;  %v5620_v52 = vld [vmem:[%s8596_s1 + $0x34c] ss:$16 sps:$4 sm:$0xff]  }
 0x106   : > { %1114 = vperm.xlu0 %5363, %v664_v8   ;;  %1119 = vperm.xlu1 %5364, %v665_v12  }
 0x10a   : > { %1274 = vperm.xlu0 %5363, %v696_v20   ;;  %1279 = vperm.xlu1 %5364, %v697_v26   ;;  %v5622_v26 = vld [vmem:[%s8596_s1 + $0x348] ss:$16 sps:$4 sm:$0xff]  }
 0x10b   : > { %3215 = vmatmul.mubr.bf16.gmra.mxu0 %v5603_v60  ;;  %3888 = vmatmul.mubr.bf16.gmra.mxu1 %v5604_v61 }
 0x10c   : > { %3224 = vmatprep.mubr.bf16.mxu0 %v5605_v63  ;;  %3897 = vmatprep.mubr.bf16.mxu1 %v5608_v2 }
 0x10e   : > { %4687 = vperm.xlu0 %5363, %v4684_v37  }
 0x113   : > { %v2986_v21 = vpop.f32.mrf.mxu0  ;;  %3225 = vmatmul.mubr.bf16.gmra.mxu0 %v5607_v10  ;;  %v3659_v22 = vpop.f32.mrf.mxu1  ;;  %3898 = vmatmul.mubr.bf16.gmra.mxu1 %v5610_v11 }
 0x114   : > { %v2987_v27 = vadd.f32 %v2986_v21, %v6439_v19  ;;  %3234 = vmatprep.mubr.bf16.mxu0 %v5611_v16  ;;  %3907 = vmatprep.mubr.bf16.mxu1 %v5614_v17 }
 0x115   : > { %v2988_v29 = vpop.f32.mrf.mxu0  ;;  %v3661_v31 = vpop.f32.mrf.mxu1 }
 0x116   : > { %v3660_v33 = vadd.f32 %v3659_v22, %v2987_v27  ;;  %v2989_v36 = vadd.f32 %v2988_v29, %v6439_v19  ;;  %v5619_v22 = vld [vmem:[%s8596_s1 + $0x340] ss:$16 sps:$4 sm:$0xff]  }
 0x117   : > { %v2990_v39 = vpop.f32.mrf.mxu0  ;;  %v3663_v42 = vpop.f32.mrf.mxu1 }
 0x118   : > { %v3662_v48 = vadd.f32 %v3661_v31, %v2989_v36  ;;  %v2991_v19 = vadd.f32 %v2990_v39, %v6455_v25  ;;  %v4298_v63 = vmax.f32 %v3660_v33, 0.0  ;;  %v5623_v31 = vld [vmem:[%s8596_s1 + $0x364] ss:$16 sps:$4 sm:$0xff]  }
 0x119   : > { %v2992_v53 = vpop.f32.mrf.mxu0  ;;  %v3665_v54 = vpop.f32.mrf.mxu1 }
 0x11a   : > { %v3664_v59 = vadd.f32 %v3663_v42, %v2991_v19  ;;  %v2993_v60 = vadd.f32 %v2992_v53, %v6455_v25  ;;  %v4299_v8 = vmax.f32 %v3662_v48, 0.0 }
 0x11b   : > { %v2996_v61 = vpop.f32.mrf.mxu0  ;;  %3235 = vmatmul.mubr.bf16.gmra.mxu0 %v5613_v44  ;;  %v3669_v62 = vpop.f32.mrf.mxu1  ;;  %3908 = vmatmul.mubr.bf16.gmra.mxu1 %v5616_v45 }
 0x11c   : > { %v4300_v2 = vmax.f32 %v3664_v59, 0.0  ;;  %v3666_v5 = vadd.f32 %v3665_v54, %v2993_v60  ;;  %v2997_v6 = vadd.f32 %v2996_v61, %v6453_v24  ;;  %3244 = vmatprep.mubr.bf16.mxu0 %v5617_v50  ;;  %3917 = vmatprep.mubr.bf16.mxu1 %v5620_v52 }
 0x11d   : > { %v2998_v10 = vpop.f32.mrf.mxu0  ;;  %v3671_v11 = vpop.f32.mrf.mxu1 }
 0x11e   : > { %v6773_v12 = vpack.c.bf16 %v4300_v2, %v4298_v63  ;;  %v4301_v16 = vmax.f32 %v3666_v5, 0.0  ;;  %v3670_v17 = vadd.f32 %v3669_v62, %v2997_v6  ;;  %v2999_v25 = vadd.f32 %v2998_v10, %v6453_v24  ;;  %v5626_v24 = vld [vmem:[%s8596_s1 + $0x36c] ss:$16 sps:$4 sm:$0xff]   ;;  %v5625_v2 = vld [vmem:[%s8596_s1 + $0x360] ss:$16 sps:$4 sm:$0xff]  }
 0x11f   : > { %v3000_v20 = vpop.f32.mrf.mxu0  ;;  %v3673_v21 = vpop.f32.mrf.mxu1  ;;  %v5628_v5 = vld [vmem:[%s8596_s1 + $0x368] ss:$16 sps:$4 sm:$0xff]   ;;  %v5634_v10 = vld [vmem:[%s8596_s1 + $0x38c] ss:$16 sps:$4 sm:$0xff]  }
 0x120   : > { %8701 = vst [vmem:[#allocation13_spill] sm:$0xff] %v6773_v12  ;;  %v3672_v27 = vadd.f32 %v3671_v11, %v2999_v25  ;;  %v3001_v29 = vadd.f32 %v3000_v20, %v6469_v30  ;;  %v6789_v33 = vpack.c.bf16 %v4301_v16, %v4299_v8  ;;  %v4302_v48 = vmax.f32 %v3670_v17, 0.0  ;;  %v5631_v8 = vld [vmem:[%s8596_s1 + $0x384] ss:$16 sps:$4 sm:$0xff]  }
 0x121   : > { %v3002_v36 = vpop.f32.mrf.mxu0  ;;  %v3675_v37 = vpop.f32.mrf.mxu1 }
 0x122   : > { %8702 = vst [vmem:[#allocation14_spill] sm:$0xff] %v6789_v33  ;;  %v3674_v39 = vadd.f32 %v3673_v21, %v3001_v29  ;;  %v3003_v42 = vadd.f32 %v3002_v36, %v6469_v30  ;;  %v4303_v59 = vmax.f32 %v3672_v27, 0.0 }
 0x123   : > { %v3006_v44 = vpop.f32.mrf.mxu0  ;;  %3245 = vmatmul.mubr.bf16.gmra.mxu0 %v5619_v22  ;;  %v3679_v45 = vpop.f32.mrf.mxu1  ;;  %3918 = vmatmul.mubr.bf16.gmra.mxu1 %v5622_v26 }
 0x124   : > { %v4304_v19 = vmax.f32 %v3674_v39, 0.0  ;;  %v3676_v50 = vadd.f32 %v3675_v37, %v3003_v42  ;;  %v3007_v52 = vadd.f32 %v3006_v44, %v6483_v35  ;;  %3254 = vmatprep.mubr.bf16.mxu0 %v5623_v31  ;;  %3927 = vmatprep.mubr.bf16.mxu1 %v5626_v24  ;;  %v5629_v37 = vld [vmem:[%s8596_s1 + $0x380] ss:$16 sps:$4 sm:$0xff]   ;;  %v5632_v39 = vld [vmem:[%s8596_s1 + $0x388] ss:$16 sps:$4 sm:$0xff]  }
 0x125   : > { %v6793_v53 = vpop.f32.mrf.mxu0  ;;  %v6795_v54 = vpop.f32.mrf.mxu1  ;;  %v5637_v42 = vld [vmem:[%s8596_s1 + $0x3a4] ss:$16 sps:$4 sm:$0xff]   ;;  %v5640_v44 = vld [vmem:[%s8596_s1 + $0x3ac] ss:$16 sps:$4 sm:$0xff]  }
 0x126   : > { %8703 = vst [vmem:[#allocation15_spill] sm:$0xff] %v6795_v54  ;;  %v6797_v60 = vpack.c.bf16 %v4304_v19, %v4302_v48  ;;  %v4305_v61 = vmax.f32 %v3676_v50, 0.0  ;;  %v3680_v30 = vadd.f32 %v3679_v45, %v3007_v52  ;;  %v6932_v38 = vadd.f32 %v6793_v53, %v6483_v35 }
 0x127   : > { %v3010_v62 = vpop.f32.mrf.mxu0  ;;  %v3683_v63 = vpop.f32.mrf.mxu1 }
 0x128   : > { %8704 = vst [vmem:[#allocation16_spill] sm:$0xff] %v6797_v60  ;;  %v3011_v6 = vadd.f32 %v3010_v62, %v6497_v40  ;;  %v6812_v11 = vpack.c.bf16 %v4305_v61, %v4303_v59  ;;  %v4306_v22 = vmax.f32 %v3680_v30, 0.0  ;;  %v5635_v62 = vld [vmem:[%s8596_s1 + $0x3a0] ss:$16 sps:$4 sm:$0xff]   ;;  %8713 = vst [vmem:[#allocation25_spill] sm:$0xff] %v6932_v38 }
 0x129   : > { %v6814_v16 = vpop.f32.mrf.mxu0  ;;  %v6816_v17 = vpop.f32.mrf.mxu1 }
 0x12a   : > { %8705 = vst [vmem:[#allocation17_spill] sm:$0xff] %v6812_v11  ;;  %v3684_v25 = vadd.f32 %v3683_v63, %v3011_v6  ;;  %v5638_v63 = vld [vmem:[%s8596_s1 + $0x3a8] ss:$16 sps:$4 sm:$0xff]  }
 0x12b   : > { %v6818_v20 = vpop.f32.mrf.mxu0  ;;  %3255 = vmatmul.mubr.bf16.gmra.mxu0 %v5625_v2  ;;  %v6820_v21 = vpop.f32.mrf.mxu1  ;;  %3928 = vmatmul.mubr.bf16.gmra.mxu1 %v5628_v5  ;;  %v5643_v2 = vld [vmem:[%s8596_s1 + $0x3c4] ss:$16 sps:$4 sm:$0xff]   ;;  %v5646_v5 = vld [vmem:[%s8596_s1 + $0x3cc] ss:$16 sps:$4 sm:$0xff]  }
 0x12c   : > { %v4308_v26 = vmax.f32 %v3684_v25, 0.0  ;;  %3264 = vmatprep.mubr.bf16.mxu0 %v5631_v8  ;;  %3937 = vmatprep.mubr.bf16.mxu1 %v5634_v10 }
 0x12d   : > { %v6822_v27 = vpop.f32.mrf.mxu0  ;;  %v6824_v29 = vpop.f32.mrf.mxu1 }
 0x12e   : > { %v6826_v31 = vpack.c.bf16 %v4308_v26, %v4306_v22 }
 0x12f   : > { %v6828_v24 = vpop.f32.mrf.mxu0  ;;  %v6830_v36 = vpop.f32.mrf.mxu1 }
 0x130   : > { %8706 = vst [vmem:[#allocation18_spill] sm:$0xff] %v6826_v31 }
 0x131   : > { %v6844_v45 = vpop.f32.mrf.mxu0  ;;  %v6846_v48 = vpop.f32.mrf.mxu1 }
 0x132   : > { %v6953_v35 = vadd.f32 %v6844_v45, %v6513_v46 }
 0x133   : > { %v6848_v19 = vpop.f32.mrf.mxu0  ;;  %3265 = vmatmul.mubr.bf16.gmra.mxu0 %v5629_v37  ;;  %v6850_v50 = vpop.f32.mrf.mxu1  ;;  %3938 = vmatmul.mubr.bf16.gmra.mxu1 %v5632_v39 }
 0x134   : > { %3274 = vmatprep.mubr.bf16.mxu0 %v5637_v42  ;;  %3947 = vmatprep.mubr.bf16.mxu1 %v5640_v44  ;;  %v6880_v37 = vpop.permute.xlu1 %909  ;;  %v5641_v44 = vld [vmem:[%s8596_s1 + $0x3c0] ss:$16 sps:$4 sm:$0xff]  }
 0x135   : > { %v3028_v52 = vpop.f32.mrf.mxu0  ;;  %v6852_v59 = vpop.f32.mrf.mxu1  ;;  %8707 = vst [vmem:[#allocation19_spill] sm:$0xff] %v6880_v37 }
 0x136   : > { %v3029_v11 = vadd.f32 %v3028_v52, %v6527_v51 }
 0x137   : > { %v3030_v61 = vpop.f32.mrf.mxu0  ;;  %v6854_v30 = vpop.f32.mrf.mxu1 }
 0x138   : > { %v6904_v49 = vpop.permute.xlu1 %899  ;;  %v3031_v31 = vadd.f32 %v3030_v61, %v6538_v55  ;;  %v6949_v61 = vadd.f32 %v6828_v24, %v6513_v46  ;;  %v6969_v46 = vadd.f32 %v6852_v59, %v3029_v11 }
 0x139   : > { %v6868_v6 = vpop.f32.mrf.mxu0  ;;  %v6870_v8 = vpop.f32.mrf.mxu1  ;;  %8709 = vst [vmem:[#allocation21_spill] sm:$0xff] %v6904_v49 }
 0x13b   : > { %v6872_v10 = vpop.f32.mrf.mxu0  ;;  %3275 = vmatmul.mubr.bf16.gmra.mxu0 %v5635_v62  ;;  %v6874_v25 = vpop.f32.mrf.mxu1  ;;  %3948 = vmatmul.mubr.bf16.gmra.mxu1 %v5638_v63  ;;  %v5644_v62 = vld [vmem:[%s8596_s1 + $0x3c8] ss:$16 sps:$4 sm:$0xff]  }
 0x13c   : > { %3284 = vmatprep.mubr.bf16.mxu0 %v5643_v2  ;;  %3957 = vmatprep.mubr.bf16.mxu1 %v5646_v5  ;;  %v6892_v63 = vpop.permute.xlu0 %894  ;;  %v5649_v2 = vld [vmem:[%s8596_s1 + $0x3e4] ss:$16 sps:$4 sm:$0xff]   ;;  %v5652_v5 = vld [vmem:[%s8596_s1 + $0x3ec] ss:$16 sps:$4 sm:$0xff]  }
 0x13d   : > { %v6876_v22 = vpop.f32.mrf.mxu0  ;;  %v6878_v26 = vpop.f32.mrf.mxu1  ;;  %8708 = vst [vmem:[#allocation20_spill] sm:$0xff] %v6892_v63  ;;  %v5647_v63 = vld [vmem:[%s8596_s1 + $0x3e0] ss:$16 sps:$4 sm:$0xff]  }
 0x13f   : > { %v6882_v39 = vpop.f32.mrf.mxu0  ;;  %v6884_v42 = vpop.f32.mrf.mxu1 }
 0x140   : > { %v6908_v32 = vpop.permute.xlu0 %884 }
 0x141   : > { %v3042_v7 = vpop.f32.mrf.mxu0  ;;  %v6900_v13 = vpop.f32.mrf.mxu1  ;;  %8710 = vst [vmem:[#allocation22_spill] sm:$0xff] %v6908_v32 }
 0x142   : > { %v6924_v32 = vpop.permute.xlu1 %889 }
 0x143   : > { %v3046_v56 = vpop.f32.mrf.mxu0  ;;  %3285 = vmatmul.mubr.bf16.gmra.mxu0 %v5641_v44  ;;  %v6902_v58 = vpop.f32.mrf.mxu1  ;;  %3958 = vmatmul.mubr.bf16.gmra.mxu1 %v5644_v62  ;;  %v5650_v44 = vld [vmem:[%s8596_s1 + $0x3e8] ss:$16 sps:$4 sm:$0xff]   ;;  %v5655_v62 = vld [vmem:[%s8596_s1 + $0x404] ss:$16 sps:$4 sm:$0xff]   ;;  %8711 = vst [vmem:[#allocation23_spill] sm:$0xff] %v6924_v32  ;;  %v6936_v32 = vadd.f32 %v6814_v16, %v6497_v40 }
 0x144   : > { %3294 = vmatprep.mubr.bf16.mxu0 %v5649_v2  ;;  %3967 = vmatprep.mubr.bf16.mxu1 %v5652_v5  ;;  %v5658_v2 = vld [vmem:[%s8596_s1 + $0x40c] ss:$16 sps:$4 sm:$0xff]   ;;  %v6926_v60 = vpop.permute.xlu0 %874 }
 0x145   : > { %v3048_v47 = vpop.f32.mrf.mxu0  ;;  %v6906_v3 = vpop.f32.mrf.mxu1  ;;  %8712 = vst [vmem:[#allocation24_spill] sm:$0xff] %v6926_v60 }
 0x147   : > { %v3050_v18 = vpop.f32.mrf.mxu0  ;;  %v6910_v37 = vpop.f32.mrf.mxu1 }
 0x148   : > { %v3051_v11 = vadd.f32 %v3050_v18, %v6573_v4 }
 0x149   : > { %v3052_v5 = vpop.f32.mrf.mxu0  ;;  %v3725_v49 = vpop.f32.mrf.mxu1 }
 0x14a   : > { %v3053_v40 = vadd.f32 %v3052_v5, %v6573_v4  ;;  %v6980_v5 = vadd.f32 %v6854_v30, %v3031_v31  ;;  %v3043_v31 = vadd.f32 %v3042_v7, %v6563_v0  ;;  %v3724_v7 = vadd.f32 %v6910_v37, %v3051_v11 }
 0x14b   : > { %v3056_v12 = vpop.f32.mrf.mxu0  ;;  %3295 = vmatmul.mubr.bf16.gmra.mxu0 %v5647_v63  ;;  %v3729_v33 = vpop.f32.mrf.mxu1  ;;  %3968 = vmatmul.mubr.bf16.gmra.mxu1 %v5650_v44  ;;  %v6940_v63 = vadd.f32 %v6818_v20, %v6499_v41  ;;  %v6945_v44 = vadd.f32 %v6822_v27, %v6499_v41  ;;  %v5656_v41 = vld [vmem:[%s8596_s1 + $0x408] ss:$16 sps:$4 sm:$0xff]   ;;  %v6966_v27 = vadd.f32 %v6848_v19, %v6527_v51 }
 0x14c   : > { %3304 = vmatprep.mubr.bf16.mxu0 %v5655_v62  ;;  %3977 = vmatprep.mubr.bf16.mxu1 %v5658_v2  ;;  %v6962_v20 = vpop.permute.xlu1 %879  ;;  %v3057_v24 = vadd.f32 %v3056_v12, %v6587_v9  ;;  %v5661_v62 = vld [vmem:[%s8596_s1 + $0x424] ss:$16 sps:$4 sm:$0xff]   ;;  %v5664_v2 = vld [vmem:[%s8596_s1 + $0x42c] ss:$16 sps:$4 sm:$0xff]   ;;  %v3049_v51 = vadd.f32 %v3048_v47, %v6565_v1  ;;  %v6984_v12 = vpop.permute.xlu0 %864  ;;  %v3047_v47 = vadd.f32 %v3046_v56, %v6565_v1 }
 0x14d   : > { %v3058_v43 = vpop.f32.mrf.mxu0  ;;  %v3731_v54 = vpop.f32.mrf.mxu1  ;;  %8714 = vst [vmem:[#allocation26_spill] sm:$0xff] %v6962_v20  ;;  %8715 = vst [vmem:[#allocation27_spill] sm:$0xff] %v6984_v12  ;;  %v3039_v20 = vadd.f32 %v6876_v22, %v6543_v57  ;;  %v3726_v30 = vadd.f32 %v3725_v49, %v3053_v40 }
 0x14e   : > { %v3059_v52 = vadd.f32 %v3058_v43, %v6587_v9  ;;  %v5653_v43 = vld [vmem:[%s8596_s1 + $0x400] ss:$16 sps:$4 sm:$0xff]  }
 0x14f   : > { %v3060_v53 = vpop.f32.mrf.mxu0  ;;  %v3733_v16 = vpop.f32.mrf.mxu1 }
 0x150   : > { %v3061_v45 = vadd.f32 %v3060_v53, %v6601_v14  ;;  %v3732_v19 = vadd.f32 %v3731_v54, %v3059_v52  ;;  %v3033_v53 = vadd.f32 %v6868_v6, %v6538_v55  ;;  %v3730_v54 = vadd.f32 %v3729_v33, %v3057_v24  ;;  %v6998_v56 = vpop.permute.xlu1 %869  ;;  %v7011_v24 = vpop.permute.xlu0 %1024 }
 0x151   : > { %v3062_v59 = vpop.f32.mrf.mxu0  ;;  %v3735_v9 = vpop.f32.mrf.mxu1  ;;  %v3041_v55 = vadd.f32 %v6882_v39, %v6563_v0  ;;  %v3720_v0 = vadd.f32 %v6902_v58, %v3047_v47  ;;  %8716 = vst [vmem:[#allocation28_spill] sm:$0xff] %v7011_v24  ;;  %v5667_v58 = vld [vmem:[%s8596_s1 + $0x444] ss:$16 sps:$4 sm:$0xff]  }
 0x152   : > { %v3734_v60 = vadd.f32 %v3733_v16, %v3061_v45  ;;  %v3063_v38 = vadd.f32 %v3062_v59, %v6601_v14  ;;  %v3722_v14 = vadd.f32 %v6906_v3, %v3049_v51  ;;  %v4327_v6 = vmax.f32 %v3732_v19, 0.0  ;;  %v5670_v59 = vld [vmem:[%s8596_s1 + $0x44c] ss:$16 sps:$4 sm:$0xff]  }
 0x153   : > { %v3066_v4 = vpop.f32.mrf.mxu0  ;;  %3305 = vmatmul.mubr.bf16.gmra.mxu0 %v5653_v43  ;;  %v3739_v18 = vpop.f32.mrf.mxu1  ;;  %3978 = vmatmul.mubr.bf16.gmra.mxu1 %v5656_v41  ;;  %v3037_v16 = vadd.f32 %v6872_v10, %v6543_v57  ;;  %v3716_v43 = vadd.f32 %v6900_v13, %v3043_v31  ;;  %v4325_v3 = vmax.f32 %v3726_v30, 0.0  ;;  %v5659_v41 = vld [vmem:[%s8596_s1 + $0x420] ss:$16 sps:$4 sm:$0xff]   ;;  %v3712_v10 = vadd.f32 %v6878_v26, %v3039_v20 }
 0x154   : > { %v3736_v52 = vadd.f32 %v3735_v9, %v3063_v38  ;;  %v3067_v12 = vadd.f32 %v3066_v4, %v6603_v15  ;;  %3314 = vmatprep.mubr.bf16.mxu0 %v5661_v62  ;;  %3987 = vmatprep.mubr.bf16.mxu1 %v5664_v2  ;;  %v4328_v22 = vmax.f32 %v3734_v60, 0.0  ;;  %v5662_v60 = vld [vmem:[%s8596_s1 + $0x428] ss:$16 sps:$4 sm:$0xff]   ;;  %v7019_v62 = vadd.f32 %v6884_v42, %v3041_v55 }
 0x155   : > { %v3068_v1 = vpop.f32.mrf.mxu0  ;;  %v3741_v49 = vpop.f32.mrf.mxu1  ;;  %v4323_v2 = vmax.f32 %v3722_v14, 0.0  ;;  %v4324_v51 = vmax.f32 %v3724_v7, 0.0  ;;  %v7025_v9 = vadd.f32 %v6870_v8, %v3033_v53  ;;  %v3710_v26 = vadd.f32 %v6874_v25, %v3037_v16 }
 0x156   : > { %v4329_v40 = vmax.f32 %v3736_v52, 0.0  ;;  %v3740_v33 = vadd.f32 %v3739_v18, %v3067_v12  ;;  %v3069_v38 = vadd.f32 %v3068_v1, %v6603_v15  ;;  %v4326_v15 = vmax.f32 %v3730_v54, 0.0  ;;  %v7029_v54 = vpop.permute.xlu1 %1029 }
 0x157   : > { %v3070_v39 = vpop.f32.mrf.mxu0  ;;  %v3743_v37 = vpop.f32.mrf.mxu1  ;;  %v4321_v42 = vmax.f32 %v3716_v43, 0.0  ;;  %v4322_v20 = vmax.f32 %v3720_v0, 0.0  ;;  %v4567_v18 = vpack.c.bf16 %v4325_v3, %v4323_v2  ;;  %8717 = vst [vmem:[#allocation29_spill] sm:$0xff] %v7029_v54  ;;  %v4320_v14 = vmax.f32 %v7019_v62, 0.0  ;;  %v5676_v62 = vld [vmem:[%s8596_s1 + $0x46c] ss:$16 sps:$4 sm:$0xff]  }
 0x158   : > { %v3742_v45 = vadd.f32 %v3741_v49, %v3069_v38  ;;  %v3071_v57 = vadd.f32 %v3070_v39, %v6623_v23  ;;  %v4569_v13 = vpack.c.bf16 %v4329_v40, %v4327_v6  ;;  %v4568_v12 = vpack.c.bf16 %v4328_v22, %v4326_v15  ;;  %v7033_v49 = vpop.permute.xlu0 %854 }
 0x159   : > { %v3072_v11 = vpop.f32.mrf.mxu0  ;;  %v3745_v19 = vpop.f32.mrf.mxu1  ;;  %v4330_v52 = vmax.f32 %v3740_v33, 0.0  ;;  %v4566_v25 = vpack.c.bf16 %v4324_v51, %v4322_v20  ;;  %v3696_v16 = vadd.f32 %v6846_v48, %v6953_v35  ;;  %v3700_v43 = vadd.f32 %v6850_v50, %v6966_v27  ;;  %v5673_v50 = vld [vmem:[%s8596_s1 + $0x464] ss:$16 sps:$4 sm:$0xff]  }
 0x15a   : > { %v3744_v31 = vadd.f32 %v3743_v37, %v3071_v57  ;;  %v3073_v47 = vadd.f32 %v3072_v11, %v6623_v23  ;;  %4734 = vmatprep.subr.bf16.mxu0 %v4569_v13  ;;  %v4319_v23 = vmax.f32 %v3712_v10, 0.0  ;;  %v4331_v7 = vmax.f32 %v3742_v45, 0.0  ;;  %v7064_v2 = vpop.permute.xlu1 %859 }
 0x15b   : > { %v3076_v30 = vpop.f32.mrf.mxu0  ;;  %3315 = vmatmul.mubr.bf16.gmra.mxu0 %v5659_v41  ;;  %v3749_v4 = vpop.f32.mrf.mxu1  ;;  %3988 = vmatmul.mubr.bf16.gmra.mxu1 %v5662_v60  ;;  %v4317_v0 = vmax.f32 %v7025_v9, 0.0  ;;  %v5665_v41 = vld [vmem:[%s8596_s1 + $0x440] ss:$16 sps:$4 sm:$0xff]   ;;  %v5668_v60 = vld [vmem:[%s8596_s1 + $0x448] ss:$16 sps:$4 sm:$0xff]   ;;  %v3692_v27 = vadd.f32 %v6824_v29, %v6945_v44  ;;  %v3694_v45 = vadd.f32 %v6830_v36, %v6949_v61  ;;  %v4315_v57 = vmax.f32 %v6969_v46, 0.0 }
 0x15c   : > { %v4332_v55 = vmax.f32 %v3744_v31, 0.0  ;;  %v3746_v8 = vadd.f32 %v3745_v19, %v3073_v47  ;;  %v3077_v53 = vadd.f32 %v3076_v30, %v6631_v28  ;;  %4735 = vmatpush1.bf16.msra.mxu0 %v4568_v12  ;;  %3324 = vmatprep.mubr.bf16.mxu0 %v5667_v58  ;;  %v4565_v37 = vpack.c.bf16 %v4321_v42, %v4319_v23  ;;  %v7071_v9 = vpop.permute.xlu0 %1014 }
 0x15d   : > { %4736 = vmatprep.subr.bf16.mxu0 %v4567_v18  ;;  %v3078_v6 = vpop.f32.mrf.mxu0  ;;  %v3751_v1 = vpop.f32.mrf.mxu1  ;;  %3997 = vmatprep.mubr.bf16.mxu1 %v5670_v59  ;;  %v4316_v13 = vmax.f32 %v6980_v5, 0.0  ;;  %v3686_v51 = vadd.f32 %v6816_v17, %v6936_v32  ;;  %v3690_v61 = vadd.f32 %v6820_v21, %v6940_v63  ;;  %v4313_v46 = vmax.f32 %v3696_v16, 0.0  ;;  %8720 = vst [vmem:[#allocation32_spill] sm:$0xff] %v7071_v9  ;;  %v8721_v32 = vld [vmem:[#allocation2_spill] sm:$0xff] }
 0x15e   : > { %v7035_v22 = vpack.c.bf16 %v4332_v55, %v4330_v52  ;;  %v4333_v40 = vmax.f32 %v3746_v8, 0.0  ;;  %v3750_v33 = vadd.f32 %v3749_v4, %v3077_v53  ;;  %v3079_v38 = vadd.f32 %v3078_v6, %v6631_v28  ;;  %v5674_v6 = vld [vmem:[%s8596_s1 + $0x468] ss:$16 sps:$4 sm:$0xff]   ;;  %v5679_v16 = vld [vmem:[%s8596_s1 + $0x484] ss:$16 sps:$4 sm:$0xff]  }
 0x15f   : > { %v3080_v3 = vpop.f32.mrf.mxu0  ;;  %v3753_v39 = vpop.f32.mrf.mxu1  ;;  %v4318_v28 = vmax.f32 %v3710_v26, 0.0  ;;  %v4314_v5 = vmax.f32 %v3700_v43, 0.0  ;;  %v4563_v59 = vpack.c.bf16 %v4317_v0, %v4315_v57  ;;  %v8723_v26 = vld [vmem:[#allocation15_spill] sm:$0xff]  ;;  %v4311_v21 = vmax.f32 %v3692_v27, 0.0 }
 0x160   : > { %8718 = vst [vmem:[#allocation30_spill] sm:$0xff] %v7035_v22  ;;  %v3752_v15 = vadd.f32 %v3751_v1, %v3079_v38  ;;  %v3081_v48 = vadd.f32 %v3080_v3, %v6645_v34  ;;  %4737 = vmatpush1.bf16.msra.mxu0 %v4566_v25  ;;  %v7053_v35 = vpack.c.bf16 %v4333_v40, %v4331_v7  ;;  %v4334_v12 = vmax.f32 %v3750_v33, 0.0  ;;  %v5671_v7 = vld [vmem:[%s8596_s1 + $0x460] ss:$16 sps:$4 sm:$0xff]   ;;  %v7088_v1 = vpop.permute.xlu1 %1019  ;;  %v8726_v33 = vld [vmem:[#allocation3_spill] sm:$0xff] }
 0x161   : > { %4738 = vmatprep.subr.bf16.mxu0 %v4565_v37  ;;  %v3082_v58 = vpop.f32.mrf.mxu0  ;;  %v3755_v10 = vpop.f32.mrf.mxu1  ;;  %v4564_v29 = vpack.c.bf16 %v4320_v14, %v4318_v28  ;;  %v4312_v63 = vmax.f32 %v3694_v45, 0.0  ;;  %v4562_v20 = vpack.c.bf16 %v4316_v13, %v4314_v5  ;;  %v4309_v53 = vmax.f32 %v3686_v51, 0.0  ;;  %v5682_v37 = vld [vmem:[%s8596_s1 + $0x48c] ss:$16 sps:$4 sm:$0xff]  }
 0x162   : > { %8719 = vst [vmem:[#allocation31_spill] sm:$0xff] %v7053_v35  ;;  %v3754_v44 = vadd.f32 %v3753_v39, %v3081_v48  ;;  %v3083_v36 = vadd.f32 %v3082_v58, %v6645_v34  ;;  %v8722_v34 = vld [vmem:[#allocation25_spill] sm:$0xff]  ;;  %v4335_v18 = vmax.f32 %v3752_v15, 0.0  ;;  %v4561_v25 = vpack.c.bf16 %v4313_v46, %v4311_v21  ;;  %v5685_v46 = vld [vmem:[%s8596_s1 + $0x4a4] ss:$16 sps:$4 sm:$0xff]  }
 0x163   : > { %v3086_v11 = vpop.f32.mrf.mxu0  ;;  %3325 = vmatmul.mubr.bf16.gmra.mxu0 %v5665_v41  ;;  %v3759_v19 = vpop.f32.mrf.mxu1  ;;  %3998 = vmatmul.mubr.bf16.gmra.mxu1 %v5668_v60  ;;  %v3682_v42 = vadd.f32 %v8723_v26, %v8722_v34  ;;  %8725 = vst [vmem:[#allocation25_spill] sm:$0xff] %v7088_v1  ;;  %v4310_v40 = vmax.f32 %v3690_v61, 0.0  ;;  %v8728_v61 = vld [vmem:[#allocation18_spill] sm:$0xff]  ;;  %v8729_v5 = vld [vmem:[#allocation17_spill] sm:$0xff] }
 0x164   : > { %v4336_v31 = vmax.f32 %v3754_v44, 0.0  ;;  %v3756_v47 = vadd.f32 %v3755_v10, %v3083_v36  ;;  %v3087_v17 = vadd.f32 %v3086_v11, %v8721_v32  ;;  %4739 = vmatpush1.bf16.msra.mxu0 %v4564_v29  ;;  %3334 = vmatprep.mubr.bf16.mxu0 %v5673_v50  ;;  %v7103_v41 = vpop.permute.xlu0 %844  ;;  %v7113_v58 = vpop.permute.xlu1 %849  ;;  %v5677_v29 = vld [vmem:[%s8596_s1 + $0x480] ss:$16 sps:$4 sm:$0xff]   ;;  %v5680_v44 = vld [vmem:[%s8596_s1 + $0x488] ss:$16 sps:$4 sm:$0xff]  }
 0x165   : > { %4740 = vmatprep.subr.bf16.mxu0 %v4563_v59  ;;  %v7076_v30 = vpop.f32.mrf.mxu0  ;;  %v7078_v4 = vpop.f32.mrf.mxu1  ;;  %4007 = vmatprep.mubr.bf16.mxu1 %v5676_v62  ;;  %v4307_v0 = vmax.f32 %v3682_v42, 0.0  ;;  %v4560_v60 = vpack.c.bf16 %v4312_v63, %v4310_v40  ;;  %v5688_v59 = vld [vmem:[%s8596_s1 + $0x4ac] ss:$16 sps:$4 sm:$0xff]   ;;  %v8732_v34 = vld [vmem:[#allocation14_spill] sm:$0xff] }
 0x166   : > { %v7080_v52 = vpack.c.bf16 %v4336_v31, %v4334_v12  ;;  %v4337_v55 = vmax.f32 %v3756_v47, 0.0  ;;  %v3760_v8 = vadd.f32 %v3759_v19, %v3087_v17  ;;  %v8731_v17 = vld [vmem:[#allocation16_spill] sm:$0xff]  ;;  %v7234_v22 = vadd.f32 %v7076_v30, %v8721_v32 }
 0x167   : > { %v3090_v23 = vpop.f32.mrf.mxu0  ;;  %v3763_v14 = vpop.f32.mrf.mxu1  ;;  %v4559_v50 = vpack.c.bf16 %v4309_v53, %v4307_v0  ;;  %v5691_v53 = vld [vmem:[%s8596_s1 + $0x4c4] ss:$16 sps:$4 sm:$0xff]  }
 0x168   : > { %8724 = vst [vmem:[#allocation2_spill] sm:$0xff] %v7080_v52  ;;  %v3091_v38 = vadd.f32 %v3090_v23, %v8726_v33  ;;  %4741 = vmatpush1.bf16.msra.mxu0 %v4562_v20  ;;  %v7094_v43 = vpack.c.bf16 %v4337_v55, %v4335_v18  ;;  %v4338_v27 = vmax.f32 %v3760_v8, 0.0  ;;  %v7127_v36 = vpop.permute.xlu0 %1004  ;;  %v7145_v47 = vpop.permute.xlu1 %1009  ;;  %v5683_v18 = vld [vmem:[%s8596_s1 + $0x4a0] ss:$16 sps:$4 sm:$0xff]   ;;  %v5686_v55 = vld [vmem:[%s8596_s1 + $0x4a8] ss:$16 sps:$4 sm:$0xff]  }
 0x169   : > { %4742 = vmatprep.subr.bf16.mxu0 %v4561_v25  ;;  %v7096_v3 = vpop.f32.mrf.mxu0  ;;  %v7098_v39 = vpop.f32.mrf.mxu1  ;;  %8727 = vst [vmem:[#allocation15_spill] sm:$0xff] %v7127_v36  ;;  %8730 = vst [vmem:[#allocation3_spill] sm:$0xff] %v7145_v47  ;;  %v8733_v8 = vld [vmem:[#allocation13_spill] sm:$0xff] }
 0x16a   : > { %v3764_v28 = vadd.f32 %v3763_v14, %v3091_v38  ;;  %v5694_v23 = vld [vmem:[%s8596_s1 + $0x4cc] ss:$16 sps:$4 sm:$0xff]  }
 0x16b   : > { %v7105_v15 = vpop.f32.mrf.mxu0  ;;  %3335 = vmatmul.mubr.bf16.gmra.mxu0 %v5671_v7  ;;  %v7107_v48 = vpop.f32.mrf.mxu1  ;;  %4008 = vmatmul.mubr.bf16.gmra.mxu1 %v5674_v6 }
 0x16c   : > { %v4340_v45 = vmax.f32 %v3764_v28, 0.0  ;;  %4743 = vmatpush1.bf16.msra.mxu0 %v4560_v60  ;;  %3344 = vmatprep.mubr.bf16.mxu0 %v5679_v16  ;;  %v7151_v21 = vpop.permute.xlu0 %834  ;;  %v7172_v7 = vpop.permute.xlu1 %839  ;;  %v5689_v28 = vld [vmem:[%s8596_s1 + $0x4c0] ss:$16 sps:$4 sm:$0xff]  }
 0x16d   : > { %4744 = vmatprep.subr.bf16.mxu0 %v4559_v50  ;;  %v7109_v57 = vpop.f32.mrf.mxu0  ;;  %v7111_v13 = vpop.f32.mrf.mxu1  ;;  %4017 = vmatprep.mubr.bf16.mxu1 %v5682_v37  ;;  %v5692_v50 = vld [vmem:[%s8596_s1 + $0x4c8] ss:$16 sps:$4 sm:$0xff]  }
 0x16e   : > { %v7115_v10 = vpack.c.bf16 %v4340_v45, %v4338_v27  ;;  %v5697_v45 = vld [vmem:[%s8596_s1 + $0x4e4] ss:$16 sps:$4 sm:$0xff]  }
 0x16f   : > { %v7117_v62 = vpop.f32.mrf.mxu0  ;;  %v7119_v51 = vpop.f32.mrf.mxu1 }
 0x170   : > { %4745 = vmatpush1.bf16.msra.mxu0 %v8728_v61  ;;  %v7178_v38 = vpop.permute.xlu0 %994  ;;  %v7194_v27 = vpop.permute.xlu1 %999 }
 0x171   : > { %4746 = vmatprep.subr.bf16.mxu0 %v8729_v5  ;;  %v7134_v11 = vpop.f32.mrf.mxu0  ;;  %v7136_v19 = vpop.f32.mrf.mxu1  ;;  %8734 = vst [vmem:[#allocation18_spill] sm:$0xff] %v7178_v38  ;;  %8735 = vst [vmem:[#allocation17_spill] sm:$0xff] %v7194_v27 }
 0x173   : > { %v7141_v12 = vpop.f32.mrf.mxu0  ;;  %3345 = vmatmul.mubr.bf16.gmra.mxu0 %v5677_v29  ;;  %v7143_v31 = vpop.f32.mrf.mxu1  ;;  %4018 = vmatmul.mubr.bf16.gmra.mxu1 %v5680_v44  ;;  %v5700_v29 = vld [vmem:[%s8596_s1 + $0x4ec] ss:$16 sps:$4 sm:$0xff]  }
 0x174   : > { %4747 = vmatpush1.bf16.msra.mxu0 %v8731_v17  ;;  %3354 = vmatprep.mubr.bf16.mxu0 %v5685_v46  ;;  %v825_v46 = vpop.permute.xlu0 %824 }
 0x175   : > { %4748 = vmatprep.subr.bf16.mxu0 %v8732_v34  ;;  %v3108_v26 = vpop.f32.mrf.mxu0  ;;  %v7149_v42 = vpop.f32.mrf.mxu1  ;;  %4027 = vmatprep.mubr.bf16.mxu1 %v5688_v59 }
 0x176   : > { %v3109_v24 = vadd.f32 %v3108_v26, %v7151_v21  ;;  %v7245_v26 = vadd.f32 %v7109_v57, %v825_v46 }
 0x177   : > { %v3110_v63 = vpop.f32.mrf.mxu0  ;;  %v7153_v20 = vpop.f32.mrf.mxu1 }
 0x178   : > { %4749 = vmatpush1.bf16.msra.mxu0 %v8733_v8  ;;  %v7267_v57 = vadd.f32 %v7149_v42, %v3109_v24 }
 0x179   : > { %v7168_v14 = vpop.f32.mrf.mxu0  ;;  %v7170_v25 = vpop.f32.mrf.mxu1 }
 0x17b   : > { %v7174_v6 = vpop.f32.mrf.mxu0  ;;  %3355 = vmatmul.mubr.bf16.gmra.mxu0 %v5683_v18  ;;  %v7176_v40 = vpop.f32.mrf.mxu1  ;;  %4028 = vmatmul.mubr.bf16.gmra.mxu1 %v5686_v55 }
 0x17c   : > { %3364 = vmatprep.mubr.bf16.mxu0 %v5691_v53  ;;  %4037 = vmatprep.mubr.bf16.mxu1 %v5694_v23  ;;  %v830_v18 = vpop.permute.xlu1 %829  ;;  %v7210_v55 = vpop.permute.xlu0 %984  ;;  %v5695_v23 = vld [vmem:[%s8596_s1 + $0x4e0] ss:$16 sps:$4 sm:$0xff]  }
 0x17d   : > { %v7180_v16 = vpop.f32.mrf.mxu0  ;;  %v7182_v0 = vpop.f32.mrf.mxu1  ;;  %8736 = vst [vmem:[#allocation16_spill] sm:$0xff] %v7210_v55  ;;  %v3111_v55 = vadd.f32 %v3110_v63, %v7172_v7  ;;  %v7248_v63 = vadd.f32 %v7117_v62, %v830_v18 }
 0x17f   : > { %v7184_v37 = vpop.f32.mrf.mxu0  ;;  %v7186_v60 = vpop.f32.mrf.mxu1 }
 0x180   : > { %v7226_v47 = vpop.permute.xlu1 %989  ;;  %v7228_v27 = vpop.permute.xlu0 %974 }
 0x181   : > { %v7202_v44 = vpop.f32.mrf.mxu0  ;;  %v7204_v61 = vpop.f32.mrf.mxu1  ;;  %8737 = vst [vmem:[#allocation14_spill] sm:$0xff] %v7226_v47  ;;  %8738 = vst [vmem:[#allocation13_spill] sm:$0xff] %v7228_v27  ;;  %v7238_v47 = vadd.f32 %v7096_v3, %v8726_v33  ;;  %v5701_v33 = vld [vmem:[%s8596_s1 + $0x500] ss:$16 sps:$4 sm:$0xff]  }
 0x183   : > { %v3126_v5 = vpop.f32.mrf.mxu0  ;;  %3365 = vmatmul.mubr.bf16.gmra.mxu0 %v5689_v28  ;;  %v7206_v59 = vpop.f32.mrf.mxu1  ;;  %4038 = vmatmul.mubr.bf16.gmra.mxu1 %v5692_v50  ;;  %v5698_v28 = vld [vmem:[%s8596_s1 + $0x4e8] ss:$16 sps:$4 sm:$0xff]   ;;  %v5703_v50 = vld [vmem:[%s8596_s1 + $0x504] ss:$16 sps:$4 sm:$0xff]  }
 0x184   : > { %3374 = vmatprep.mubr.bf16.mxu0 %v5697_v45  ;;  %4047 = vmatprep.mubr.bf16.mxu1 %v5700_v29  ;;  %v5706_v45 = vld [vmem:[%s8596_s1 + $0x50c] ss:$16 sps:$4 sm:$0xff]   ;;  %v7260_v3 = vpop.permute.xlu1 %979 }
 0x185   : > { %v3128_v17 = vpop.f32.mrf.mxu0  ;;  %v7208_v34 = vpop.f32.mrf.mxu1 }
 0x187   : > { %v3130_v8 = vpop.f32.mrf.mxu0  ;;  %v7212_v53 = vpop.f32.mrf.mxu1 }
 0x188   : > { %v3131_v24 = vadd.f32 %v3130_v8, %v7064_v2 }
 0x189   : > { %v3132_v29 = vpop.f32.mrf.mxu0  ;;  %v3805_v36 = vpop.f32.mrf.mxu1 }
 0x18a   : > { %v3133_v32 = vadd.f32 %v3132_v29, %v7064_v2  ;;  %v7278_v29 = vadd.f32 %v7153_v20, %v3111_v55  ;;  %v3123_v20 = vadd.f32 %v7202_v44, %v7113_v58 }
 0x18b   : > { %v3136_v54 = vpop.f32.mrf.mxu0  ;;  %3375 = vmatmul.mubr.bf16.gmra.mxu0 %v5695_v23  ;;  %v3809_v9 = vpop.f32.mrf.mxu1  ;;  %4048 = vmatmul.mubr.bf16.gmra.mxu1 %v5698_v28  ;;  %v7241_v23 = vadd.f32 %v7105_v15, %v825_v46  ;;  %v8739_v28 = vld [vmem:[#allocation27_spill] sm:$0xff]  ;;  %v7264_v15 = vadd.f32 %v7141_v12, %v7151_v21  ;;  %v5709_v46 = vld [vmem:[%s8596_s1 + $0x524] ss:$16 sps:$4 sm:$0xff]   ;;  %v3129_v12 = vadd.f32 %v3128_v17, %v7033_v49 }
 0x18c   : > { %3384 = vmatprep.mubr.bf16.mxu0 %v5703_v50  ;;  %4057 = vmatprep.mubr.bf16.mxu1 %v5706_v45  ;;  %v7251_v50 = vadd.f32 %v7134_v11, %v830_v18  ;;  %8740 = vst [vmem:[#allocation27_spill] sm:$0xff] %v7260_v3  ;;  %v3137_v62 = vadd.f32 %v3136_v54, %v8739_v28  ;;  %v5712_v18 = vld [vmem:[%s8596_s1 + $0x52c] ss:$16 sps:$4 sm:$0xff]  }
 0x18d   : > { %v3138_v1 = vpop.f32.mrf.mxu0  ;;  %v3811_v38 = vpop.f32.mrf.mxu1  ;;  %v3119_v3 = vadd.f32 %v7180_v16, %v7103_v41  ;;  %v3127_v17 = vadd.f32 %v3126_v5, %v7033_v49  ;;  %v3806_v2 = vadd.f32 %v3805_v36, %v3133_v32  ;;  %v3804_v16 = vadd.f32 %v7212_v53, %v3131_v24 }
 0x18e   : > { %v3139_v27 = vadd.f32 %v3138_v1, %v8739_v28  ;;  %v5704_v1 = vld [vmem:[%s8596_s1 + $0x508] ss:$16 sps:$4 sm:$0xff]   ;;  %v7282_v28 = vpop.permute.xlu0 %964  ;;  %v3810_v55 = vadd.f32 %v3809_v9, %v3137_v62  ;;  %v7297_v5 = vpop.permute.xlu1 %969  ;;  %v5707_v62 = vld [vmem:[%s8596_s1 + $0x520] ss:$16 sps:$4 sm:$0xff]  }
 0x18f   : > { %v3140_v30 = vpop.f32.mrf.mxu0  ;;  %v3813_v45 = vpop.f32.mrf.mxu1  ;;  %8741 = vst [vmem:[#allocation33_spill] sm:$0xff] %v7282_v28  ;;  %v8742_v28 = vld [vmem:[#allocation24_spill] sm:$0xff] }
 0x190   : > { %v3141_v11 = vadd.f32 %v3140_v30, %v6998_v56  ;;  %v3812_v42 = vadd.f32 %v3811_v38, %v3139_v27  ;;  %v3113_v30 = vadd.f32 %v7168_v14, %v7172_v7  ;;  %v3121_v7 = vadd.f32 %v7184_v37, %v7113_v58 }
 0x191   : > { %v3142_v21 = vpop.f32.mrf.mxu0  ;;  %v3815_v54 = vpop.f32.mrf.mxu1  ;;  %v3800_v58 = vadd.f32 %v7206_v59, %v3127_v17  ;;  %v4357_v37 = vmax.f32 %v3806_v2, 0.0  ;;  %v5715_v59 = vld [vmem:[%s8596_s1 + $0x544] ss:$16 sps:$4 sm:$0xff]  }
 0x192   : > { %v3814_v35 = vadd.f32 %v3813_v45, %v3141_v11  ;;  %v3143_v52 = vadd.f32 %v3142_v21, %v6998_v56  ;;  %v3802_v56 = vadd.f32 %v7208_v34, %v3129_v12  ;;  %v4359_v44 = vmax.f32 %v3812_v42, 0.0  ;;  %v7310_v11 = vpop.permute.xlu0 %954 }
 0x193   : > { %v3146_v38 = vpop.f32.mrf.mxu0  ;;  %3385 = vmatmul.mubr.bf16.gmra.mxu0 %v5701_v33  ;;  %v3819_v27 = vpop.f32.mrf.mxu1  ;;  %4058 = vmatmul.mubr.bf16.gmra.mxu1 %v5704_v1  ;;  %v3117_v33 = vadd.f32 %v7174_v6, %v7103_v41  ;;  %v3796_v1 = vadd.f32 %v7204_v61, %v3123_v20  ;;  %v8743_v41 = vld [vmem:[#allocation26_spill] sm:$0xff]  ;;  %v3792_v12 = vadd.f32 %v7182_v0, %v3119_v3  ;;  %v4356_v21 = vmax.f32 %v3804_v16, 0.0  ;;  %v5718_v20 = vld [vmem:[%s8596_s1 + $0x54c] ss:$16 sps:$4 sm:$0xff]  }
 0x194   : > { %v3816_v8 = vadd.f32 %v3815_v54, %v3143_v52  ;;  %v3147_v14 = vadd.f32 %v3146_v38, %v8742_v28  ;;  %3394 = vmatprep.mubr.bf16.mxu0 %v5709_v46  ;;  %4067 = vmatprep.mubr.bf16.mxu1 %v5712_v18  ;;  %v4360_v32 = vmax.f32 %v3814_v35, 0.0  ;;  %v5710_v35 = vld [vmem:[%s8596_s1 + $0x528] ss:$16 sps:$4 sm:$0xff]   ;;  %v4358_v46 = vmax.f32 %v3810_v55, 0.0 }
 0x195   : > { %v3148_v49 = vpop.f32.mrf.mxu0  ;;  %v3821_v36 = vpop.f32.mrf.mxu1  ;;  %v7318_v24 = vadd.f32 %v7186_v60, %v3121_v7  ;;  %v4355_v42 = vmax.f32 %v3802_v56, 0.0  ;;  %v7324_v17 = vadd.f32 %v7170_v25, %v3113_v30  ;;  %v3790_v0 = vadd.f32 %v7176_v40, %v3117_v33  ;;  %v8744_v30 = vld [vmem:[#allocation22_spill] sm:$0xff] }
 0x196   : > { %v4361_v45 = vmax.f32 %v3816_v8, 0.0  ;;  %v3820_v9 = vadd.f32 %v3819_v27, %v3147_v14  ;;  %v3149_v52 = vadd.f32 %v3148_v49, %v8742_v28  ;;  %v4584_v2 = vpack.c.bf16 %v4360_v32, %v4358_v46  ;;  %v7328_v7 = vpop.permute.xlu1 %959  ;;  %v7332_v33 = vpop.permute.xlu0 %1104 }
 0x197   : > { %v3150_v34 = vpop.f32.mrf.mxu0  ;;  %v3823_v53 = vpop.f32.mrf.mxu1  ;;  %v4353_v60 = vmax.f32 %v3796_v1, 0.0  ;;  %v4354_v3 = vmax.f32 %v3800_v58, 0.0  ;;  %v4583_v14 = vpack.c.bf16 %v4357_v37, %v4355_v42  ;;  %v4351_v49 = vmax.f32 %v3792_v12, 0.0  ;;  %8745 = vst [vmem:[#allocation24_spill] sm:$0xff] %v7332_v33  ;;  %v8747_v12 = vld [vmem:[#allocation23_spill] sm:$0xff] }
 0x198   : > { %v3822_v18 = vadd.f32 %v3821_v36, %v3149_v52  ;;  %v3151_v6 = vadd.f32 %v3150_v34, %v8743_v41  ;;  %v4585_v61 = vpack.c.bf16 %v4361_v45, %v4359_v44  ;;  %v4362_v56 = vmax.f32 %v3820_v9, 0.0 }
 0x199   : > { %v3152_v54 = vpop.f32.mrf.mxu0  ;;  %v3825_v28 = vpop.f32.mrf.mxu1  ;;  %v4352_v36 = vmax.f32 %v7318_v24, 0.0  ;;  %v4582_v40 = vpack.c.bf16 %v4356_v21, %v4354_v3  ;;  %v3776_v34 = vadd.f32 %v7136_v19, %v7251_v50  ;;  %v3774_v24 = vadd.f32 %v7119_v51, %v7248_v63 }
 0x19a   : > { %v3824_v38 = vadd.f32 %v3823_v53, %v3151_v6  ;;  %v3153_v27 = vadd.f32 %v3152_v54, %v8743_v41  ;;  %4750 = vmatprep.subr.bf16.mxu0 %v4585_v61  ;;  %v4363_v32 = vmax.f32 %v3822_v18, 0.0  ;;  %v3780_v53 = vadd.f32 %v7143_v31, %v7264_v15  ;;  %v5713_v41 = vld [vmem:[%s8596_s1 + $0x540] ss:$16 sps:$4 sm:$0xff]   ;;  %v5716_v6 = vld [vmem:[%s8596_s1 + $0x548] ss:$16 sps:$4 sm:$0xff]  }
 0x19b   : > { %v3156_v55 = vpop.f32.mrf.mxu0  ;;  %3395 = vmatmul.mubr.bf16.gmra.mxu0 %v5707_v62  ;;  %v3829_v8 = vpop.f32.mrf.mxu1  ;;  %4068 = vmatmul.mubr.bf16.gmra.mxu1 %v5710_v35  ;;  %v4349_v62 = vmax.f32 %v7324_v17, 0.0  ;;  %v4581_v18 = vpack.c.bf16 %v4353_v60, %v4351_v49  ;;  %v4350_v61 = vmax.f32 %v3790_v0, 0.0  ;;  %v5721_v31 = vld [vmem:[%s8596_s1 + $0x564] ss:$16 sps:$4 sm:$0xff]   ;;  %v3772_v15 = vadd.f32 %v7111_v13, %v7245_v26 }
 0x19c   : > { %v4364_v16 = vmax.f32 %v3824_v38, 0.0  ;;  %v3826_v25 = vadd.f32 %v3825_v28, %v3153_v27  ;;  %v3157_v44 = vadd.f32 %v3156_v55, %v8744_v30  ;;  %4751 = vmatpush2.bf16.msra.mxu0 %v4584_v2  ;;  %3404 = vmatprep.mubr.bf16.mxu0 %v5715_v59  ;;  %v4347_v42 = vmax.f32 %v7267_v57, 0.0  ;;  %v7363_v17 = vpop.permute.xlu1 %1109  ;;  %v7370_v60 = vpop.permute.xlu0 %1264 }
 0x19d   : > { %4752 = vmatprep.subr.bf16.mxu0 %v4583_v14  ;;  %v3158_v45 = vpop.f32.mrf.mxu0  ;;  %v3831_v52 = vpop.f32.mrf.mxu1  ;;  %4077 = vmatprep.mubr.bf16.mxu1 %v5718_v20  ;;  %v4348_v21 = vmax.f32 %v7278_v29, 0.0  ;;  %v5724_v20 = vld [vmem:[%s8596_s1 + $0x56c] ss:$16 sps:$4 sm:$0xff]   ;;  %8749 = vst [vmem:[#allocation23_spill] sm:$0xff] %v7363_v17  ;;  %v3766_v2 = vadd.f32 %v7098_v39, %v7238_v47  ;;  %v4580_v13 = vpack.c.bf16 %v4352_v36, %v4350_v61  ;;  %v4345_v57 = vmax.f32 %v3776_v34, 0.0  ;;  %v8751_v39 = vld [vmem:[#allocation20_spill] sm:$0xff] }
 0x19e   : > { %v7334_v1 = vpack.c.bf16 %v4364_v16, %v4362_v56  ;;  %v4365_v9 = vmax.f32 %v3826_v25, 0.0  ;;  %v3830_v58 = vadd.f32 %v3829_v8, %v3157_v44  ;;  %v3159_v37 = vadd.f32 %v3158_v45, %v8744_v30  ;;  %8750 = vst [vmem:[#allocation34_spill] sm:$0xff] %v7370_v60  ;;  %v8773_v17 = vld [vmem:[#allocation11_spill] sm:$0xff] }
 0x19f   : > { %v3160_v35 = vpop.f32.mrf.mxu0  ;;  %v3833_v46 = vpop.f32.mrf.mxu1  ;;  %v3770_v63 = vadd.f32 %v7107_v48, %v7241_v23  ;;  %v4346_v29 = vmax.f32 %v3780_v53, 0.0  ;;  %v4579_v0 = vpack.c.bf16 %v4349_v62, %v4347_v42  ;;  %v3762_v14 = vadd.f32 %v7078_v4, %v7234_v22  ;;  %v5719_v22 = vld [vmem:[%s8596_s1 + $0x560] ss:$16 sps:$4 sm:$0xff]   ;;  %v5722_v4 = vld [vmem:[%s8596_s1 + $0x568] ss:$16 sps:$4 sm:$0xff]  }
 0x1a0   : > { %8746 = vst [vmem:[#allocation26_spill] sm:$0xff] %v7334_v1  ;;  %v3832_v59 = vadd.f32 %v3831_v52, %v3159_v37  ;;  %v3161_v19 = vadd.f32 %v3160_v35, %v8747_v12  ;;  %4753 = vmatpush2.bf16.msra.mxu0 %v4582_v40  ;;  %v7352_v50 = vpack.c.bf16 %v4365_v9, %v4363_v32  ;;  %v4366_v3 = vmax.f32 %v3830_v58, 0.0  ;;  %v7387_v9 = vpop.permute.xlu1 %1269  ;;  %v8754_v37 = vld [vmem:[#allocation21_spill] sm:$0xff]  ;;  %v5727_v53 = vld [vmem:[%s8596_s1 + $0x584] ss:$16 sps:$4 sm:$0xff]  }
 0x1a1   : > { %4754 = vmatprep.subr.bf16.mxu0 %v4581_v18  ;;  %v3162_v54 = vpop.f32.mrf.mxu0  ;;  %v3835_v28 = vpop.f32.mrf.mxu1  ;;  %v4343_v48 = vmax.f32 %v3772_v15, 0.0  ;;  %v4344_v23 = vmax.f32 %v3774_v24, 0.0  ;;  %v4578_v56 = vpack.c.bf16 %v4348_v21, %v4346_v29  ;;  %v4341_v40 = vmax.f32 %v3766_v2, 0.0  ;;  %8753 = vst [vmem:[#allocation35_spill] sm:$0xff] %v7387_v9  ;;  %v8770_v9 = vld [vmem:[#allocation19_spill] sm:$0xff] }
 0x1a2   : > { %8748 = vst [vmem:[#allocation22_spill] sm:$0xff] %v7352_v50  ;;  %v3834_v26 = vadd.f32 %v3833_v46, %v3161_v19  ;;  %v3163_v51 = vadd.f32 %v3162_v54, %v8747_v12  ;;  %v4367_v30 = vmax.f32 %v3832_v59, 0.0  ;;  %v4342_v58 = vmax.f32 %v3770_v63, 0.0  ;;  %v5733_v63 = vld [vmem:[%s8596_s1 + $0x5a4] ss:$16 sps:$4 sm:$0xff]  }
 0x1a3   : > { %v3166_v38 = vpop.f32.mrf.mxu0  ;;  %3405 = vmatmul.mubr.bf16.gmra.mxu0 %v5713_v41  ;;  %v3839_v27 = vpop.f32.mrf.mxu1  ;;  %4078 = vmatmul.mubr.bf16.gmra.mxu1 %v5716_v6  ;;  %v4577_v52 = vpack.c.bf16 %v4345_v57, %v4343_v48  ;;  %v4339_v35 = vmax.f32 %v3762_v14, 0.0  ;;  %v5730_v41 = vld [vmem:[%s8596_s1 + $0x58c] ss:$16 sps:$4 sm:$0xff]  }
 0x1a4   : > { %v4368_v55 = vmax.f32 %v3834_v26, 0.0  ;;  %v3836_v8 = vadd.f32 %v3835_v28, %v3163_v51  ;;  %v3167_v47 = vadd.f32 %v3166_v38, %v8751_v39  ;;  %4755 = vmatpush2.bf16.msra.mxu0 %v4580_v13  ;;  %3414 = vmatprep.mubr.bf16.mxu0 %v5721_v31  ;;  %v7402_v6 = vpop.permute.xlu0 %1094  ;;  %v4576_v61 = vpack.c.bf16 %v4344_v23, %v4342_v58  ;;  %v7412_v54 = vpop.permute.xlu1 %1099  ;;  %v5725_v13 = vld [vmem:[%s8596_s1 + $0x580] ss:$16 sps:$4 sm:$0xff]   ;;  %v5728_v26 = vld [vmem:[%s8596_s1 + $0x588] ss:$16 sps:$4 sm:$0xff]  }
 0x1a5   : > { %4756 = vmatprep.subr.bf16.mxu0 %v4579_v0  ;;  %v7375_v16 = vpop.f32.mrf.mxu0  ;;  %v7377_v25 = vpop.f32.mrf.mxu1  ;;  %4087 = vmatprep.mubr.bf16.mxu1 %v5724_v20  ;;  %8756 = vst [vmem:[#allocation36_spill] sm:$0xff] %v7402_v6  ;;  %v4575_v31 = vpack.c.bf16 %v4341_v40, %v4339_v35  ;;  %8757 = vst [vmem:[#allocation37_spill] sm:$0xff] %v7412_v54  ;;  %v5736_v38 = vld [vmem:[%s8596_s1 + $0x5ac] ss:$16 sps:$4 sm:$0xff]   ;;  %v5731_v23 = vld [vmem:[%s8596_s1 + $0x5a0] ss:$16 sps:$4 sm:$0xff]  }
 0x1a6   : > { %v7379_v44 = vpack.c.bf16 %v4368_v55, %v4366_v3  ;;  %v4369_v49 = vmax.f32 %v3836_v8, 0.0  ;;  %v3840_v36 = vadd.f32 %v3839_v27, %v3167_v47  ;;  %v8760_v3 = vld [vmem:[#allocation2_spill] sm:$0xff] }
 0x1a7   : > { %v3170_v32 = vpop.f32.mrf.mxu0  ;;  %v3843_v45 = vpop.f32.mrf.mxu1 }
 0x1a8   : > { %8752 = vst [vmem:[#allocation20_spill] sm:$0xff] %v7379_v44  ;;  %v3171_v34 = vadd.f32 %v3170_v32, %v8754_v37  ;;  %4757 = vmatpush2.bf16.msra.mxu0 %v4578_v56  ;;  %v7393_v62 = vpack.c.bf16 %v4369_v49, %v4367_v30  ;;  %v4370_v15 = vmax.f32 %v3840_v36, 0.0  ;;  %v7426_v51 = vpop.permute.xlu0 %1254  ;;  %v5734_v56 = vld [vmem:[%s8596_s1 + $0x5a8] ss:$16 sps:$4 sm:$0xff]   ;;  %v8763_v30 = vld [vmem:[#allocation30_spill] sm:$0xff] }
 0x1a9   : > { %4758 = vmatprep.subr.bf16.mxu0 %v4577_v52  ;;  %v7395_v46 = vpop.f32.mrf.mxu0  ;;  %v7397_v18 = vpop.f32.mrf.mxu1  ;;  %8758 = vst [vmem:[#allocation38_spill] sm:$0xff] %v7426_v51  ;;  %v5739_v49 = vld [vmem:[%s8596_s1 + $0x5c4] ss:$16 sps:$4 sm:$0xff]   ;;  %v5742_v36 = vld [vmem:[%s8596_s1 + $0x5cc] ss:$16 sps:$4 sm:$0xff]  }
 0x1aa   : > { %8755 = vst [vmem:[#allocation21_spill] sm:$0xff] %v7393_v62  ;;  %v3844_v59 = vadd.f32 %v3843_v45, %v3171_v34 }
 0x1ab   : > { %v7404_v12 = vpop.f32.mrf.mxu0  ;;  %3415 = vmatmul.mubr.bf16.gmra.mxu0 %v5719_v22  ;;  %v7406_v19 = vpop.f32.mrf.mxu1  ;;  %4088 = vmatmul.mubr.bf16.gmra.mxu1 %v5722_v4 }
 0x1ac   : > { %v4372_v24 = vmax.f32 %v3844_v59, 0.0  ;;  %4759 = vmatpush2.bf16.msra.mxu0 %v4576_v61  ;;  %3424 = vmatprep.mubr.bf16.mxu0 %v5727_v53  ;;  %v7450_v47 = vpop.permute.xlu0 %1084  ;;  %v5740_v61 = vld [vmem:[%s8596_s1 + $0x5c8] ss:$16 sps:$4 sm:$0xff]  }
 0x1ad   : > { %4760 = vmatprep.subr.bf16.mxu0 %v4575_v31  ;;  %v7408_v42 = vpop.f32.mrf.mxu0  ;;  %v7410_v21 = vpop.f32.mrf.mxu1  ;;  %4097 = vmatprep.mubr.bf16.mxu1 %v5730_v41  ;;  %8762 = vst [vmem:[#allocation2_spill] sm:$0xff] %v7450_v47  ;;  %v5737_v41 = vld [vmem:[%s8596_s1 + $0x5c0] ss:$16 sps:$4 sm:$0xff]   ;;  %v5745_v31 = vld [vmem:[%s8596_s1 + $0x5e4] ss:$16 sps:$4 sm:$0xff]  }
 0x1ae   : > { %v7414_v28 = vpack.c.bf16 %v4372_v24, %v4370_v15  ;;  %v5748_v15 = vld [vmem:[%s8596_s1 + $0x5ec] ss:$16 sps:$4 sm:$0xff]   ;;  %v8772_v47 = vld [vmem:[#allocation10_spill] sm:$0xff] }
 0x1af   : > { %v7416_v20 = vpop.f32.mrf.mxu0  ;;  %v7418_v2 = vpop.f32.mrf.mxu1 }
 0x1b0   : > { %4761 = vmatpush2.bf16.msra.mxu0 %v7115_v10  ;;  %v7444_v10 = vpop.permute.xlu1 %1259  ;;  %v7477_v4 = vpop.permute.xlu0 %1244 }
 0x1b1   : > { %4762 = vmatprep.subr.bf16.mxu0 %v7094_v43  ;;  %v7433_v57 = vpop.f32.mrf.mxu0  ;;  %v7435_v29 = vpop.f32.mrf.mxu1  ;;  %8759 = vst [vmem:[#allocation39_spill] sm:$0xff] %v7444_v10  ;;  %v8761_v43 = vld [vmem:[#allocation31_spill] sm:$0xff]  ;;  %8765 = vst [vmem:[#allocation30_spill] sm:$0xff] %v7477_v4 }
 0x1b2   : > { %v3183_v51 = vadd.f32 %v7433_v57, %v8770_v9 }
 0x1b3   : > { %v7440_v27 = vpop.f32.mrf.mxu0  ;;  %3425 = vmatmul.mubr.bf16.gmra.mxu0 %v5725_v13  ;;  %v7442_v0 = vpop.f32.mrf.mxu1  ;;  %4098 = vmatmul.mubr.bf16.gmra.mxu1 %v5728_v26 }
 0x1b4   : > { %4763 = vmatpush2.bf16.msra.mxu0 %v8760_v3  ;;  %3434 = vmatprep.mubr.bf16.mxu0 %v5733_v63  ;;  %v7471_v45 = vpop.permute.xlu1 %1089  ;;  %v7503_v26 = vpop.permute.xlu0 %1074 }
 0x1b5   : > { %4764 = vmatprep.subr.bf16.mxu0 %v8761_v43  ;;  %v3188_v55 = vpop.f32.mrf.mxu0  ;;  %v7448_v8 = vpop.f32.mrf.mxu1  ;;  %4107 = vmatprep.mubr.bf16.mxu1 %v5736_v38  ;;  %8764 = vst [vmem:[#allocation31_spill] sm:$0xff] %v7471_v45  ;;  %8767 = vst [vmem:[#allocation41_spill] sm:$0xff] %v7503_v26 }
 0x1b6   : > { %v3189_v45 = vadd.f32 %v3188_v55, %v8772_v47 }
 0x1b7   : > { %v7452_v14 = vpop.f32.mrf.mxu0  ;;  %v7454_v48 = vpop.f32.mrf.mxu1 }
 0x1b8   : > { %4765 = vmatpush2.bf16.msra.mxu0 %v8763_v30  ;;  %v7493_v59 = vpop.permute.xlu1 %1249 }
 0x1b9   : > { %v3192_v40 = vpop.f32.mrf.mxu0  ;;  %v7469_v32 = vpop.f32.mrf.mxu1  ;;  %8766 = vst [vmem:[#allocation40_spill] sm:$0xff] %v7493_v59  ;;  %v3173_v59 = vadd.f32 %v7395_v46, %v8754_v37  ;;  %v7542_v46 = vadd.f32 %v7375_v16, %v8751_v39  ;;  %v7561_v39 = vadd.f32 %v7440_v27, %v8772_v47  ;;  %v8779_v27 = vld [vmem:[#allocation5_spill] sm:$0xff]  ;;  %v5757_v47 = vld [vmem:[%s8596_s1 + $0x624] ss:$16 sps:$4 sm:$0xff]  }
 0x1ba   : > { %v3193_v6 = vadd.f32 %v3192_v40, %v8773_v17  ;;  %v7554_v40 = vadd.f32 %v7416_v20, %v8770_v9  ;;  %v5752_v9 = vld [vmem:[%s8596_s1 + $0x608] ss:$16 sps:$4 sm:$0xff]   ;;  %v3191_v20 = vadd.f32 %v7452_v14, %v8773_v17 }
 0x1bb   : > { %v7473_v52 = vpop.f32.mrf.mxu0  ;;  %3435 = vmatmul.mubr.bf16.gmra.mxu0 %v5731_v23  ;;  %v7475_v22 = vpop.f32.mrf.mxu1  ;;  %4108 = vmatmul.mubr.bf16.gmra.mxu1 %v5734_v56  ;;  %v7545_v57 = vadd.f32 %v7397_v18, %v3173_v59 }
 0x1bc   : > { %3444 = vmatprep.mubr.bf16.mxu0 %v5739_v49  ;;  %4117 = vmatprep.mubr.bf16.mxu1 %v5742_v36  ;;  %v7511_v23 = vpop.permute.xlu1 %1079  ;;  %v5743_v49 = vld [vmem:[%s8596_s1 + $0x5e0] ss:$16 sps:$4 sm:$0xff]   ;;  %v5746_v36 = vld [vmem:[%s8596_s1 + $0x5e8] ss:$16 sps:$4 sm:$0xff]  }
 0x1bd   : > { %v7479_v58 = vpop.f32.mrf.mxu0  ;;  %v7481_v34 = vpop.f32.mrf.mxu1  ;;  %8768 = vst [vmem:[#allocation42_spill] sm:$0xff] %v7511_v23  ;;  %v8774_v23 = vld [vmem:[#allocation7_spill] sm:$0xff] }
 0x1bf   : > { %v7483_v53 = vpop.f32.mrf.mxu0  ;;  %v7485_v35 = vpop.f32.mrf.mxu1 }
 0x1c1   : > { %v3202_v24 = vpop.f32.mrf.mxu0  ;;  %v7501_v13 = vpop.f32.mrf.mxu1 }
 0x1c3   : > { %v7505_v63 = vpop.f32.mrf.mxu0  ;;  %3445 = vmatmul.mubr.bf16.gmra.mxu0 %v5737_v41  ;;  %v7507_v38 = vpop.f32.mrf.mxu1  ;;  %4118 = vmatmul.mubr.bf16.gmra.mxu1 %v5740_v61  ;;  %v5751_v61 = vld [vmem:[%s8596_s1 + $0x604] ss:$16 sps:$4 sm:$0xff]  }
 0x1c4   : > { %3454 = vmatprep.mubr.bf16.mxu0 %v5745_v31  ;;  %4127 = vmatprep.mubr.bf16.mxu1 %v5748_v15  ;;  %v7521_v41 = vpop.permute.xlu0 %1234  ;;  %v5754_v31 = vld [vmem:[%s8596_s1 + $0x60c] ss:$16 sps:$4 sm:$0xff]  }
 0x1c5   : > { %v3208_v3 = vpop.f32.mrf.mxu0  ;;  %v7509_v43 = vpop.f32.mrf.mxu1  ;;  %8769 = vst [vmem:[#allocation43_spill] sm:$0xff] %v7521_v41 }
 0x1c6   : > { %v7533_v41 = vpop.permute.xlu1 %1239 }
 0x1c7   : > { %v3210_v56 = vpop.f32.mrf.mxu0  ;;  %v7513_v30 = vpop.f32.mrf.mxu1  ;;  %8771 = vst [vmem:[#allocation19_spill] sm:$0xff] %v7533_v41 }
 0x1c8   : > { %v7538_v37 = vpop.permute.xlu0 %1064  ;;  %v3211_v41 = vadd.f32 %v3210_v56, %v8774_v23 }
 0x1c9   : > { %v3212_v15 = vpop.f32.mrf.mxu0  ;;  %v3885_v4 = vpop.f32.mrf.mxu1  ;;  %8775 = vst [vmem:[#allocation10_spill] sm:$0xff] %v7538_v37 }
 0x1ca   : > { %v3213_v33 = vadd.f32 %v3212_v15, %v8774_v23  ;;  %v5760_v15 = vld [vmem:[%s8596_s1 + $0x62c] ss:$16 sps:$4 sm:$0xff]   ;;  %v7588_v37 = vpop.permute.xlu1 %1069 }
 0x1cb   : > { %v3216_v60 = vpop.f32.mrf.mxu0  ;;  %3455 = vmatmul.mubr.bf16.gmra.mxu0 %v5743_v49  ;;  %v3889_v10 = vpop.f32.mrf.mxu1  ;;  %4128 = vmatmul.mubr.bf16.gmra.mxu1 %v5746_v36  ;;  %v8776_v49 = vld [vmem:[#allocation12_spill] sm:$0xff]  ;;  %8781 = vst [vmem:[#allocation11_spill] sm:$0xff] %v7588_v37 }
 0x1cc   : > { %3464 = vmatprep.mubr.bf16.mxu0 %v5751_v61  ;;  %4137 = vmatprep.mubr.bf16.mxu1 %v5754_v31  ;;  %v7549_v55 = vadd.f32 %v7408_v42, %v8776_v49  ;;  %v8777_v36 = vld [vmem:[#allocation4_spill] sm:$0xff]  ;;  %v7557_v31 = vadd.f32 %v7435_v29, %v3183_v51  ;;  %v8778_v51 = vld [vmem:[#allocation6_spill] sm:$0xff]  ;;  %v3886_v17 = vadd.f32 %v3885_v4, %v3213_v33  ;;  %v7597_v4 = vpop.permute.xlu0 %1224 }
 0x1cd   : > { %v3218_v54 = vpop.f32.mrf.mxu0  ;;  %v3891_v26 = vpop.f32.mrf.mxu1  ;;  %v3217_v16 = vadd.f32 %v3216_v60, %v8777_v36  ;;  %v5749_v42 = vld [vmem:[%s8596_s1 + $0x600] ss:$16 sps:$4 sm:$0xff]   ;;  %v3209_v29 = vadd.f32 %v3208_v3, %v8778_v51  ;;  %8783 = vst [vmem:[#allocation7_spill] sm:$0xff] %v7597_v4 }
 0x1ce   : > { %v3219_v61 = vadd.f32 %v3218_v54, %v8777_v36  ;;  %v7571_v54 = vadd.f32 %v7448_v8, %v3189_v45  ;;  %v7584_v36 = vadd.f32 %v7469_v32, %v3193_v6  ;;  %v8780_v8 = vld [vmem:[#allocation9_spill] sm:$0xff]  ;;  %v3207_v32 = vadd.f32 %v7505_v63, %v8778_v51 }
 0x1cf   : > { %v3220_v18 = vpop.f32.mrf.mxu0  ;;  %v3893_v59 = vpop.f32.mrf.mxu1  ;;  %v3203_v45 = vadd.f32 %v3202_v24, %v8780_v8  ;;  %v3201_v6 = vadd.f32 %v7483_v53, %v8780_v8  ;;  %v3890_v24 = vadd.f32 %v3889_v10, %v3217_v16  ;;  %v3882_v56 = vadd.f32 %v7509_v43, %v3209_v29 }
 0x1d0   : > { %v3221_v60 = vadd.f32 %v3220_v18, %v8779_v27  ;;  %v8782_v18 = vld [vmem:[#allocation8_spill] sm:$0xff]  ;;  %v3892_v50 = vadd.f32 %v3891_v26, %v3219_v61  ;;  %v3884_v53 = vadd.f32 %v7513_v30, %v3211_v41  ;;  %v3880_v29 = vadd.f32 %v7507_v38, %v3207_v32  ;;  %v7611_v30 = vpop.permute.xlu1 %1229 }
 0x1d1   : > { %v3222_v14 = vpop.f32.mrf.mxu0  ;;  %v3895_v3 = vpop.f32.mrf.mxu1  ;;  %v3199_v1 = vadd.f32 %v7479_v58, %v8782_v18  ;;  %v3876_v61 = vadd.f32 %v7501_v13, %v3203_v45  ;;  %8784 = vst [vmem:[#allocation12_spill] sm:$0xff] %v7611_v30  ;;  %v7627_v32 = vadd.f32 %v7454_v48, %v3191_v20 }
 0x1d2   : > { %v3894_v44 = vadd.f32 %v3893_v59, %v3221_v60  ;;  %v3223_v62 = vadd.f32 %v3222_v14, %v8779_v27  ;;  %v4389_v59 = vmax.f32 %v3886_v17, 0.0  ;;  %v4390_v60 = vmax.f32 %v3890_v24, 0.0  ;;  %v5763_v14 = vld [vmem:[%s8596_s1 + $0x644] ss:$16 sps:$4 sm:$0xff]  }
 0x1d3   : > { %v3226_v23 = vpop.f32.mrf.mxu0  ;;  %3465 = vmatmul.mubr.bf16.gmra.mxu0 %v5749_v42  ;;  %v3899_v33 = vpop.f32.mrf.mxu1  ;;  %4138 = vmatmul.mubr.bf16.gmra.mxu1 %v5752_v9  ;;  %v4391_v42 = vmax.f32 %v3892_v50, 0.0  ;;  %v3872_v43 = vadd.f32 %v7481_v34, %v3199_v1  ;;  %v4387_v50 = vmax.f32 %v3882_v56, 0.0  ;;  %v5758_v1 = vld [vmem:[%s8596_s1 + $0x628] ss:$16 sps:$4 sm:$0xff]   ;;  %v4385_v34 = vmax.f32 %v3876_v61, 0.0 }
 0x1d4   : > { %v3896_v58 = vadd.f32 %v3895_v3, %v3223_v62  ;;  %v3227_v26 = vadd.f32 %v3226_v23, %v7310_v11  ;;  %3474 = vmatprep.mubr.bf16.mxu0 %v5757_v47  ;;  %4147 = vmatprep.mubr.bf16.mxu1 %v5760_v15  ;;  %v4392_v63 = vmax.f32 %v3894_v44, 0.0  ;;  %v3197_v62 = vadd.f32 %v7473_v52, %v8782_v18  ;;  %v5755_v44 = vld [vmem:[%s8596_s1 + $0x620] ss:$16 sps:$4 sm:$0xff]   ;;  %v5766_v3 = vld [vmem:[%s8596_s1 + $0x64c] ss:$16 sps:$4 sm:$0xff]   ;;  %v7624_v18 = vpop.permute.xlu0 %1054 }
 0x1d5   : > { %v3228_v10 = vpop.f32.mrf.mxu0  ;;  %v3901_v16 = vpop.f32.mrf.mxu1  ;;  %v3874_v52 = vadd.f32 %v7485_v35, %v3201_v6  ;;  %v4388_v38 = vmax.f32 %v3884_v53, 0.0  ;;  %8785 = vst [vmem:[#allocation4_spill] sm:$0xff] %v7624_v18  ;;  %v4599_v24 = vpack.c.bf16 %v4389_v59, %v4387_v50  ;;  %v4381_v23 = vmax.f32 %v7584_v36, 0.0 }
 0x1d6   : > { %v4393_v51 = vmax.f32 %v3896_v58, 0.0  ;;  %v3229_v9 = vadd.f32 %v3228_v10, %v7310_v11  ;;  %v3900_v27 = vadd.f32 %v3899_v33, %v3227_v26  ;;  %v4600_v8 = vpack.c.bf16 %v4392_v63, %v4390_v60  ;;  %v8786_v10 = vld [vmem:[#allocation33_spill] sm:$0xff] }
 0x1d7   : > { %v3230_v13 = vpop.f32.mrf.mxu0  ;;  %v3903_v47 = vpop.f32.mrf.mxu1  ;;  %v3870_v33 = vadd.f32 %v7475_v22, %v3197_v62  ;;  %v4383_v56 = vmax.f32 %v3872_v43, 0.0  ;;  %v4386_v58 = vmax.f32 %v3880_v29, 0.0  ;;  %v3177_v29 = vadd.f32 %v7404_v12, %v8776_v49 }
 0x1d8   : > { %v3231_v11 = vadd.f32 %v3230_v13, %v7328_v7  ;;  %v3902_v41 = vadd.f32 %v3901_v16, %v3229_v9  ;;  %v4601_v15 = vpack.c.bf16 %v4393_v51, %v4391_v42  ;;  %v4394_v53 = vmax.f32 %v3900_v27, 0.0  ;;  %v7633_v22 = vpop.permute.xlu1 %1059 }
 0x1d9   : > { %v3232_v45 = vpop.f32.mrf.mxu0  ;;  %v3905_v17 = vpop.f32.mrf.mxu1  ;;  %v4598_v16 = vpack.c.bf16 %v4388_v38, %v4386_v58  ;;  %v4597_v51 = vpack.c.bf16 %v4385_v34, %v4383_v56  ;;  %8787 = vst [vmem:[#allocation6_spill] sm:$0xff] %v7633_v22  ;;  %v3852_v60 = vadd.f32 %v7410_v21, %v7549_v55  ;;  %v3860_v13 = vadd.f32 %v7442_v0, %v7561_v39  ;;  %v5764_v21 = vld [vmem:[%s8596_s1 + $0x648] ss:$16 sps:$4 sm:$0xff]   ;;  %v5769_v38 = vld [vmem:[%s8596_s1 + $0x664] ss:$16 sps:$4 sm:$0xff]  }
 0x1da   : > { %v3233_v35 = vadd.f32 %v3232_v45, %v7328_v7  ;;  %v3904_v6 = vadd.f32 %v3903_v47, %v3231_v11  ;;  %4775 = vmatprep.subr.bf16.mxu1 %v4601_v15  ;;  %v4384_v7 = vmax.f32 %v3874_v52, 0.0  ;;  %v4395_v59 = vmax.f32 %v3902_v41, 0.0  ;;  %v5761_v11 = vld [vmem:[%s8596_s1 + $0x640] ss:$16 sps:$4 sm:$0xff]   ;;  %v7647_v41 = vpop.permute.xlu0 %1214  ;;  %v8792_v56 = vld [vmem:[#allocation13_spill] sm:$0xff] }
 0x1db   : > { %v3236_v26 = vpop.f32.mrf.mxu0  ;;  %3475 = vmatmul.mubr.bf16.gmra.mxu0 %v5755_v44  ;;  %4776 = vmatpush1.bf16.msra.mxu1 %v4600_v8  ;;  %v3909_v61 = vpop.f32.mrf.mxu1  ;;  %v4382_v47 = vmax.f32 %v3870_v33, 0.0  ;;  %8789 = vst [vmem:[#allocation9_spill] sm:$0xff] %v7647_v41  ;;  %v4379_v15 = vmax.f32 %v7571_v54, 0.0  ;;  %v3854_v55 = vadd.f32 %v7418_v2, %v7554_v40  ;;  %v4377_v39 = vmax.f32 %v7557_v31, 0.0  ;;  %v5772_v8 = vld [vmem:[%s8596_s1 + $0x66c] ss:$16 sps:$4 sm:$0xff]  }
 0x1dc   : > { %v4396_v63 = vmax.f32 %v3904_v6, 0.0  ;;  %v3237_v48 = vadd.f32 %v3236_v26, %v8786_v10  ;;  %v3906_v20 = vadd.f32 %v3905_v17, %v3233_v35  ;;  %4777 = vmatprep.subr.bf16.mxu1 %v4599_v24  ;;  %4148 = vmatmul.mubr.bf16.gmra.mxu1 %v5758_v1  ;;  %v4380_v1 = vmax.f32 %v7627_v32, 0.0  ;;  %v7670_v6 = vpop.permute.xlu1 %1219 }
 0x1dd   : > { %v3238_v42 = vpop.f32.mrf.mxu0  ;;  %v3911_v36 = vpop.f32.mrf.mxu1  ;;  %3484 = vmatprep.mubr.bf16.mxu0 %v5763_v14  ;;  %4157 = vmatprep.mubr.bf16.mxu1 %v5766_v3  ;;  %v4596_v52 = vpack.c.bf16 %v4384_v7, %v4382_v47  ;;  %v4595_v14 = vpack.c.bf16 %v4381_v23, %v4379_v15  ;;  %v3842_v2 = vadd.f32 %v7377_v25, %v7542_v46  ;;  %v4375_v31 = vmax.f32 %v3852_v60, 0.0  ;;  %v5778_v47 = vld [vmem:[%s8596_s1 + $0x68c] ss:$16 sps:$4 sm:$0xff]  }
 0x1de   : > { %v7635_v9 = vpack.c.bf16 %v4396_v63, %v4394_v53  ;;  %v4397_v62 = vmax.f32 %v3906_v20, 0.0  ;;  %v3239_v27 = vadd.f32 %v3238_v42, %v8786_v10  ;;  %v3910_v43 = vadd.f32 %v3909_v61, %v3237_v48  ;;  %8791 = vst [vmem:[#allocation33_spill] sm:$0xff] %v7670_v6  ;;  %v7678_v53 = vpop.permute.xlu0 %1044  ;;  %v8810_v6 = vld [vmem:[#allocation14_spill] sm:$0xff] }
 0x1df   : > { %v3240_v44 = vpop.f32.mrf.mxu0  ;;  %4778 = vmatpush1.bf16.msra.mxu1 %v4598_v16  ;;  %v3913_v50 = vpop.f32.mrf.mxu1  ;;  %v3850_v40 = vadd.f32 %v7406_v19, %v3177_v29  ;;  %v4378_v3 = vmax.f32 %v3860_v13, 0.0  ;;  %v4373_v23 = vmax.f32 %v7545_v57, 0.0  ;;  %v4376_v25 = vmax.f32 %v3854_v55, 0.0  ;;  %v5775_v13 = vld [vmem:[%s8596_s1 + $0x684] ss:$16 sps:$4 sm:$0xff]  }
 0x1e0   : > { %8788 = vst [vmem:[#allocation5_spill] sm:$0xff] %v7635_v9  ;;  %v3241_v12 = vadd.f32 %v3240_v44, %v7297_v5  ;;  %v3912_v49 = vadd.f32 %v3911_v36, %v3239_v27  ;;  %4779 = vmatprep.subr.bf16.mxu1 %v4597_v51  ;;  %v7654_v0 = vpack.c.bf16 %v4397_v62, %v4395_v59  ;;  %v4398_v24 = vmax.f32 %v3910_v43, 0.0  ;;  %v5767_v59 = vld [vmem:[%s8596_s1 + $0x660] ss:$16 sps:$4 sm:$0xff]   ;;  %v8794_v36 = vld [vmem:[#allocation27_spill] sm:$0xff]  ;;  %v7701_v44 = vpop.permute.xlu1 %1049 }
 0x1e1   : > { %v3242_v34 = vpop.f32.mrf.mxu0  ;;  %v3915_v54 = vpop.f32.mrf.mxu1  ;;  %v4594_v46 = vpack.c.bf16 %v4380_v1, %v4378_v3  ;;  %v4593_v61 = vpack.c.bf16 %v4377_v39, %v4375_v31  ;;  %v4374_v7 = vmax.f32 %v3850_v40, 0.0  ;;  %v4371_v42 = vmax.f32 %v3842_v2, 0.0  ;;  %v5770_v62 = vld [vmem:[%s8596_s1 + $0x668] ss:$16 sps:$4 sm:$0xff]   ;;  %v5784_v40 = vld [vmem:[%s8596_s1 + $0x6ac] ss:$16 sps:$4 sm:$0xff]  }
 0x1e2   : > { %8790 = vst [vmem:[#allocation8_spill] sm:$0xff] %v7654_v0  ;;  %v3243_v45 = vadd.f32 %v3242_v34, %v7297_v5  ;;  %v3914_v17 = vadd.f32 %v3913_v50, %v3241_v12  ;;  %v4399_v63 = vmax.f32 %v3912_v49, 0.0  ;;  %v7707_v49 = vpop.permute.xlu0 %1204 }
 0x1e3   : > { %v3246_v32 = vpop.f32.mrf.mxu0  ;;  %3485 = vmatmul.mubr.bf16.gmra.mxu0 %v5761_v11  ;;  %4780 = vmatpush1.bf16.msra.mxu1 %v4596_v52  ;;  %v3919_v35 = vpop.f32.mrf.mxu1  ;;  %v4592_v43 = vpack.c.bf16 %v4376_v25, %v4374_v7  ;;  %v4591_v11 = vpack.c.bf16 %v4373_v23, %v4371_v42  ;;  %8796 = vst [vmem:[#allocation44_spill] sm:$0xff] %v7707_v49  ;;  %v8802_v25 = vld [vmem:[#allocation26_spill] sm:$0xff] }
 0x1e4   : > { %v4400_v33 = vmax.f32 %v3914_v17, 0.0  ;;  %v3247_v58 = vadd.f32 %v3246_v32, %v8792_v56  ;;  %v3916_v5 = vadd.f32 %v3915_v54, %v3243_v45  ;;  %4781 = vmatprep.subr.bf16.mxu1 %v4595_v14  ;;  %4158 = vmatmul.mubr.bf16.gmra.mxu1 %v5764_v21  ;;  %v8799_v45 = vld [vmem:[#allocation21_spill] sm:$0xff]  ;;  %v8800_v32 = vld [vmem:[#allocation20_spill] sm:$0xff]  ;;  %v8811_v49 = vld [vmem:[#allocation18_spill] sm:$0xff] }
 0x1e5   : > { %v7674_v19 = vpop.f32.mrf.mxu0  ;;  %v7676_v26 = vpop.f32.mrf.mxu1  ;;  %3494 = vmatprep.mubr.bf16.mxu0 %v5769_v38  ;;  %4167 = vmatprep.mubr.bf16.mxu1 %v5772_v8  ;;  %v5773_v38 = vld [vmem:[%s8596_s1 + $0x680] ss:$16 sps:$4 sm:$0xff]   ;;  %v5776_v17 = vld [vmem:[%s8596_s1 + $0x688] ss:$16 sps:$4 sm:$0xff]  }
 0x1e6   : > { %v7680_v10 = vpack.c.bf16 %v4400_v33, %v4398_v24  ;;  %v4401_v48 = vmax.f32 %v3916_v5, 0.0  ;;  %v3920_v20 = vadd.f32 %v3919_v35, %v3247_v58  ;;  %v7723_v8 = vpop.permute.xlu1 %1209  ;;  %v7739_v31 = vpop.permute.xlu0 %1034  ;;  %v8801_v24 = vld [vmem:[#allocation22_spill] sm:$0xff] }
 0x1e7   : > { %v3250_v16 = vpop.f32.mrf.mxu0  ;;  %4782 = vmatpush1.bf16.msra.mxu1 %v4594_v46  ;;  %v3923_v57 = vpop.f32.mrf.mxu1  ;;  %8798 = vst [vmem:[#allocation46_spill] sm:$0xff] %v7723_v8 }
 0x1e8   : > { %8793 = vst [vmem:[#allocation13_spill] sm:$0xff] %v7680_v10  ;;  %v3251_v51 = vadd.f32 %v3250_v16, %v8794_v36  ;;  %4783 = vmatprep.subr.bf16.mxu1 %v4593_v61  ;;  %v7689_v27 = vpack.c.bf16 %v4401_v48, %v4399_v63  ;;  %v4402_v21 = vmax.f32 %v3920_v20, 0.0  ;;  %v5779_v61 = vld [vmem:[%s8596_s1 + $0x6a0] ss:$16 sps:$4 sm:$0xff]   ;;  %v5782_v48 = vld [vmem:[%s8596_s1 + $0x6a8] ss:$16 sps:$4 sm:$0xff]  }
 0x1e9   : > { %v7691_v29 = vpop.f32.mrf.mxu0  ;;  %v7693_v60 = vpop.f32.mrf.mxu1  ;;  %v5787_v20 = vld [vmem:[%s8596_s1 + $0x6c4] ss:$16 sps:$4 sm:$0xff]   ;;  %v8821_v10 = vld [vmem:[#allocation15_spill] sm:$0xff] }
 0x1ea   : > { %8795 = vst [vmem:[#allocation27_spill] sm:$0xff] %v7689_v27  ;;  %v3924_v50 = vadd.f32 %v3923_v57, %v3251_v51  ;;  %v7749_v5 = vpop.permute.xlu1 %1039  ;;  %v7759_v63 = vpop.permute.xlu0 %1194  ;;  %v5790_v57 = vld [vmem:[%s8596_s1 + $0x6cc] ss:$16 sps:$4 sm:$0xff]  }
 0x1eb   : > { %v7703_v15 = vpop.f32.mrf.mxu0  ;;  %3495 = vmatmul.mubr.bf16.gmra.mxu0 %v5767_v59  ;;  %4784 = vmatpush1.bf16.msra.mxu1 %v4592_v43  ;;  %v7705_v12 = vpop.f32.mrf.mxu1  ;;  %8803 = vst [vmem:[#allocation21_spill] sm:$0xff] %v7759_v63  ;;  %v7835_v63 = vadd.f32 %v7674_v19, %v8792_v56  ;;  %v8815_v56 = vld [vmem:[#allocation28_spill] sm:$0xff] }
 0x1ec   : > { %v4404_v55 = vmax.f32 %v3924_v50, 0.0  ;;  %4785 = vmatprep.subr.bf16.mxu1 %v4591_v11  ;;  %4168 = vmatmul.mubr.bf16.gmra.mxu1 %v5770_v62  ;;  %v5785_v11 = vld [vmem:[%s8596_s1 + $0x6c0] ss:$16 sps:$4 sm:$0xff]  }
 0x1ed   : > { %v7709_v39 = vpop.f32.mrf.mxu0  ;;  %v7711_v1 = vpop.f32.mrf.mxu1  ;;  %3504 = vmatprep.mubr.bf16.mxu0 %v5775_v13  ;;  %4177 = vmatprep.mubr.bf16.mxu1 %v5778_v47 }
 0x1ee   : > { %v7713_v52 = vpack.c.bf16 %v4404_v55, %v4402_v21  ;;  %v7778_v51 = vpop.permute.xlu1 %1199  ;;  %v7784_v13 = vpop.permute.xlu0 %1184  ;;  %v5788_v21 = vld [vmem:[%s8596_s1 + $0x6c8] ss:$16 sps:$4 sm:$0xff]   ;;  %v5793_v55 = vld [vmem:[%s8596_s1 + $0x6e4] ss:$16 sps:$4 sm:$0xff]  }
 0x1ef   : > { %v7715_v34 = vpop.f32.mrf.mxu0  ;;  %4786 = vmatpush1.bf16.msra.mxu1 %v7414_v28  ;;  %v7718_v54 = vpop.f32.mrf.mxu1  ;;  %v5781_v28 = vld [vmem:[%s8596_s1 + $0x6a4] ss:$16 sps:$4 sm:$0xff]   ;;  %8804 = vst [vmem:[#allocation20_spill] sm:$0xff] %v7778_v51  ;;  %8805 = vst [vmem:[#allocation22_spill] sm:$0xff] %v7784_v13 }
 0x1f0   : > { %8797 = vst [vmem:[#allocation45_spill] sm:$0xff] %v7713_v52  ;;  %4787 = vmatprep.subr.bf16.mxu1 %v8799_v45 }
 0x1f1   : > { %v7729_v14 = vpop.f32.mrf.mxu0  ;;  %v7731_v2 = vpop.f32.mrf.mxu1 }
 0x1f2   : > { %v3263_v41 = vadd.f32 %v7729_v14, %v8810_v6  ;;  %v7842_v14 = vadd.f32 %v7691_v29, %v8794_v36 }
 0x1f3   : > { %v7741_v3 = vpop.f32.mrf.mxu0  ;;  %3505 = vmatmul.mubr.bf16.gmra.mxu0 %v5773_v38  ;;  %4788 = vmatpush1.bf16.msra.mxu1 %v8800_v32  ;;  %v7744_v35 = vpop.f32.mrf.mxu1 }
 0x1f4   : > { %4789 = vmatprep.subr.bf16.mxu1 %v8801_v24  ;;  %4178 = vmatmul.mubr.bf16.gmra.mxu1 %v5776_v17  ;;  %v5796_v17 = vld [vmem:[%s8596_s1 + $0x6ec] ss:$16 sps:$4 sm:$0xff]   ;;  %v7810_v24 = vpop.permute.xlu0 %1344  ;;  %v7862_v36 = vadd.f32 %v7731_v2, %v3263_v41 }
 0x1f5   : > { %v3268_v33 = vpop.f32.mrf.mxu0  ;;  %v7747_v58 = vpop.f32.mrf.mxu1  ;;  %3514 = vmatprep.mubr.bf16.mxu0 %v5781_v28  ;;  %4187 = vmatprep.mubr.bf16.mxu1 %v5784_v40  ;;  %8807 = vst [vmem:[#allocation47_spill] sm:$0xff] %v7810_v24  ;;  %v8819_v2 = vld [vmem:[#allocation29_spill] sm:$0xff] }
 0x1f6   : > { %v7804_v28 = vpop.permute.xlu1 %1189  ;;  %v3269_v51 = vadd.f32 %v3268_v33, %v8811_v49 }
 0x1f7   : > { %v7751_v23 = vpop.f32.mrf.mxu0  ;;  %4790 = vmatpush1.bf16.msra.mxu1 %v8802_v25  ;;  %v7754_v46 = vpop.f32.mrf.mxu1  ;;  %8806 = vst [vmem:[#allocation26_spill] sm:$0xff] %v7804_v28  ;;  %v8812_v28 = vld [vmem:[#allocation25_spill] sm:$0xff] }
 0x1f8   : > { %v7828_v30 = vpop.permute.xlu0 %1174 }
 0x1f9   : > { %v7767_v7 = vpop.f32.mrf.mxu0  ;;  %v7769_v16 = vpop.f32.mrf.mxu1  ;;  %8809 = vst [vmem:[#allocation49_spill] sm:$0xff] %v7828_v30 }
 0x1fa   : > { %v7817_v4 = vpop.permute.xlu1 %1349 }
 0x1fb   : > { %v7774_v59 = vpop.f32.mrf.mxu0  ;;  %3515 = vmatmul.mubr.bf16.gmra.mxu0 %v5779_v61  ;;  %v7776_v42 = vpop.f32.mrf.mxu1  ;;  %8808 = vst [vmem:[#allocation48_spill] sm:$0xff] %v7817_v4 }
 0x1fc   : > { %4188 = vmatmul.mubr.bf16.gmra.mxu1 %v5782_v48  ;;  %3524 = vmatprep.mubr.bf16.mxu0 %v5787_v20  ;;  %v3277_v27 = vadd.f32 %v7774_v59, %v8821_v10 }
 0x1fd   : > { %v7780_v62 = vpop.f32.mrf.mxu0  ;;  %v7782_v43 = vpop.f32.mrf.mxu1  ;;  %4197 = vmatprep.mubr.bf16.mxu1 %v5790_v57  ;;  %v5791_v57 = vld [vmem:[%s8596_s1 + $0x6e0] ss:$16 sps:$4 sm:$0xff]  }
 0x1fe   : > { %v7838_v30 = vpop.permute.xlu1 %1179 }
 0x1ff   : > { %v7786_v47 = vpop.f32.mrf.mxu0  ;;  %v7788_v50 = vpop.f32.mrf.mxu1  ;;  %8813 = vst [vmem:[#allocation14_spill] sm:$0xff] %v7838_v30 }
 0x201   : > { %v3282_v38 = vpop.f32.mrf.mxu0  ;;  %v7799_v45 = vpop.f32.mrf.mxu1 }
 0x203   : > { %v7806_v40 = vpop.f32.mrf.mxu0  ;;  %3525 = vmatmul.mubr.bf16.gmra.mxu0 %v5785_v11  ;;  %v7808_v32 = vpop.f32.mrf.mxu1  ;;  %v5794_v11 = vld [vmem:[%s8596_s1 + $0x6e8] ss:$16 sps:$4 sm:$0xff]  }
 0x204   : > { %4198 = vmatmul.mubr.bf16.gmra.mxu1 %v5788_v21  ;;  %3534 = vmatprep.mubr.bf16.mxu0 %v5793_v55  ;;  %v5799_v21 = vld [vmem:[%s8596_s1 + $0x704] ss:$16 sps:$4 sm:$0xff]  }
 0x205   : > { %v3288_v25 = vpop.f32.mrf.mxu0  ;;  %v3961_v61 = vpop.f32.mrf.mxu1  ;;  %4207 = vmatprep.mubr.bf16.mxu1 %v5796_v17  ;;  %v5802_v17 = vld [vmem:[%s8596_s1 + $0x70c] ss:$16 sps:$4 sm:$0xff]  }
 0x207   : > { %v3290_v48 = vpop.f32.mrf.mxu0  ;;  %v7812_v20 = vpop.f32.mrf.mxu1 }
 0x209   : > { %v3292_v55 = vpop.f32.mrf.mxu0  ;;  %v3965_v24 = vpop.f32.mrf.mxu1 }
 0x20a   : > { %v3293_v13 = vadd.f32 %v3292_v55, %v8812_v28  ;;  %v7859_v55 = vadd.f32 %v7741_v3, %v8811_v49  ;;  %v7875_v49 = vadd.f32 %v7747_v58, %v3269_v51  ;;  %v3291_v58 = vadd.f32 %v3290_v48, %v8812_v28 }
 0x20b   : > { %v3296_v4 = vpop.f32.mrf.mxu0  ;;  %3535 = vmatmul.mubr.bf16.gmra.mxu0 %v5791_v57  ;;  %v3969_v8 = vpop.f32.mrf.mxu1  ;;  %v8814_v57 = vld [vmem:[#allocation16_spill] sm:$0xff] }
 0x20c   : > { %4208 = vmatmul.mubr.bf16.gmra.mxu1 %v5794_v11  ;;  %3544 = vmatprep.mubr.bf16.mxu0 %v5799_v21  ;;  %v7846_v33 = vadd.f32 %v7703_v15, %v8814_v57  ;;  %v7850_v11 = vadd.f32 %v7709_v39, %v8814_v57  ;;  %v7855_v21 = vadd.f32 %v7715_v34, %v8810_v6  ;;  %v5797_v39 = vld [vmem:[%s8596_s1 + $0x700] ss:$16 sps:$4 sm:$0xff]   ;;  %v8817_v57 = vld [vmem:[#allocation17_spill] sm:$0xff] }
 0x20d   : > { %v3298_v37 = vpop.f32.mrf.mxu0  ;;  %v3971_v9 = vpop.f32.mrf.mxu1  ;;  %4217 = vmatprep.mubr.bf16.mxu1 %v5802_v17  ;;  %v3297_v29 = vadd.f32 %v3296_v4, %v8815_v56  ;;  %v7872_v6 = vadd.f32 %v7751_v23, %v8817_v57  ;;  %v8818_v34 = vld [vmem:[#allocation32_spill] sm:$0xff]  ;;  %v5800_v4 = vld [vmem:[%s8596_s1 + $0x708] ss:$16 sps:$4 sm:$0xff]   ;;  %v3966_v51 = vadd.f32 %v3965_v24, %v3293_v13 }
 0x20e   : > { %v3299_v19 = vadd.f32 %v3298_v37, %v8815_v56  ;;  %v7868_v37 = vpop.permute.xlu0 %1334  ;;  %v3289_v41 = vadd.f32 %v3288_v25, %v8818_v34  ;;  %v5805_v56 = vld [vmem:[%s8596_s1 + $0x724] ss:$16 sps:$4 sm:$0xff]   ;;  %v8820_v23 = vld [vmem:[#allocation3_spill] sm:$0xff]  ;;  %v3287_v13 = vadd.f32 %v7806_v40, %v8818_v34 }
 0x20f   : > { %v3300_v15 = vpop.f32.mrf.mxu0  ;;  %v3973_v17 = vpop.f32.mrf.mxu1  ;;  %8816 = vst [vmem:[#allocation18_spill] sm:$0xff] %v7868_v37  ;;  %v3273_v37 = vadd.f32 %v7767_v7, %v8817_v57  ;;  %v3283_v30 = vadd.f32 %v3282_v38, %v8820_v23  ;;  %v3279_v7 = vadd.f32 %v7780_v62, %v8821_v10  ;;  %v3281_v38 = vadd.f32 %v7786_v47, %v8820_v23 }
 0x210   : > { %v3301_v3 = vadd.f32 %v3300_v15, %v8819_v2  ;;  %v5808_v15 = vld [vmem:[%s8596_s1 + $0x72c] ss:$16 sps:$4 sm:$0xff]   ;;  %v3972_v52 = vadd.f32 %v3971_v9, %v3299_v19  ;;  %v3970_v28 = vadd.f32 %v3969_v8, %v3297_v29  ;;  %v7901_v57 = vpop.permute.xlu1 %1339  ;;  %v3962_v59 = vadd.f32 %v3961_v61, %v3289_v41 }
 0x211   : > { %v3302_v0 = vpop.f32.mrf.mxu0  ;;  %v3975_v25 = vpop.f32.mrf.mxu1  ;;  %8822 = vst [vmem:[#allocation25_spill] sm:$0xff] %v7901_v57  ;;  %v3956_v10 = vadd.f32 %v7799_v45, %v3283_v30  ;;  %v3964_v62 = vadd.f32 %v7812_v20, %v3291_v58  ;;  %v4421_v47 = vmax.f32 %v3966_v51, 0.0  ;;  %v3952_v41 = vadd.f32 %v7782_v43, %v3279_v7  ;;  %v5811_v51 = vld [vmem:[%s8596_s1 + $0x744] ss:$16 sps:$4 sm:$0xff]   ;;  %v8852_v57 = vld [vmem:[#allocation11_spill] sm:$0xff] }
 0x212   : > { %v3303_v22 = vadd.f32 %v3302_v0, %v8819_v2  ;;  %v3974_v18 = vadd.f32 %v3973_v17, %v3301_v3  ;;  %v7906_v8 = vpop.permute.xlu0 %1164  ;;  %v4423_v29 = vmax.f32 %v3972_v52, 0.0  ;;  %v3960_v30 = vadd.f32 %v7808_v32, %v3287_v13  ;;  %v5803_v2 = vld [vmem:[%s8596_s1 + $0x720] ss:$16 sps:$4 sm:$0xff]  }
 0x213   : > { %v3306_v24 = vpop.f32.mrf.mxu0  ;;  %3545 = vmatmul.mubr.bf16.gmra.mxu0 %v5797_v39  ;;  %v3979_v48 = vpop.f32.mrf.mxu1  ;;  %8823 = vst [vmem:[#allocation16_spill] sm:$0xff] %v7906_v8  ;;  %v4422_v45 = vmax.f32 %v3970_v28, 0.0  ;;  %v4419_v3 = vmax.f32 %v3962_v59, 0.0  ;;  %v3954_v43 = vadd.f32 %v7788_v50, %v3281_v38  ;;  %v4420_v32 = vmax.f32 %v3964_v62, 0.0 }
 0x214   : > { %v3307_v9 = vadd.f32 %v3306_v24, %v7739_v31  ;;  %v3976_v0 = vadd.f32 %v3975_v25, %v3303_v22  ;;  %4218 = vmatmul.mubr.bf16.gmra.mxu1 %v5800_v4  ;;  %3554 = vmatprep.mubr.bf16.mxu0 %v5805_v56  ;;  %v4424_v19 = vmax.f32 %v3974_v18, 0.0  ;;  %v7910_v22 = vadd.f32 %v7769_v16, %v3273_v37  ;;  %v5806_v16 = vld [vmem:[%s8596_s1 + $0x728] ss:$16 sps:$4 sm:$0xff]   ;;  %v5814_v25 = vld [vmem:[%s8596_s1 + $0x74c] ss:$16 sps:$4 sm:$0xff]  }
 0x215   : > { %v3308_v17 = vpop.f32.mrf.mxu0  ;;  %v3981_v40 = vpop.f32.mrf.mxu1  ;;  %4227 = vmatprep.mubr.bf16.mxu1 %v5808_v15  ;;  %v4417_v37 = vmax.f32 %v3956_v10, 0.0  ;;  %v7932_v7 = vadd.f32 %v7754_v46, %v7872_v6  ;;  %v4615_v13 = vpack.c.bf16 %v4421_v47, %v4419_v3  ;;  %v3950_v24 = vadd.f32 %v7776_v42, %v3277_v27 }
 0x216   : > { %v4425_v39 = vmax.f32 %v3976_v0, 0.0  ;;  %v3309_v61 = vadd.f32 %v3308_v17, %v7739_v31  ;;  %v3980_v34 = vadd.f32 %v3979_v48, %v3307_v9  ;;  %v4616_v56 = vpack.c.bf16 %v4424_v19, %v4422_v45  ;;  %v7928_v15 = vpop.permute.xlu1 %1169  ;;  %v7937_v10 = vpop.permute.xlu0 %1324 }
 0x217   : > { %v3310_v20 = vpop.f32.mrf.mxu0  ;;  %v3983_v18 = vpop.f32.mrf.mxu1  ;;  %8824 = vst [vmem:[#allocation28_spill] sm:$0xff] %v7928_v15  ;;  %v4413_v28 = vmax.f32 %v7910_v22, 0.0  ;;  %v4415_v48 = vmax.f32 %v3952_v41, 0.0  ;;  %v4418_v59 = vmax.f32 %v3960_v30, 0.0  ;;  %8825 = vst [vmem:[#allocation17_spill] sm:$0xff] %v7937_v10  ;;  %v4416_v47 = vmax.f32 %v3954_v43, 0.0 }
 0x218   : > { %v3311_v52 = vadd.f32 %v3310_v20, %v7749_v5  ;;  %v3982_v4 = vadd.f32 %v3981_v40, %v3309_v61  ;;  %v4617_v31 = vpack.c.bf16 %v4425_v39, %v4423_v29  ;;  %v4426_v62 = vmax.f32 %v3980_v34, 0.0  ;;  %v5820_v43 = vld [vmem:[%s8596_s1 + $0x76c] ss:$16 sps:$4 sm:$0xff]  }
 0x219   : > { %v3312_v23 = vpop.f32.mrf.mxu0  ;;  %v3985_v58 = vpop.f32.mrf.mxu1  ;;  %v4614_v19 = vpack.c.bf16 %v4420_v32, %v4418_v59  ;;  %v4613_v42 = vpack.c.bf16 %v4417_v37, %v4415_v48  ;;  %v7945_v22 = vadd.f32 %v7693_v60, %v7842_v14  ;;  %v3932_v41 = vadd.f32 %v7711_v1, %v7850_v11  ;;  %v5812_v1 = vld [vmem:[%s8596_s1 + $0x748] ss:$16 sps:$4 sm:$0xff]  }
 0x21a   : > { %v3313_v50 = vadd.f32 %v3312_v23, %v7749_v5  ;;  %v3984_v38 = vadd.f32 %v3983_v18, %v3311_v52  ;;  %4791 = vmatprep.subr.bf16.mxu1 %v4617_v31  ;;  %v4427_v17 = vmax.f32 %v3982_v4, 0.0  ;;  %v3940_v30 = vadd.f32 %v7744_v35, %v7859_v55  ;;  %v7973_v37 = vpop.permute.xlu0 %1154 }
 0x21b   : > { %v3316_v9 = vpop.f32.mrf.mxu0  ;;  %3555 = vmatmul.mubr.bf16.gmra.mxu0 %v5803_v2  ;;  %4792 = vmatpush2.bf16.msra.mxu1 %v4616_v56  ;;  %v3989_v0 = vpop.f32.mrf.mxu1  ;;  %v4414_v45 = vmax.f32 %v3950_v24, 0.0  ;;  %v5809_v2 = vld [vmem:[%s8596_s1 + $0x740] ss:$16 sps:$4 sm:$0xff]   ;;  %v4411_v3 = vmax.f32 %v7875_v49, 0.0  ;;  %v3934_v11 = vadd.f32 %v7718_v54, %v7855_v21  ;;  %v4409_v55 = vmax.f32 %v7862_v36, 0.0  ;;  %8829 = vst [vmem:[#allocation15_spill] sm:$0xff] %v7973_v37 }
 0x21c   : > { %v4428_v46 = vmax.f32 %v3984_v38, 0.0  ;;  %v3317_v6 = vadd.f32 %v3316_v9, %v7678_v53  ;;  %v3986_v5 = vadd.f32 %v3985_v58, %v3313_v50  ;;  %4793 = vmatprep.subr.bf16.mxu1 %v4615_v13  ;;  %4228 = vmatmul.mubr.bf16.gmra.mxu1 %v5806_v16  ;;  %v4412_v52 = vmax.f32 %v7932_v7, 0.0  ;;  %v5817_v16 = vld [vmem:[%s8596_s1 + $0x764] ss:$16 sps:$4 sm:$0xff]  }
 0x21d   : > { %v3318_v40 = vpop.f32.mrf.mxu0  ;;  %v3991_v27 = vpop.f32.mrf.mxu1  ;;  %3564 = vmatprep.mubr.bf16.mxu0 %v5811_v51  ;;  %4237 = vmatprep.mubr.bf16.mxu1 %v5814_v25  ;;  %v4612_v4 = vpack.c.bf16 %v4416_v47, %v4414_v45  ;;  %v4611_v21 = vpack.c.bf16 %v4413_v28, %v4411_v3  ;;  %v3922_v36 = vadd.f32 %v7676_v26, %v7835_v63  ;;  %v4407_v23 = vmax.f32 %v3932_v41, 0.0  ;;  %v8830_v38 = vld [vmem:[#allocation4_spill] sm:$0xff] }
 0x21e   : > { %v7940_v29 = vpack.c.bf16 %v4428_v46, %v4426_v62  ;;  %v4429_v39 = vmax.f32 %v3986_v5, 0.0  ;;  %v3319_v61 = vadd.f32 %v3318_v40, %v7678_v53  ;;  %v3990_v34 = vadd.f32 %v3989_v0, %v3317_v6  ;;  %v7954_v53 = vpop.permute.xlu1 %1329  ;;  %v5815_v47 = vld [vmem:[%s8596_s1 + $0x760] ss:$16 sps:$4 sm:$0xff]   ;;  %v5823_v41 = vld [vmem:[%s8596_s1 + $0x784] ss:$16 sps:$4 sm:$0xff]  }
 0x21f   : > { %v3320_v20 = vpop.f32.mrf.mxu0  ;;  %4794 = vmatpush2.bf16.msra.mxu1 %v4614_v19  ;;  %v3993_v18 = vpop.f32.mrf.mxu1  ;;  %8827 = vst [vmem:[#allocation29_spill] sm:$0xff] %v7954_v53  ;;  %v3930_v56 = vadd.f32 %v7705_v12, %v7846_v33  ;;  %v4410_v58 = vmax.f32 %v3940_v30, 0.0  ;;  %v4408_v28 = vmax.f32 %v3934_v11, 0.0  ;;  %v4609_v33 = vpack.c.bf16 %v4409_v55, %v4407_v23  ;;  %v8834_v40 = vld [vmem:[#allocation6_spill] sm:$0xff]  ;;  %v5826_v30 = vld [vmem:[%s8596_s1 + $0x78c] ss:$16 sps:$4 sm:$0xff]  }
 0x220   : > { %8826 = vst [vmem:[#allocation32_spill] sm:$0xff] %v7940_v29  ;;  %v3321_v60 = vadd.f32 %v3320_v20, %v7701_v44  ;;  %v3992_v14 = vadd.f32 %v3991_v27, %v3319_v61  ;;  %4795 = vmatprep.subr.bf16.mxu1 %v4613_v42  ;;  %v7961_v35 = vpack.c.bf16 %v4429_v39, %v4427_v17  ;;  %v4430_v7 = vmax.f32 %v3990_v34, 0.0  ;;  %v7993_v19 = vpop.permute.xlu0 %1314  ;;  %v5818_v42 = vld [vmem:[%s8596_s1 + $0x768] ss:$16 sps:$4 sm:$0xff]  }
 0x221   : > { %v3322_v31 = vpop.f32.mrf.mxu0  ;;  %v3995_v49 = vpop.f32.mrf.mxu1  ;;  %v4610_v26 = vpack.c.bf16 %v4412_v52, %v4410_v58  ;;  %v4406_v46 = vmax.f32 %v3930_v56, 0.0  ;;  %8833 = vst [vmem:[#allocation51_spill] sm:$0xff] %v7993_v19  ;;  %v4403_v17 = vmax.f32 %v3922_v36, 0.0  ;;  %v5829_v36 = vld [vmem:[%s8596_s1 + $0x7a4] ss:$16 sps:$4 sm:$0xff]  }
 0x222   : > { %8828 = vst [vmem:[#allocation3_spill] sm:$0xff] %v7961_v35  ;;  %v3323_v32 = vadd.f32 %v3322_v31, %v7701_v44  ;;  %v3994_v54 = vadd.f32 %v3993_v18, %v3321_v60  ;;  %v4405_v44 = vmax.f32 %v7945_v22, 0.0  ;;  %v7986_v48 = vpop.permute.xlu1 %1159  ;;  %v4431_v59 = vmax.f32 %v3992_v14, 0.0  ;;  %v8839_v31 = vld [vmem:[#allocation45_spill] sm:$0xff] }
 0x223   : > { %v3326_v51 = vpop.f32.mrf.mxu0  ;;  %3565 = vmatmul.mubr.bf16.gmra.mxu0 %v5809_v2  ;;  %4796 = vmatpush2.bf16.msra.mxu1 %v4612_v4  ;;  %v3999_v25 = vpop.f32.mrf.mxu1  ;;  %8831 = vst [vmem:[#allocation4_spill] sm:$0xff] %v7986_v48  ;;  %v4608_v61 = vpack.c.bf16 %v4408_v28, %v4406_v46  ;;  %v5832_v56 = vld [vmem:[%s8596_s1 + $0x7ac] ss:$16 sps:$4 sm:$0xff]   ;;  %v5880_v46 = vmov 1983009808  }
 0x224   : > { %v4432_v50 = vmax.f32 %v3994_v54, 0.0  ;;  %v3327_v13 = vadd.f32 %v3326_v51, %v8830_v38  ;;  %v3996_v24 = vadd.f32 %v3995_v49, %v3323_v32  ;;  %4797 = vmatprep.subr.bf16.mxu1 %v4611_v21  ;;  %4238 = vmatmul.mubr.bf16.gmra.mxu1 %v5812_v1  ;;  %v4607_v20 = vpack.c.bf16 %v4405_v44, %v4403_v17  ;;  %v8021_v55 = vpop.permute.xlu0 %1144  ;;  %v5824_v32 = vld [vmem:[%s8596_s1 + $0x788] ss:$16 sps:$4 sm:$0xff]  }
 0x225   : > { %v7982_v63 = vpop.f32.mrf.mxu0  ;;  %v7984_v12 = vpop.f32.mrf.mxu1  ;;  %3574 = vmatprep.mubr.bf16.mxu0 %v5817_v16  ;;  %4247 = vmatprep.mubr.bf16.mxu1 %v5820_v43  ;;  %8837 = vst [vmem:[#allocation53_spill] sm:$0xff] %v8021_v55  ;;  %v5821_v16 = vld [vmem:[%s8596_s1 + $0x780] ss:$16 sps:$4 sm:$0xff]   ;;  %v8840_v43 = vld [vmem:[#allocation27_spill] sm:$0xff]  ;;  %v8842_v51 = vld [vmem:[#allocation13_spill] sm:$0xff] }
 0x226   : > { %v7988_v9 = vpack.c.bf16 %v4432_v50, %v4430_v7  ;;  %v4433_v0 = vmax.f32 %v3996_v24, 0.0  ;;  %v4000_v62 = vadd.f32 %v3999_v25, %v3327_v13  ;;  %v8015_v3 = vpop.permute.xlu1 %1319  ;;  %v8844_v50 = vld [vmem:[#allocation8_spill] sm:$0xff]  ;;  %v8845_v28 = vld [vmem:[#allocation5_spill] sm:$0xff] }
 0x227   : > { %v3330_v6 = vpop.f32.mrf.mxu0  ;;  %4798 = vmatpush2.bf16.msra.mxu1 %v4610_v26  ;;  %v4003_v5 = vpop.f32.mrf.mxu1  ;;  %8836 = vst [vmem:[#allocation52_spill] sm:$0xff] %v8015_v3  ;;  %v8854_v48 = vld [vmem:[#allocation41_spill] sm:$0xff] }
 0x228   : > { %8832 = vst [vmem:[#allocation50_spill] sm:$0xff] %v7988_v9  ;;  %v3331_v27 = vadd.f32 %v3330_v6, %v8834_v40  ;;  %4799 = vmatprep.subr.bf16.mxu1 %v4609_v33  ;;  %v7999_v39 = vpack.c.bf16 %v4433_v0, %v4431_v59  ;;  %v4434_v60 = vmax.f32 %v4000_v62, 0.0  ;;  %v8054_v7 = vpop.permute.xlu0 %1304  ;;  %v5827_v33 = vld [vmem:[%s8596_s1 + $0x7a0] ss:$16 sps:$4 sm:$0xff]   ;;  %v5830_v0 = vld [vmem:[%s8596_s1 + $0x7a8] ss:$16 sps:$4 sm:$0xff]   ;;  %v4694_v6 = vunpack.c.l.s4 %v5880_v46 }
 0x229   : > { %v8001_v34 = vpop.f32.mrf.mxu0  ;;  %v8003_v22 = vpop.f32.mrf.mxu1  ;;  %8843 = vst [vmem:[#allocation27_spill] sm:$0xff] %v8054_v7  ;;  %v5835_v62 = vld [vmem:[%s8596_s1 + $0x7c4] ss:$16 sps:$4 sm:$0xff]   ;;  %v8862_v9 = vld [vmem:[#allocation23_spill] sm:$0xff] }
 0x22a   : > { %8835 = vst [vmem:[#allocation6_spill] sm:$0xff] %v7999_v39  ;;  %v4004_v45 = vadd.f32 %v4003_v5, %v3331_v27  ;;  %v8047_v23 = vpop.permute.xlu1 %1149  ;;  %v4696_v5 = vlaneseq  ;;  %v5838_v27 = vld [vmem:[%s8596_s1 + $0x7cc] ss:$16 sps:$4 sm:$0xff]  }
 0x22b   : > { %v8011_v18 = vpop.f32.mrf.mxu0  ;;  %3575 = vmatmul.mubr.bf16.gmra.mxu0 %v5815_v47  ;;  %4800 = vmatpush2.bf16.msra.mxu1 %v4608_v61  ;;  %v8013_v2 = vpop.f32.mrf.mxu1  ;;  %8841 = vst [vmem:[#allocation45_spill] sm:$0xff] %v8047_v23  ;;  %v8162_v23 = vadd.f32 %v7982_v63, %v8830_v38  ;;  %v8858_v63 = vld [vmem:[#allocation24_spill] sm:$0xff] }
 0x22c   : > { %v4436_v14 = vmax.f32 %v4004_v45, 0.0  ;;  %4801 = vmatprep.subr.bf16.mxu1 %v4607_v20  ;;  %4248 = vmatmul.mubr.bf16.gmra.mxu1 %v5818_v42  ;;  %v8084_v42 = vpop.permute.xlu0 %1134  ;;  %v4697_v45 = vshrl.u32 %v4696_v5, 7 }
 0x22d   : > { %v8017_v1 = vpop.f32.mrf.mxu0  ;;  %v8019_v11 = vpop.f32.mrf.mxu1  ;;  %3584 = vmatprep.mubr.bf16.mxu0 %v5823_v41  ;;  %4257 = vmatprep.mubr.bf16.mxu1 %v5826_v30  ;;  %v4695_v30 = vunpack.c.0.s8 %v4694_v6 }
 0x22e   : > { %v8023_v52 = vpack.c.bf16 %v4436_v14, %v4434_v60  ;;  %v8069_v59 = vpop.permute.xlu1 %1309 }
 0x22f   : > { %v8025_v4 = vpop.f32.mrf.mxu0  ;;  %4802 = vmatpush2.bf16.msra.mxu1 %v8839_v31  ;;  %v8028_v49 = vpop.f32.mrf.mxu1  ;;  %8846 = vst [vmem:[#allocation13_spill] sm:$0xff] %v8069_v59  ;;  %v4682_v31 = vld [vmem:[%s8598_s3] sm:$0xff] }
 0x230   : > { %8838 = vst [vmem:[#allocation54_spill] sm:$0xff] %v8023_v52  ;;  %4803 = vmatprep.subr.bf16.mxu1 %v8840_v43  ;;  %v8179_v38 = vadd.f32 %v8025_v4, %v8852_v57 }
 0x231   : > { %v8037_v54 = vpop.f32.mrf.mxu0  ;;  %v8039_v21 = vpop.f32.mrf.mxu1 }
 0x232   : > { %v8094_v14 = vpop.permute.xlu1 %1139 }
 0x233   : > { %v8049_v58 = vpop.f32.mrf.mxu0  ;;  %3585 = vmatmul.mubr.bf16.gmra.mxu0 %v5821_v16  ;;  %4804 = vmatpush2.bf16.msra.mxu1 %v8842_v51  ;;  %v8052_v25 = vpop.f32.mrf.mxu1  ;;  %8847 = vst [vmem:[#allocation8_spill] sm:$0xff] %v8094_v14  ;;  %v5841_v51 = vld [vmem:[%s8596_s1 + $0x7e4] ss:$16 sps:$4 sm:$0xff]  }
 0x234   : > { %4805 = vmatprep.subr.bf16.mxu1 %v8844_v50  ;;  %4258 = vmatmul.mubr.bf16.gmra.mxu1 %v5824_v32  ;;  %v5833_v32 = vld [vmem:[%s8596_s1 + $0x7c0] ss:$16 sps:$4 sm:$0xff]   ;;  %v8114_v50 = vsub.s32 %v4695_v30, %v4697_v45 }
 0x235   : > { %v8057_v13 = vpop.f32.mrf.mxu0  ;;  %v8059_v24 = vpop.f32.mrf.mxu1  ;;  %3594 = vmatprep.mubr.bf16.mxu0 %v5829_v36  ;;  %4267 = vmatprep.mubr.bf16.mxu1 %v5832_v56  ;;  %v5836_v56 = vld [vmem:[%s8596_s1 + $0x7c8] ss:$16 sps:$4 sm:$0xff]  }
 0x236   : > { %v8106_v36 = vpop.permute.xlu0 %1294  ;;  %8849 = vst [vmem:[#allocation55_spill] sm:$0xff] %v8114_v50  ;;  %v8125_v5 = vpop.permute.xlu1 %1299  ;;  %v3349_v55 = vadd.f32 %v8057_v13, %v8854_v48  ;;  %v8857_v13 = vld [vmem:[#allocation10_spill] sm:$0xff] }
 0x237   : > { %v8061_v44 = vpop.f32.mrf.mxu0  ;;  %4806 = vmatpush2.bf16.msra.mxu1 %v8845_v28  ;;  %v8064_v26 = vpop.f32.mrf.mxu1  ;;  %8848 = vst [vmem:[#allocation5_spill] sm:$0xff] %v8106_v36  ;;  %8850 = vst [vmem:[#allocation56_spill] sm:$0xff] %v8125_v5  ;;  %v3343_v5 = vadd.f32 %v8037_v54, %v8852_v57  ;;  %v8166_v54 = vadd.f32 %v8001_v34, %v8834_v40  ;;  %v8184_v34 = vadd.f32 %v8049_v58, %v8854_v48 }
 0x238   : > { %v8195_v57 = vadd.f32 %v8059_v24, %v3349_v55  ;;  %v8864_v55 = vld [vmem:[#allocation2_spill] sm:$0xff] }
 0x239   : > { %v8077_v47 = vpop.f32.mrf.mxu0  ;;  %v8079_v17 = vpop.f32.mrf.mxu1 }
 0x23a   : > { %v8131_v59 = vpop.permute.xlu0 %1124  ;;  %v8148_v53 = vpop.permute.xlu1 %1129 }
 0x23b   : > { %v8086_v61 = vpop.f32.mrf.mxu0  ;;  %3595 = vmatmul.mubr.bf16.gmra.mxu0 %v5827_v33  ;;  %v8088_v41 = vpop.f32.mrf.mxu1 }
 0x23c   : > { %4268 = vmatmul.mubr.bf16.gmra.mxu1 %v5830_v0  ;;  %3604 = vmatprep.mubr.bf16.mxu0 %v5835_v62  ;;  %v5844_v0 = vld [vmem:[%s8596_s1 + $0x7ec] ss:$16 sps:$4 sm:$0xff]   ;;  %v4692_v62 = vcombine.high %v4682_v31, %v4682_v31  ;;  %v3357_v24 = vadd.f32 %v8086_v61, %v8864_v55 }
 0x23d   : > { %v8090_v20 = vpop.f32.mrf.mxu0  ;;  %v8092_v60 = vpop.f32.mrf.mxu1  ;;  %4277 = vmatprep.mubr.bf16.mxu1 %v5838_v27  ;;  %v4699_v27 = vrot.slane %v4682_v31, %v8114_v50 }
 0x23e   : > { %v8129_v7 = vrot.slane %v4692_v62, %v8114_v50  ;;  %v8146_v62 = vld [vmem:[%s8598_s3 + $0x8] sm:$0xff]  ;;  %v8152_v15 = vpop.permute.xlu0 %1284 }
 0x23f   : > { %v8099_v16 = vpop.f32.mrf.mxu0  ;;  %v8101_v43 = vpop.f32.mrf.mxu1  ;;  %v4707_v31 = vcombine.high %v4699_v27, %v4699_v27  ;;  %8851 = vst [vmem:[#allocation57_spill] sm:$0xff] %v8146_v62  ;;  %8853 = vst [vmem:[#allocation11_spill] sm:$0xff] %v8152_v15  ;;  %v8158_v37 = vrot.slane %v8146_v62, %v8114_v50 }
 0x240   : > { %v8192_v62 = vpop.permute.xlu1 %1289 }
 0x241   : > { %v3362_v28 = vpop.f32.mrf.mxu0  ;;  %v8116_v33 = vpop.f32.mrf.mxu1  ;;  %8855 = vst [vmem:[#allocation41_spill] sm:$0xff] %v8158_v37 }
 0x242   : > { %v1115_v52 = vpop.permute.xlu0 %1114 }
 0x243   : > { %v8121_v46 = vpop.f32.mrf.mxu0  ;;  %3605 = vmatmul.mubr.bf16.gmra.mxu0 %v5833_v32  ;;  %v8123_v6 = vpop.f32.mrf.mxu1  ;;  %v5839_v32 = vld [vmem:[%s8596_s1 + $0x7e0] ss:$16 sps:$4 sm:$0xff]  }
 0x244   : > { %4278 = vmatmul.mubr.bf16.gmra.mxu1 %v5836_v56  ;;  %3614 = vmatprep.mubr.bf16.mxu0 %v5841_v51  ;;  %v5842_v56 = vld [vmem:[%s8596_s1 + $0x7e8] ss:$16 sps:$4 sm:$0xff]  }
 0x245   : > { %v3368_v30 = vpop.f32.mrf.mxu0  ;;  %v4041_v45 = vpop.f32.mrf.mxu1  ;;  %4287 = vmatprep.mubr.bf16.mxu1 %v5844_v0  ;;  %v4708_v0 = vcombine.high %v8129_v7, %v8129_v7 }
 0x247   : > { %v3370_v19 = vpop.f32.mrf.mxu0  ;;  %v8133_v10 = vpop.f32.mrf.mxu1 }
 0x249   : > { %v3372_v51 = vpop.f32.mrf.mxu0  ;;  %v4045_v3 = vpop.f32.mrf.mxu1 }
 0x24b   : > { %v3376_v36 = vpop.f32.mrf.mxu0  ;;  %3615 = vmatmul.mubr.bf16.gmra.mxu0 %v5839_v32  ;;  %v4049_v8 = vpop.f32.mrf.mxu1  ;;  %v8856_v32 = vld [vmem:[#allocation37_spill] sm:$0xff] }
 0x24c   : > { %4288 = vmatmul.mubr.bf16.gmra.mxu1 %v5842_v56  ;;  %4766 = vmatprep.mubr.bf16.mxu0 %v4707_v31  ;;  %v3373_v29 = vadd.f32 %v3372_v51, %v8856_v32  ;;  %v8171_v56 = vadd.f32 %v8011_v18, %v8857_v13  ;;  %v8175_v31 = vadd.f32 %v8017_v1, %v8857_v13 }
 0x24d   : > { %v3378_v15 = vpop.f32.mrf.mxu0  ;;  %v4051_v35 = vpop.f32.mrf.mxu1  ;;  %4807 = vmatprep.mubr.bf16.mxu1 %v4708_v0  ;;  %v8187_v51 = vadd.f32 %v8039_v21, %v3343_v5  ;;  %v8859_v0 = vld [vmem:[#allocation42_spill] sm:$0xff]  ;;  %v3377_v50 = vadd.f32 %v3376_v36, %v8858_v63  ;;  %8860 = vst [vmem:[#allocation37_spill] sm:$0xff] %v8192_v62  ;;  %v4724_v21 = vcombine.high %v8158_v37, %v8158_v37 }
 0x24e   : > { %v3379_v40 = vadd.f32 %v3378_v15, %v8858_v63  ;;  %v3351_v18 = vadd.f32 %v8061_v44, %v8859_v0  ;;  %v8861_v15 = vld [vmem:[#allocation36_spill] sm:$0xff]  ;;  %v3353_v58 = vadd.f32 %v8077_v47, %v8859_v0  ;;  %v8863_v44 = vld [vmem:[#allocation31_spill] sm:$0xff]  ;;  %v3371_v36 = vadd.f32 %v3370_v19, %v8856_v32 }
 0x24f   : > { %v3380_v1 = vpop.f32.mrf.mxu0  ;;  %v4053_v13 = vpop.f32.mrf.mxu1  ;;  %v3369_v4 = vadd.f32 %v3368_v30, %v8861_v15  ;;  %v3363_v5 = vadd.f32 %v3362_v28, %v8863_v44  ;;  %v4046_v63 = vadd.f32 %v4045_v3, %v3373_v29  ;;  %v3359_v37 = vadd.f32 %v8090_v20, %v8864_v55 }
 0x250   : > { %v3381_v48 = vadd.f32 %v3380_v1, %v8862_v9  ;;  %v4052_v30 = vadd.f32 %v4051_v35, %v3379_v40  ;;  %v3361_v47 = vadd.f32 %v8099_v16, %v8863_v44  ;;  %v3367_v19 = vadd.f32 %v8121_v46, %v8861_v15 }
 0x251   : > { %v3382_v39 = vpop.f32.mrf.mxu0  ;;  %v4055_v62 = vpop.f32.mrf.mxu1  ;;  %v4050_v29 = vadd.f32 %v4049_v8, %v3377_v50  ;;  %v4042_v32 = vadd.f32 %v4041_v45, %v3369_v4  ;;  %v4036_v35 = vadd.f32 %v8116_v33, %v3363_v5  ;;  %v8218_v45 = vadd.f32 %v8079_v17, %v3353_v58 }
 0x252   : > { %v3383_v1 = vadd.f32 %v3382_v39, %v8862_v9  ;;  %v4054_v14 = vadd.f32 %v4053_v13, %v3381_v48  ;;  %v4044_v9 = vadd.f32 %v8133_v10, %v3371_v36  ;;  %v4453_v39 = vmax.f32 %v4046_v63, 0.0  ;;  %v1120_v13 = vpop.permute.xlu1 %1119 }
 0x253   : > { %v3386_v3 = vpop.f32.mrf.mxu0  ;;  %4767 = vmatmul.mubr.bf16.vlgmr.msra.gmra.mxu0 %v4699_v27  ;;  %v4059_v28 = vpop.f32.mrf.mxu1  ;;  %v4455_v46 = vmax.f32 %v4052_v30, 0.0  ;;  %v4454_v15 = vmax.f32 %v4050_v29, 0.0  ;;  %v4451_v10 = vmax.f32 %v4042_v32, 0.0  ;;  %v4034_v44 = vadd.f32 %v8101_v43, %v3361_v47 }
 0x254   : > { %v3387_v0 = vadd.f32 %v3386_v3, %v1115_v52  ;;  %v4056_v61 = vadd.f32 %v4055_v62, %v3383_v1  ;;  %4808 = vmatmul.mubr.bf16.vlgmr.msra.gmra.mxu1 %v8129_v7  ;;  %4848 = vmatprep.mubr.bf16.mxu0 %v4724_v21  ;;  %v4456_v20 = vmax.f32 %v4054_v14, 0.0  ;;  %v4032_v62 = vadd.f32 %v8092_v60, %v3359_v37 }
 0x255   : > { %v3388_v16 = vpop.f32.mrf.mxu0  ;;  %v4061_v40 = vpop.f32.mrf.mxu1  ;;  %v4040_v7 = vadd.f32 %v8123_v6, %v3367_v19  ;;  %v4449_v5 = vmax.f32 %v4036_v35, 0.0  ;;  %v4452_v36 = vmax.f32 %v4044_v9, 0.0  ;;  %v8224_v17 = vadd.f32 %v8064_v26, %v3351_v18 }
 0x256   : > { %v4457_v8 = vmax.f32 %v4056_v61, 0.0  ;;  %v3389_v50 = vadd.f32 %v3388_v16, %v1115_v52  ;;  %v4060_v27 = vadd.f32 %v4059_v28, %v3387_v0  ;;  %v4632_v52 = vpack.c.bf16 %v4456_v20, %v4454_v15 }
 0x257   : > { %v3390_v33 = vpop.f32.mrf.mxu0  ;;  %v4063_v4 = vpop.f32.mrf.mxu1  ;;  %v4631_v37 = vpack.c.bf16 %v4453_v39, %v4451_v10  ;;  %v4445_v58 = vmax.f32 %v8218_v45, 0.0  ;;  %v4030_v30 = vadd.f32 %v8088_v41, %v3357_v24  ;;  %v4447_v1 = vmax.f32 %v4032_v62, 0.0 }
 0x258   : > { %v4633_v48 = vpack.c.bf16 %v4457_v8, %v4455_v46  ;;  %v3391_v14 = vadd.f32 %v3390_v33, %v1120_v13  ;;  %v4062_v21 = vadd.f32 %v4061_v40, %v3389_v50  ;;  %v4450_v19 = vmax.f32 %v4040_v7, 0.0 }
 0x259   : > { %v3392_v63 = vpop.f32.mrf.mxu0  ;;  %v4065_v55 = vpop.f32.mrf.mxu1  ;;  %v4458_v47 = vmax.f32 %v4060_v27, 0.0  ;;  %v4448_v26 = vmax.f32 %v4034_v44, 0.0  ;;  %v4629_v9 = vpack.c.bf16 %v4449_v5, %v4447_v1  ;;  %v4006_v16 = vadd.f32 %v8003_v22, %v8166_v54 }
 0x25a   : > { %v3393_v60 = vadd.f32 %v3392_v63, %v1120_v13  ;;  %v4064_v6 = vadd.f32 %v4063_v4, %v3391_v14  ;;  %4816 = vmatprep.subr.bf16.mxu0 %v4633_v48  ;;  %v4630_v18 = vpack.c.bf16 %v4452_v36, %v4450_v19  ;;  %v4459_v0 = vmax.f32 %v4062_v21, 0.0 }
 0x25b   : > { %v3396_v29 = vpop.f32.mrf.mxu0  ;;  %4817 = vmatpush1.bf16.msra.mxu0 %v4632_v52  ;;  %v4069_v43 = vpop.f32.mrf.mxu1  ;;  %v4012_v40 = vadd.f32 %v8019_v11, %v8175_v31  ;;  %v4020_v13 = vadd.f32 %v8052_v25, %v8184_v34  ;;  %v4446_v46 = vmax.f32 %v4030_v30, 0.0  ;;  %v4443_v27 = vmax.f32 %v8195_v57, 0.0  ;;  %v8867_v30 = vld [vmem:[#allocation8_spill] sm:$0xff] }
 0x25c   : > { %v4460_v3 = vmax.f32 %v4064_v6, 0.0  ;;  %v3397_v28 = vadd.f32 %v3396_v29, %v8131_v59  ;;  %v4066_v32 = vadd.f32 %v4065_v55, %v3393_v60  ;;  %4818 = vmatprep.subr.bf16.mxu0 %v4631_v37  ;;  %v4014_v22 = vadd.f32 %v8028_v49, %v8179_v38 }
 0x25d   : > { %v3398_v61 = vpop.f32.mrf.mxu0  ;;  %v4071_v35 = vpop.f32.mrf.mxu1  ;;  %v4441_v11 = vmax.f32 %v8187_v51, 0.0  ;;  %v4444_v54 = vmax.f32 %v8224_v17, 0.0  ;;  %v4628_v25 = vpack.c.bf16 %v4448_v26, %v4446_v46  ;;  %v4627_v57 = vpack.c.bf16 %v4445_v58, %v4443_v27  ;;  %v8870_v46 = vld [vmem:[#allocation50_spill] sm:$0xff] }
 0x25e   : > { %v8229_v39 = vpack.c.bf16 %v4460_v3, %v4458_v47  ;;  %v4461_v41 = vmax.f32 %v4066_v32, 0.0  ;;  %v3399_v24 = vadd.f32 %v3398_v61, %v8131_v59  ;;  %v4070_v20 = vadd.f32 %v4069_v43, %v3397_v28 }
 0x25f   : > { %v3400_v8 = vpop.f32.mrf.mxu0  ;;  %4819 = vmatpush1.bf16.msra.mxu0 %v4630_v18  ;;  %v4073_v50 = vpop.f32.mrf.mxu1  ;;  %v4002_v33 = vadd.f32 %v7984_v12, %v8162_v23  ;;  %v4010_v4 = vadd.f32 %v8013_v2, %v8171_v56  ;;  %v4439_v10 = vmax.f32 %v4012_v40, 0.0  ;;  %v4442_v48 = vmax.f32 %v4020_v13, 0.0 }
 0x260   : > { %8865 = vst [vmem:[#allocation10_spill] sm:$0xff] %v8229_v39  ;;  %v8239_v45 = vpack.c.bf16 %v4461_v41, %v4459_v0  ;;  %v3401_v59 = vadd.f32 %v3400_v8, %v8148_v53  ;;  %v4072_v62 = vadd.f32 %v4071_v35, %v3399_v24  ;;  %4820 = vmatprep.subr.bf16.mxu0 %v4629_v9  ;;  %v4462_v51 = vmax.f32 %v4070_v20, 0.0  ;;  %v8868_v41 = vld [vmem:[#allocation54_spill] sm:$0xff] }
 0x261   : > { %v3402_v31 = vpop.f32.mrf.mxu0  ;;  %v4075_v34 = vpop.f32.mrf.mxu1  ;;  %v4440_v5 = vmax.f32 %v4014_v22, 0.0  ;;  %v4626_v36 = vpack.c.bf16 %v4444_v54, %v4442_v48  ;;  %v4625_v23 = vpack.c.bf16 %v4441_v11, %v4439_v10  ;;  %v4438_v17 = vmax.f32 %v4010_v4, 0.0  ;;  %v8869_v20 = vld [vmem:[#allocation6_spill] sm:$0xff]  ;;  %v8872_v22 = vld [vmem:[#allocation32_spill] sm:$0xff] }
 0x262   : > { %8866 = vst [vmem:[#allocation24_spill] sm:$0xff] %v8239_v45  ;;  %v3403_v7 = vadd.f32 %v3402_v31, %v8148_v53  ;;  %v4074_v15 = vadd.f32 %v4073_v50, %v3401_v59  ;;  %v4437_v53 = vmax.f32 %v4006_v16, 0.0  ;;  %v4463_v2 = vmax.f32 %v4072_v62, 0.0  ;;  %v8871_v50 = vld [vmem:[#allocation3_spill] sm:$0xff] }
 0x263   : > { %v3406_v49 = vpop.f32.mrf.mxu0  ;;  %4821 = vmatpush1.bf16.msra.mxu0 %v4628_v25  ;;  %v4079_v38 = vpop.f32.mrf.mxu1  ;;  %v4435_v6 = vmax.f32 %v4002_v33, 0.0  ;;  %v4624_v19 = vpack.c.bf16 %v4440_v5, %v4438_v17  ;;  %v8875_v17 = vld [vmem:[#allocation14_spill] sm:$0xff] }
 0x264   : > { %v4464_v14 = vmax.f32 %v4074_v15, 0.0  ;;  %v3407_v21 = vadd.f32 %v3406_v49, %v8084_v42  ;;  %v4076_v44 = vadd.f32 %v4075_v34, %v3403_v7  ;;  %4822 = vmatprep.subr.bf16.mxu0 %v4627_v57 }
 0x265   : > { %v8252_v52 = vpop.f32.mrf.mxu0  ;;  %v8254_v12 = vpop.f32.mrf.mxu1  ;;  %v4623_v3 = vpack.c.bf16 %v4437_v53, %v4435_v6 }
 0x266   : > { %v8256_v56 = vpack.c.bf16 %v4464_v14, %v4462_v51  ;;  %v4465_v63 = vmax.f32 %v4076_v44, 0.0  ;;  %v4080_v55 = vadd.f32 %v4079_v38, %v3407_v21 }
 0x267   : > { %v3410_v37 = vpop.f32.mrf.mxu0  ;;  %4823 = vmatpush1.bf16.msra.mxu0 %v4626_v36  ;;  %v4083_v60 = vpop.f32.mrf.mxu1 }
 0x268   : > { %v8258_v58 = vpack.c.bf16 %v4465_v63, %v4463_v2  ;;  %v3411_v1 = vadd.f32 %v3410_v37, %v8867_v30  ;;  %4824 = vmatprep.subr.bf16.mxu0 %v4625_v23  ;;  %v4466_v26 = vmax.f32 %v4080_v55, 0.0  ;;  %v8873_v23 = vld [vmem:[#allocation45_spill] sm:$0xff]  ;;  %v8874_v63 = vld [vmem:[#allocation15_spill] sm:$0xff] }
 0x269   : > { %v3412_v29 = vpop.f32.mrf.mxu0  ;;  %v8261_v43 = vpop.f32.mrf.mxu1 }
 0x26a   : > { %v4084_v47 = vadd.f32 %v4083_v60, %v3411_v1  ;;  %v8293_v1 = vadd.f32 %v8252_v52, %v8084_v42 }
 0x26b   : > { %v3416_v28 = vpop.f32.mrf.mxu0  ;;  %4825 = vmatpush1.bf16.msra.mxu0 %v4624_v19  ;;  %v8263_v32 = vpop.f32.mrf.mxu1  ;;  %v8296_v19 = vadd.f32 %v3412_v29, %v8867_v30  ;;  %v8878_v29 = vld [vmem:[#allocation4_spill] sm:$0xff] }
 0x26c   : > { %v4468_v18 = vmax.f32 %v4084_v47, 0.0  ;;  %4826 = vmatprep.subr.bf16.mxu0 %v4623_v3  ;;  %v8876_v47 = vld [vmem:[#allocation53_spill] sm:$0xff] }
 0x26d   : > { %v3418_v0 = vpop.f32.mrf.mxu0  ;;  %v8265_v61 = vpop.f32.mrf.mxu1  ;;  %v8299_v3 = vadd.f32 %v3416_v28, %v8876_v47 }
 0x26e   : > { %v8267_v35 = vpack.c.bf16 %v4468_v18, %v4466_v26  ;;  %v8877_v26 = vld [vmem:[#allocation22_spill] sm:$0xff] }
 0x26f   : > { %v3420_v9 = vpop.f32.mrf.mxu0  ;;  %4827 = vmatpush1.bf16.msra.mxu0 %v8868_v41  ;;  %v8270_v24 = vpop.f32.mrf.mxu1  ;;  %v8303_v41 = vadd.f32 %v3418_v0, %v8876_v47 }
 0x270   : > { %4828 = vmatprep.subr.bf16.mxu0 %v8869_v20  ;;  %v8306_v20 = vadd.f32 %v3420_v9, %v8873_v23 }
 0x271   : > { %v3422_v16 = vpop.f32.mrf.mxu0  ;;  %v4095_v40 = vpop.f32.mrf.mxu1 }
 0x272   : > { %v3423_v2 = vadd.f32 %v3422_v16, %v8873_v23 }
 0x273   : > { %v3426_v13 = vpop.f32.mrf.mxu0  ;;  %4829 = vmatpush1.bf16.msra.mxu0 %v8870_v46  ;;  %v8274_v8 = vpop.f32.mrf.mxu1 }
 0x274   : > { %4830 = vmatprep.subr.bf16.mxu0 %v8871_v50  ;;  %v8309_v16 = vadd.f32 %v3426_v13, %v8874_v63  ;;  %v8312_v30 = vadd.f32 %v4095_v40, %v3423_v2  ;;  %v8879_v50 = vld [vmem:[#allocation49_spill] sm:$0xff] }
 0x275   : > { %v3428_v27 = vpop.f32.mrf.mxu0  ;;  %v4101_v59 = vpop.f32.mrf.mxu1 }
 0x276   : > { %v3429_v55 = vadd.f32 %v3428_v27, %v8874_v63 }
 0x277   : > { %v3430_v62 = vpop.f32.mrf.mxu0  ;;  %4831 = vmatpush1.bf16.msra.mxu0 %v8872_v22  ;;  %v8278_v11 = vpop.f32.mrf.mxu1  ;;  %v8880_v22 = vld [vmem:[#allocation26_spill] sm:$0xff] }
 0x278   : > { %v3431_v28 = vadd.f32 %v3430_v62, %v8878_v29  ;;  %v8317_v0 = vadd.f32 %v4101_v59, %v3429_v55  ;;  %v8882_v62 = vld [vmem:[#allocation16_spill] sm:$0xff] }
 0x279   : > { %v3432_v54 = vpop.f32.mrf.mxu0  ;;  %v8280_v25 = vpop.f32.mrf.mxu1 }
 0x27b   : > { %v3436_v31 = vpop.f32.mrf.mxu0  ;;  %v8282_v34 = vpop.f32.mrf.mxu1 }
 0x27c   : > { %v3437_v39 = vadd.f32 %v3436_v31, %v8882_v62 }
 0x27d   : > { %v3438_v7 = vpop.f32.mrf.mxu0  ;;  %v8284_v15 = vpop.f32.mrf.mxu1 }
 0x27f   : > { %v3440_v57 = vpop.f32.mrf.mxu0  ;;  %v8286_v33 = vpop.f32.mrf.mxu1 }
 0x281   : > { %v3442_v4 = vpop.f32.mrf.mxu0  ;;  %v4115_v10 = vpop.f32.mrf.mxu1 }
 0x283   : > { %v3446_v48 = vpop.f32.mrf.mxu0  ;;  %v4119_v49 = vpop.f32.mrf.mxu1 }
 0x284   : > { %v3447_v59 = vadd.f32 %v3446_v48, %v8879_v50 }
 0x285   : > { %v3448_v38 = vpop.f32.mrf.mxu0  ;;  %v4121_v51 = vpop.f32.mrf.mxu1 }
 0x286   : > { %v3449_v27 = vadd.f32 %v3448_v38, %v8879_v50  ;;  %v3439_v38 = vadd.f32 %v3438_v7, %v8882_v62  ;;  %v4110_v62 = vadd.f32 %v8282_v34, %v3437_v39 }
 0x287   : > { %v3450_v14 = vpop.f32.mrf.mxu0  ;;  %v4123_v21 = vpop.f32.mrf.mxu1 }
 0x288   : > { %v3451_v23 = vadd.f32 %v3450_v14, %v8875_v17 }
 0x289   : > { %v3452_v44 = vpop.f32.mrf.mxu0  ;;  %v4125_v53 = vpop.f32.mrf.mxu1 }
 0x28a   : > { %v3453_v37 = vadd.f32 %v3452_v44, %v8875_v17  ;;  %v8883_v17 = vld [vmem:[#allocation21_spill] sm:$0xff] }
 0x28b   : > { %v3456_v5 = vpop.f32.mrf.mxu0  ;;  %v4129_v36 = vpop.f32.mrf.mxu1 }
 0x28c   : > { %v3457_v42 = vadd.f32 %v3456_v5, %v8877_v26  ;;  %v4126_v13 = vadd.f32 %v4125_v53, %v3453_v37  ;;  %v3433_v5 = vadd.f32 %v3432_v54, %v8878_v29  ;;  %v4122_v53 = vadd.f32 %v4121_v51, %v3449_v27 }
 0x28d   : > { %v3458_v60 = vpop.f32.mrf.mxu0  ;;  %v4131_v6 = vpop.f32.mrf.mxu1 }
 0x28e   : > { %v3459_v18 = vadd.f32 %v3458_v60, %v8877_v26  ;;  %v8881_v60 = vld [vmem:[#allocation28_spill] sm:$0xff]  ;;  %v4130_v55 = vadd.f32 %v4129_v36, %v3457_v42  ;;  %v4106_v36 = vadd.f32 %v8280_v25, %v3433_v5  ;;  %v4112_v42 = vadd.f32 %v8284_v15, %v3439_v38 }
 0x28f   : > { %v3460_v52 = vpop.f32.mrf.mxu0  ;;  %v4133_v46 = vpop.f32.mrf.mxu1  ;;  %v3443_v9 = vadd.f32 %v3442_v4, %v8881_v60  ;;  %v3441_v14 = vadd.f32 %v3440_v57, %v8881_v60  ;;  %v4120_v57 = vadd.f32 %v4119_v49, %v3447_v59  ;;  %v4483_v60 = vmax.f32 %v4122_v53, 0.0 }
 0x290   : > { %v3461_v44 = vadd.f32 %v3460_v52, %v8880_v22  ;;  %v4132_v26 = vadd.f32 %v4131_v6, %v3459_v18  ;;  %v4124_v6 = vadd.f32 %v4123_v21, %v3451_v23  ;;  %v4485_v18 = vmax.f32 %v4126_v13, 0.0  ;;  %v8884_v21 = vld [vmem:[#allocation20_spill] sm:$0xff] }
 0x291   : > { %v3462_v63 = vpop.f32.mrf.mxu0  ;;  %v4135_v47 = vpop.f32.mrf.mxu1  ;;  %v4116_v54 = vadd.f32 %v4115_v10, %v3443_v9  ;;  %v4486_v51 = vmax.f32 %v4130_v55, 0.0  ;;  %v4114_v13 = vadd.f32 %v8286_v33, %v3441_v14  ;;  %v8334_v25 = vadd.f32 %v8278_v11, %v3431_v28 }
 0x292   : > { %v3463_v40 = vadd.f32 %v3462_v63, %v8880_v22  ;;  %v4134_v2 = vadd.f32 %v4133_v46, %v3461_v44  ;;  %v4487_v31 = vmax.f32 %v4132_v26, 0.0  ;;  %v4647_v15 = vpack.c.bf16 %v4485_v18, %v4483_v60 }
 0x293   : > { %v3466_v52 = vpop.f32.mrf.mxu0  ;;  %v4139_v4 = vpop.f32.mrf.mxu1  ;;  %v4481_v63 = vmax.f32 %v4116_v54, 0.0  ;;  %v4479_v38 = vmax.f32 %v4112_v42, 0.0  ;;  %v4482_v59 = vmax.f32 %v4120_v57, 0.0  ;;  %v4480_v28 = vmax.f32 %v4114_v13, 0.0  ;;  %v8888_v57 = vld [vmem:[#allocation46_spill] sm:$0xff] }
 0x294   : > { %v3467_v37 = vadd.f32 %v3466_v52, %v8883_v17  ;;  %v4136_v45 = vadd.f32 %v4135_v47, %v3463_v40  ;;  %v4488_v29 = vmax.f32 %v4134_v2, 0.0  ;;  %v4477_v2 = vmax.f32 %v4106_v36, 0.0 }
 0x295   : > { %v3468_v46 = vpop.f32.mrf.mxu0  ;;  %v4141_v22 = vpop.f32.mrf.mxu1  ;;  %v4475_v36 = vmax.f32 %v8317_v0, 0.0 }
 0x296   : > { %v4489_v44 = vmax.f32 %v4136_v45, 0.0  ;;  %v3469_v7 = vadd.f32 %v3468_v46, %v8883_v17  ;;  %v4140_v48 = vadd.f32 %v4139_v4, %v3467_v37  ;;  %v4484_v45 = vmax.f32 %v4124_v6, 0.0  ;;  %v8885_v4 = vld [vmem:[#allocation44_spill] sm:$0xff] }
 0x297   : > { %v3470_v50 = vpop.f32.mrf.mxu0  ;;  %v4143_v27 = vpop.f32.mrf.mxu1  ;;  %v4648_v47 = vpack.c.bf16 %v4488_v29, %v4486_v51  ;;  %v4645_v17 = vpack.c.bf16 %v4481_v63, %v4479_v38  ;;  %v8889_v63 = vld [vmem:[#allocation9_spill] sm:$0xff] }
 0x298   : > { %v4649_v10 = vpack.c.bf16 %v4489_v44, %v4487_v31  ;;  %v3471_v9 = vadd.f32 %v3470_v50, %v8884_v21  ;;  %v4142_v23 = vadd.f32 %v4141_v22, %v3469_v7  ;;  %v4490_v33 = vmax.f32 %v4140_v48, 0.0 }
 0x299   : > { %v3472_v26 = vpop.f32.mrf.mxu0  ;;  %v4145_v40 = vpop.f32.mrf.mxu1  ;;  %v4646_v37 = vpack.c.bf16 %v4484_v45, %v4482_v59  ;;  %v4086_v22 = vadd.f32 %v8261_v43, %v8296_v19  ;;  %v4092_v31 = vadd.f32 %v8265_v61, %v8303_v41  ;;  %v4100_v44 = vadd.f32 %v8274_v8, %v8309_v16 }
 0x29a   : > { %v3473_v49 = vadd.f32 %v3472_v26, %v8884_v21  ;;  %v4144_v5 = vadd.f32 %v4143_v27, %v3471_v9  ;;  %4832 = vmatprep.subr.bf16.mxu0 %v4649_v10  ;;  %v4491_v54 = vmax.f32 %v4142_v23, 0.0  ;;  %v4478_v7 = vmax.f32 %v4110_v62, 0.0 }
 0x29b   : > { %v3476_v55 = vpop.f32.mrf.mxu0  ;;  %4833 = vmatpush2.bf16.msra.mxu0 %v4648_v47  ;;  %v4094_v43 = vadd.f32 %v8270_v24, %v8306_v20  ;;  %v4473_v61 = vmax.f32 %v8312_v30, 0.0  ;;  %v4476_v19 = vmax.f32 %v8334_v25, 0.0  ;;  %v4643_v16 = vpack.c.bf16 %v4477_v2, %v4475_v36  ;;  %v8891_v36 = vld [vmem:[#allocation24_spill] sm:$0xff] }
 0x29c   : > { %v4492_v52 = vmax.f32 %v4144_v5, 0.0  ;;  %v3477_v14 = vadd.f32 %v3476_v55, %v8885_v4  ;;  %v4146_v53 = vadd.f32 %v4145_v40, %v3473_v49  ;;  %4834 = vmatprep.subr.bf16.mxu0 %v4647_v15  ;;  %v4149_v11 = vpop.f32.mrf.mxu1  ;;  %v4644_v8 = vpack.c.bf16 %v4480_v28, %v4478_v7 }
 0x29d   : > { %v3478_v6 = vpop.f32.mrf.mxu0  ;;  %v4082_v21 = vadd.f32 %v8254_v12, %v8293_v1  ;;  %v4090_v9 = vadd.f32 %v8263_v32, %v8299_v3  ;;  %v4471_v23 = vmax.f32 %v4092_v31, 0.0  ;;  %v4474_v13 = vmax.f32 %v4100_v44, 0.0 }
 0x29e   : > { %v8339_v18 = vpack.c.bf16 %v4492_v52, %v4490_v33  ;;  %v4493_v29 = vmax.f32 %v4146_v53, 0.0  ;;  %v3479_v39 = vadd.f32 %v3478_v6, %v8885_v4  ;;  %v4150_v34 = vadd.f32 %v4149_v11, %v3477_v14  ;;  %v4151_v46 = vpop.f32.mrf.mxu1  ;;  %v8890_v33 = vld [vmem:[#allocation33_spill] sm:$0xff] }
 0x29f   : > { %v3480_v48 = vpop.f32.mrf.mxu0  ;;  %4835 = vmatpush2.bf16.msra.mxu0 %v4646_v37  ;;  %v4469_v40 = vmax.f32 %v4086_v22, 0.0  ;;  %v4472_v25 = vmax.f32 %v4094_v43, 0.0  ;;  %v4641_v15 = vpack.c.bf16 %v4473_v61, %v4471_v23  ;;  %v4642_v49 = vpack.c.bf16 %v4476_v19, %v4474_v13 }
 0x2a0   : > { %8886 = vst [vmem:[#allocation42_spill] sm:$0xff] %v8339_v18  ;;  %v8349_v42 = vpack.c.bf16 %v4493_v29, %v4491_v54  ;;  %v3481_v51 = vadd.f32 %v3480_v48, %v8888_v57  ;;  %v4152_v50 = vadd.f32 %v4151_v46, %v3479_v39  ;;  %4836 = vmatprep.subr.bf16.mxu0 %v4645_v17  ;;  %v4153_v27 = vpop.f32.mrf.mxu1  ;;  %v4494_v20 = vmax.f32 %v4150_v34, 0.0 }
 0x2a1   : > { %v3482_v41 = vpop.f32.mrf.mxu0  ;;  %v4470_v62 = vmax.f32 %v4090_v9, 0.0  ;;  %v4467_v59 = vmax.f32 %v4082_v21, 0.0 }
 0x2a2   : > { %8887 = vst [vmem:[#allocation36_spill] sm:$0xff] %v8349_v42  ;;  %v3483_v60 = vadd.f32 %v3482_v41, %v8888_v57  ;;  %v4154_v0 = vadd.f32 %v4153_v27, %v3481_v51  ;;  %v4155_v10 = vpop.f32.mrf.mxu1  ;;  %v4495_v12 = vmax.f32 %v4152_v50, 0.0  ;;  %v8892_v51 = vld [vmem:[#allocation57_spill] sm:$0xff] }
 0x2a3   : > { %v3486_v24 = vpop.f32.mrf.mxu0  ;;  %4837 = vmatpush2.bf16.msra.mxu0 %v4644_v8  ;;  %v4640_v14 = vpack.c.bf16 %v4472_v25, %v4470_v62  ;;  %v4639_v11 = vpack.c.bf16 %v4469_v40, %v4467_v59  ;;  %v4709_v50 = vcombine.high %v8892_v51, %v8892_v51 }
 0x2a4   : > { %v4496_v30 = vmax.f32 %v4154_v0, 0.0  ;;  %v3487_v45 = vadd.f32 %v3486_v24, %v8889_v63  ;;  %v4156_v47 = vadd.f32 %v4155_v10, %v3483_v60  ;;  %4838 = vmatprep.subr.bf16.mxu0 %v4643_v16  ;;  %v4159_v26 = vpop.f32.mrf.mxu1  ;;  %v8896_v16 = vld [vmem:[#allocation41_spill] sm:$0xff] }
 0x2a5   : > { %v8362_v5 = vpop.f32.mrf.mxu0 }
 0x2a6   : > { %v8364_v1 = vpack.c.bf16 %v4496_v30, %v4494_v20  ;;  %v4497_v32 = vmax.f32 %v4156_v47, 0.0  ;;  %v4160_v3 = vadd.f32 %v4159_v26, %v3487_v45  ;;  %v8366_v2 = vpop.f32.mrf.mxu1 }
 0x2a7   : > { %v3490_v38 = vpop.f32.mrf.mxu0  ;;  %4839 = vmatpush2.bf16.msra.mxu0 %v4642_v49 }
 0x2a8   : > { %v8368_v55 = vpack.c.bf16 %v4497_v32, %v4495_v12  ;;  %v3491_v52 = vadd.f32 %v3490_v38, %v8890_v33  ;;  %4840 = vmatprep.subr.bf16.mxu0 %v4641_v15  ;;  %v4163_v4 = vpop.f32.mrf.mxu1  ;;  %v4498_v54 = vmax.f32 %v4160_v3, 0.0  ;;  %v8897_v32 = vld [vmem:[#allocation12_spill] sm:$0xff]  ;;  %v8898_v38 = vld [vmem:[#allocation43_spill] sm:$0xff] }
 0x2a9   : > { %v3492_v53 = vpop.f32.mrf.mxu0 }
 0x2aa   : > { %v4164_v28 = vadd.f32 %v4163_v4, %v3491_v52  ;;  %v8371_v17 = vpop.f32.mrf.mxu1  ;;  %v8899_v52 = vld [vmem:[#allocation39_spill] sm:$0xff] }
 0x2ab   : > { %v3496_v37 = vpop.f32.mrf.mxu0  ;;  %4841 = vmatpush2.bf16.msra.mxu0 %v4640_v14 }
 0x2ac   : > { %v4500_v6 = vmax.f32 %v4164_v28, 0.0  ;;  %4842 = vmatprep.subr.bf16.mxu0 %v4639_v11  ;;  %v8373_v29 = vpop.f32.mrf.mxu1  ;;  %v8411_v11 = vadd.f32 %v8362_v5, %v8889_v63  ;;  %v8414_v28 = vadd.f32 %v3492_v53, %v8890_v33  ;;  %v8902_v53 = vld [vmem:[#allocation19_spill] sm:$0xff] }
 0x2ad   : > { %v3498_v39 = vpop.f32.mrf.mxu0 }
 0x2ae   : > { %v8375_v34 = vpack.c.bf16 %v4500_v6, %v4498_v54  ;;  %v8377_v46 = vpop.f32.mrf.mxu1  ;;  %v8900_v54 = vld [vmem:[#allocation7_spill] sm:$0xff] }
 0x2af   : > { %v3500_v22 = vpop.f32.mrf.mxu0  ;;  %4843 = vmatpush2.bf16.msra.mxu0 %v8267_v35  ;;  %v8893_v35 = vld [vmem:[#allocation10_spill] sm:$0xff]  ;;  %v8417_v6 = vadd.f32 %v3496_v37, %v8900_v54 }
 0x2b0   : > { %4844 = vmatprep.subr.bf16.mxu0 %v8258_v58  ;;  %v8381_v31 = vpop.f32.mrf.mxu1  ;;  %v8894_v58 = vld [vmem:[#allocation55_spill] sm:$0xff] }
 0x2b1   : > { %v3502_v44 = vpop.f32.mrf.mxu0  ;;  %v8391_v19 = vrot.slane %v4709_v50, %v8894_v58  ;;  %v8903_v58 = vld [vmem:[#allocation38_spill] sm:$0xff] }
 0x2b2   : > { %v4175_v7 = vpop.f32.mrf.mxu1  ;;  %v3503_v3 = vadd.f32 %v3502_v44, %v8897_v32  ;;  %v8421_v44 = vadd.f32 %v3498_v39, %v8900_v54  ;;  %v8905_v54 = vld [vmem:[#allocation40_spill] sm:$0xff] }
 0x2b3   : > { %v3506_v48 = vpop.f32.mrf.mxu0  ;;  %4845 = vmatpush2.bf16.msra.mxu0 %v8256_v56  ;;  %8895 = vst [vmem:[#allocation23_spill] sm:$0xff] %v8391_v19  ;;  %v4725_v56 = vcombine.high %v8391_v19, %v8391_v19  ;;  %v1275_v19 = vpop.permute.xlu0 %1274 }
 0x2b4   : > { %4846 = vmatprep.subr.bf16.mxu0 %v8891_v36  ;;  %v8385_v57 = vpop.f32.mrf.mxu1  ;;  %v8901_v36 = vld [vmem:[#allocation34_spill] sm:$0xff]  ;;  %v8430_v33 = vadd.f32 %v4175_v7, %v3503_v3 }
 0x2b5   : > { %v3508_v27 = vpop.f32.mrf.mxu0  ;;  %4889 = vmatprep.mubr.bf16.mxu1 %v4725_v56 }
 0x2b6   : > { %v4181_v43 = vpop.f32.mrf.mxu1  ;;  %v3509_v59 = vadd.f32 %v3508_v27, %v8898_v38  ;;  %v8424_v27 = vadd.f32 %v3500_v22, %v8897_v32 }
 0x2b7   : > { %v3510_v61 = vpop.f32.mrf.mxu0  ;;  %4847 = vmatpush2.bf16.msra.mxu0 %v8893_v35  ;;  %v8427_v35 = vadd.f32 %v3506_v48, %v8898_v38 }
 0x2b8   : > { %v8393_v8 = vpop.f32.mrf.mxu1  ;;  %v3511_v37 = vadd.f32 %v3510_v61, %v8902_v53  ;;  %v8435_v39 = vadd.f32 %v4181_v43, %v3509_v59 }
 0x2b9   : > { %v3512_v41 = vpop.f32.mrf.mxu0 }
 0x2ba   : > { %4849 = vmatmul.mubr.bf16.vlgmr.msra.gmra.mxu0 %v8896_v16  ;;  %v8398_v60 = vpop.f32.mrf.mxu1  ;;  %v8904_v16 = vld [vmem:[#allocation35_spill] sm:$0xff] }
 0x2bb   : > { %v3516_v0 = vpop.f32.mrf.mxu0 }
 0x2bc   : > { %v8400_v10 = vpop.f32.mrf.mxu1 }
 0x2bd   : > { %v3518_v21 = vpop.f32.mrf.mxu0 }
 0x2be   : > { %v8402_v9 = vpop.f32.mrf.mxu1 }
 0x2bf   : > { %v3520_v23 = vpop.f32.mrf.mxu0 }
 0x2c0   : > { %v8404_v13 = vpop.f32.mrf.mxu1 }
 0x2c1   : > { %v3522_v24 = vpop.f32.mrf.mxu0 }
 0x2c2   : > { %v4195_v20 = vpop.f32.mrf.mxu1  ;;  %v3523_v22 = vadd.f32 %v3522_v24, %v8905_v54 }
 0x2c3   : > { %v3526_v30 = vpop.f32.mrf.mxu0 }
 0x2c4   : > { %v4199_v45 = vpop.f32.mrf.mxu1  ;;  %v3527_v43 = vadd.f32 %v3526_v30, %v8903_v58 }
 0x2c5   : > { %v3528_v47 = vpop.f32.mrf.mxu0 }
 0x2c6   : > { %v4201_v26 = vpop.f32.mrf.mxu1  ;;  %v3529_v56 = vadd.f32 %v3528_v47, %v8903_v58  ;;  %v8906_v47 = vld [vmem:[#allocation30_spill] sm:$0xff] }
 0x2c7   : > { %v3530_v40 = vpop.f32.mrf.mxu0  ;;  %v3517_v18 = vadd.f32 %v3516_v0, %v8906_v47 }
 0x2c8   : > { %v4203_v25 = vpop.f32.mrf.mxu1  ;;  %v3531_v32 = vadd.f32 %v3530_v40, %v8899_v52  ;;  %v3521_v40 = vadd.f32 %v3520_v23, %v8905_v54  ;;  %v4200_v23 = vadd.f32 %v4199_v45, %v3527_v43 }
 0x2c9   : > { %v3532_v15 = vpop.f32.mrf.mxu0 }
 0x2ca   : > { %v4205_v49 = vpop.f32.mrf.mxu1  ;;  %v3533_v4 = vadd.f32 %v3532_v15, %v8899_v52  ;;  %v4514_v43 = vmax.f32 %v4200_v23, 0.0 }
 0x2cb   : > { %v3536_v12 = vpop.f32.mrf.mxu0 }
 0x2cc   : > { %v4209_v62 = vpop.f32.mrf.mxu1  ;;  %v3537_v63 = vadd.f32 %v3536_v12, %v8901_v36  ;;  %v4206_v48 = vadd.f32 %v4205_v49, %v3533_v4  ;;  %v3513_v12 = vadd.f32 %v3512_v41, %v8902_v53  ;;  %v4202_v49 = vadd.f32 %v4201_v26, %v3529_v56 }
 0x2cd   : > { %v3538_v14 = vpop.f32.mrf.mxu0 }
 0x2ce   : > { %v3539_v51 = vadd.f32 %v3538_v14, %v8901_v36  ;;  %v4211_v50 = vpop.f32.mrf.mxu1  ;;  %v4210_v59 = vadd.f32 %v4209_v62, %v3537_v63  ;;  %v4517_v53 = vmax.f32 %v4206_v48, 0.0  ;;  %v4186_v30 = vadd.f32 %v8398_v60, %v3513_v12 }
 0x2cf   : > { %v3540_v5 = vpop.f32.mrf.mxu0  ;;  %v4515_v58 = vmax.f32 %v4202_v49, 0.0 }
 0x2d0   : > { %v3541_v15 = vadd.f32 %v3540_v5, %v8904_v16  ;;  %v4213_v14 = vpop.f32.mrf.mxu1  ;;  %v4212_v36 = vadd.f32 %v4211_v50, %v3539_v51  ;;  %v3519_v5 = vadd.f32 %v3518_v21, %v8906_v47  ;;  %v4196_v51 = vadd.f32 %v4195_v20, %v3523_v22  ;;  %v1280_v47 = vpop.permute.xlu1 %1279 }
 0x2d1   : > { %v3542_v38 = vpop.f32.mrf.mxu0  ;;  %v4204_v50 = vadd.f32 %v4203_v25, %v3531_v32  ;;  %v4518_v26 = vmax.f32 %v4210_v59, 0.0  ;;  %v4194_v22 = vadd.f32 %v8404_v13, %v3521_v40  ;;  %v4663_v60 = vpack.c.bf16 %v4517_v53, %v4515_v58  ;;  %v8907_v40 = vld [vmem:[#allocation11_spill] sm:$0xff] }
 0x2d2   : > { %v3543_v7 = vadd.f32 %v3542_v38, %v8904_v16  ;;  %v4214_v3 = vadd.f32 %v4213_v14, %v3541_v15  ;;  %v4215_v61 = vpop.f32.mrf.mxu1  ;;  %v4519_v14 = vmax.f32 %v4212_v36, 0.0  ;;  %v4192_v62 = vadd.f32 %v8402_v9, %v3519_v5 }
 0x2d3   : > { %v3546_v24 = vpop.f32.mrf.mxu0  ;;  %v4513_v32 = vmax.f32 %v4196_v51, 0.0  ;;  %v4516_v48 = vmax.f32 %v4204_v50, 0.0 }
 0x2d4   : > { %v3547_v52 = vadd.f32 %v3546_v24, %v1275_v19  ;;  %v4216_v4 = vadd.f32 %v4215_v61, %v3543_v7  ;;  %v4219_v41 = vpop.f32.mrf.mxu1  ;;  %v4520_v16 = vmax.f32 %v4214_v3, 0.0  ;;  %v8449_v7 = vadd.f32 %v8393_v8, %v3511_v37 }
 0x2d5   : > { %v3548_v15 = vpop.f32.mrf.mxu0  ;;  %v4509_v3 = vmax.f32 %v4186_v30, 0.0  ;;  %v4190_v61 = vadd.f32 %v8400_v10, %v3517_v18  ;;  %v4511_v5 = vmax.f32 %v4192_v62, 0.0  ;;  %v4512_v37 = vmax.f32 %v4194_v22, 0.0  ;;  %v8910_v62 = vld [vmem:[#allocation37_spill] sm:$0xff] }
 0x2d6   : > { %v4521_v38 = vmax.f32 %v4216_v4, 0.0  ;;  %v3549_v0 = vadd.f32 %v3548_v15, %v1275_v19  ;;  %v4220_v42 = vadd.f32 %v4219_v41, %v3547_v52  ;;  %v4221_v21 = vpop.f32.mrf.mxu1  ;;  %v4664_v19 = vpack.c.bf16 %v4520_v16, %v4518_v26 }
 0x2d7   : > { %v3550_v63 = vpop.f32.mrf.mxu0  ;;  %v4661_v4 = vpack.c.bf16 %v4513_v32, %v4511_v5  ;;  %v4662_v41 = vpack.c.bf16 %v4516_v48, %v4514_v43  ;;  %v8911_v32 = vld [vmem:[#allocation5_spill] sm:$0xff] }
 0x2d8   : > { %v4665_v56 = vpack.c.bf16 %v4521_v38, %v4519_v14  ;;  %v3551_v20 = vadd.f32 %v3550_v63, %v1280_v47  ;;  %v4222_v25 = vadd.f32 %v4221_v21, %v3549_v0  ;;  %v4223_v54 = vpop.f32.mrf.mxu1  ;;  %v4522_v13 = vmax.f32 %v4220_v42, 0.0 }
 0x2d9   : > { %v3552_v36 = vpop.f32.mrf.mxu0  ;;  %v4166_v42 = vadd.f32 %v8371_v17, %v8414_v28  ;;  %v4172_v14 = vadd.f32 %v8377_v46, %v8421_v44  ;;  %v4180_v38 = vadd.f32 %v8385_v57, %v8427_v35  ;;  %v4510_v0 = vmax.f32 %v4190_v61, 0.0 }
 0x2da   : > { %v3553_v12 = vadd.f32 %v3552_v36, %v1280_v47  ;;  %v4224_v9 = vadd.f32 %v4223_v54, %v3551_v20  ;;  %4857 = vmatprep.subr.bf16.mxu1 %v4665_v56  ;;  %v4225_v45 = vpop.f32.mrf.mxu1  ;;  %v4523_v51 = vmax.f32 %v4222_v25, 0.0  ;;  %v4507_v47 = vmax.f32 %v8435_v39, 0.0 }
 0x2db   : > { %v3556_v59 = vpop.f32.mrf.mxu0  ;;  %4858 = vmatpush1.bf16.msra.mxu1 %v4664_v19  ;;  %v4174_v17 = vadd.f32 %v8381_v31, %v8424_v27  ;;  %v4505_v46 = vmax.f32 %v8430_v33, 0.0  ;;  %v4508_v28 = vmax.f32 %v8449_v7, 0.0  ;;  %v4660_v57 = vpack.c.bf16 %v4512_v37, %v4510_v0 }
 0x2dc   : > { %v4524_v24 = vmax.f32 %v4224_v9, 0.0  ;;  %v3557_v49 = vadd.f32 %v3556_v59, %v8907_v40  ;;  %v4226_v52 = vadd.f32 %v4225_v45, %v3553_v12  ;;  %4859 = vmatprep.subr.bf16.mxu1 %v4663_v60  ;;  %v4229_v8 = vpop.f32.mrf.mxu1  ;;  %v4659_v35 = vpack.c.bf16 %v4509_v3, %v4507_v47  ;;  %v8918_v47 = vld [vmem:[#allocation36_spill] sm:$0xff] }
 0x2dd   : > { %v3558_v50 = vpop.f32.mrf.mxu0  ;;  %v4162_v20 = vadd.f32 %v8366_v2, %v8411_v11  ;;  %v4170_v25 = vadd.f32 %v8373_v29, %v8417_v6  ;;  %v4503_v54 = vmax.f32 %v4172_v14, 0.0  ;;  %v4506_v22 = vmax.f32 %v4180_v38, 0.0 }
 0x2de   : > { %v8453_v53 = vpack.c.bf16 %v4524_v24, %v4522_v13  ;;  %v4525_v16 = vmax.f32 %v4226_v52, 0.0  ;;  %v3559_v18 = vadd.f32 %v3558_v50, %v8907_v40  ;;  %v4230_v10 = vadd.f32 %v4229_v8, %v3557_v49  ;;  %v4231_v15 = vpop.f32.mrf.mxu1  ;;  %v8915_v13 = vld [vmem:[#allocation56_spill] sm:$0xff] }
 0x2df   : > { %v3560_v21 = vpop.f32.mrf.mxu0  ;;  %4860 = vmatpush1.bf16.msra.mxu1 %v4662_v41  ;;  %v4501_v7 = vmax.f32 %v4166_v42, 0.0  ;;  %v4504_v60 = vmax.f32 %v4174_v17, 0.0  ;;  %v4657_v12 = vpack.c.bf16 %v4505_v46, %v4503_v54  ;;  %v4658_v9 = vpack.c.bf16 %v4508_v28, %v4506_v22 }
 0x2e0   : > { %8908 = vst [vmem:[#allocation31_spill] sm:$0xff] %v8453_v53  ;;  %v8463_v30 = vpack.c.bf16 %v4525_v16, %v4523_v51  ;;  %v3561_v23 = vadd.f32 %v3560_v21, %v8910_v62  ;;  %v4232_v26 = vadd.f32 %v4231_v15, %v3559_v18  ;;  %4861 = vmatprep.subr.bf16.mxu1 %v4661_v4  ;;  %v4233_v63 = vpop.f32.mrf.mxu1  ;;  %v4526_v27 = vmax.f32 %v4230_v10, 0.0 }
 0x2e1   : > { %v3562_v44 = vpop.f32.mrf.mxu0  ;;  %v4502_v61 = vmax.f32 %v4170_v25, 0.0  ;;  %v4499_v43 = vmax.f32 %v4162_v20, 0.0 }
 0x2e2   : > { %8909 = vst [vmem:[#allocation2_spill] sm:$0xff] %v8463_v30  ;;  %v3563_v58 = vadd.f32 %v3562_v44, %v8910_v62  ;;  %v4234_v39 = vadd.f32 %v4233_v63, %v3561_v23  ;;  %v4235_v56 = vpop.f32.mrf.mxu1  ;;  %v4527_v2 = vmax.f32 %v4232_v26, 0.0  ;;  %v4688_v30 = vpop.permute.xlu0 %4687 }
 0x2e3   : > { %v3566_v31 = vpop.f32.mrf.mxu0  ;;  %4862 = vmatpush1.bf16.msra.mxu1 %v4660_v57  ;;  %v4656_v49 = vpack.c.bf16 %v4504_v60, %v4502_v61  ;;  %v4655_v8 = vpack.c.bf16 %v4501_v7, %v4499_v43  ;;  %v8920_v7 = vld [vmem:[#allocation25_spill] sm:$0xff] }
 0x2e4   : > { %v4528_v33 = vmax.f32 %v4234_v39, 0.0  ;;  %v3567_v48 = vadd.f32 %v3566_v31, %v8911_v32  ;;  %v4236_v19 = vadd.f32 %v4235_v56, %v3563_v58  ;;  %4863 = vmatprep.subr.bf16.mxu1 %v4659_v35  ;;  %v4239_v36 = vpop.f32.mrf.mxu1 }
 0x2e5   : > { %v8476_v45 = vpop.f32.mrf.mxu0 }
 0x2e6   : > { %v8478_v11 = vpack.c.bf16 %v4528_v33, %v4526_v27  ;;  %v4529_v29 = vmax.f32 %v4236_v19, 0.0  ;;  %v4240_v6 = vadd.f32 %v4239_v36, %v3567_v48  ;;  %v8480_v3 = vpop.f32.mrf.mxu1 }
 0x2e7   : > { %8913 = vst [vmem:[#allocation54_spill] sm:$0xff] %v8480_v3  ;;  %v3570_v5 = vpop.f32.mrf.mxu0  ;;  %4864 = vmatpush1.bf16.msra.mxu1 %v4658_v9  ;;  %v8921_v9 = vld [vmem:[#allocation47_spill] sm:$0xff] }
 0x2e8   : > { %8912 = vst [vmem:[#allocation8_spill] sm:$0xff] %v8478_v11  ;;  %v8482_v59 = vpack.c.bf16 %v4529_v29, %v4527_v2  ;;  %v3571_v24 = vadd.f32 %v3570_v5, %v8915_v13  ;;  %4865 = vmatprep.subr.bf16.mxu1 %v4657_v12  ;;  %v4243_v40 = vpop.f32.mrf.mxu1  ;;  %v4530_v51 = vmax.f32 %v4240_v6, 0.0  ;;  %v8922_v5 = vld [vmem:[#allocation18_spill] sm:$0xff]  ;;  %v8925_v11 = vld [vmem:[#allocation52_spill] sm:$0xff] }
 0x2e9   : > { %v8485_v52 = vpop.f32.mrf.mxu0 }
 0x2ea   : > { %8914 = vst [vmem:[#allocation6_spill] sm:$0xff] %v8482_v59  ;;  %v4244_v37 = vadd.f32 %v4243_v40, %v3571_v24  ;;  %v8487_v4 = vpop.f32.mrf.mxu1  ;;  %v8923_v24 = vld [vmem:[#allocation48_spill] sm:$0xff] }
 0x2eb   : > { %v8489_v41 = vpop.f32.mrf.mxu0  ;;  %4866 = vmatpush1.bf16.msra.mxu1 %v4656_v49 }
 0x2ec   : > { %v4532_v50 = vmax.f32 %v4244_v37, 0.0  ;;  %4867 = vmatprep.subr.bf16.mxu1 %v4655_v8  ;;  %v8491_v16 = vpop.f32.mrf.mxu1  ;;  %v8924_v8 = vld [vmem:[#allocation29_spill] sm:$0xff] }
 0x2ed   : > { %8916 = vst [vmem:[#allocation50_spill] sm:$0xff] %v8491_v16  ;;  %v8493_v18 = vpop.f32.mrf.mxu0 }
 0x2ee   : > { %v8495_v10 = vpack.c.bf16 %v4532_v50, %v4530_v51  ;;  %v8497_v15 = vpop.f32.mrf.mxu1 }
 0x2ef   : > { %v8499_v42 = vpop.f32.mrf.mxu0  ;;  %4868 = vmatpush1.bf16.msra.mxu1 %v8375_v34 }
 0x2f0   : > { %8917 = vst [vmem:[#allocation3_spill] sm:$0xff] %v8495_v10  ;;  %4869 = vmatprep.subr.bf16.mxu1 %v8368_v55  ;;  %v8503_v14 = vpop.f32.mrf.mxu1  ;;  %v8919_v55 = vld [vmem:[#allocation42_spill] sm:$0xff] }
 0x2f1   : > { %v8505_v38 = vpop.f32.mrf.mxu0 }
 0x2f2   : > { %v8507_v0 = vpop.f32.mrf.mxu1 }
 0x2f3   : > { %v8509_v21 = vpop.f32.mrf.mxu0  ;;  %4870 = vmatpush1.bf16.msra.mxu1 %v8364_v1 }
 0x2f4   : > { %4871 = vmatprep.subr.bf16.mxu1 %v8918_v47  ;;  %v8513_v62 = vpop.f32.mrf.mxu1 }
 0x2f5   : > { %v8515_v23 = vpop.f32.mrf.mxu0 }
 0x2f6   : > { %v8517_v26 = vpop.f32.mrf.mxu1 }
 0x2f7   : > { %v8519_v34 = vpop.f32.mrf.mxu0  ;;  %4872 = vmatpush1.bf16.msra.mxu1 %v8919_v55 }
 0x2f8   : > { %v8522_v63 = vpop.f32.mrf.mxu1 }
 0x2f9   : > { %v3592_v17 = vpop.f32.mrf.mxu0 }
 0x2fa   : > { %v8524_v46 = vpop.f32.mrf.mxu1 }
 0x2fb   : > { %v3596_v28 = vpop.f32.mrf.mxu0 }
 0x2fc   : > { %v8526_v57 = vpop.f32.mrf.mxu1 }
 0x2fd   : > { %v3598_v1 = vpop.f32.mrf.mxu0 }
 0x2fe   : > { %v4271_v44 = vpop.f32.mrf.mxu1 }
 0x2ff   : > { %v3600_v35 = vpop.f32.mrf.mxu0 }
 0x300   : > { %v4273_v58 = vpop.f32.mrf.mxu1 }
 0x301   : > { %v3602_v39 = vpop.f32.mrf.mxu0 }
 0x302   : > { %v4275_v56 = vpop.f32.mrf.mxu1  ;;  %v3603_v37 = vadd.f32 %v3602_v39, %v8924_v8  ;;  %v3601_v39 = vadd.f32 %v3600_v35, %v8924_v8 }
 0x303   : > { %v3606_v20 = vpop.f32.mrf.mxu0 }
 0x304   : > { %v4279_v25 = vpop.f32.mrf.mxu1  ;;  %v4274_v8 = vadd.f32 %v4273_v58, %v3601_v39 }
 0x305   : > { %v3608_v54 = vpop.f32.mrf.mxu0 }
 0x306   : > { %v4281_v22 = vpop.f32.mrf.mxu1  ;;  %v3609_v43 = vadd.f32 %v3608_v54, %v8922_v5  ;;  %v3607_v54 = vadd.f32 %v3606_v20, %v8922_v5  ;;  %v8927_v20 = vld [vmem:[#allocation51_spill] sm:$0xff] }
 0x307   : > { %v3610_v31 = vpop.f32.mrf.mxu0 }
 0x308   : > { %v4283_v27 = vpop.f32.mrf.mxu1  ;;  %v3611_v51 = vadd.f32 %v3610_v31, %v8920_v7  ;;  %v4282_v3 = vadd.f32 %v4281_v22, %v3609_v43  ;;  %v4280_v22 = vadd.f32 %v4279_v25, %v3607_v54 }
 0x309   : > { %v3612_v33 = vpop.f32.mrf.mxu0 }
 0x30a   : > { %v4285_v48 = vpop.f32.mrf.mxu1  ;;  %v3613_v60 = vadd.f32 %v3612_v33, %v8920_v7 }
 0x30b   : > { %v3616_v19 = vpop.f32.mrf.mxu0 }
 0x30c   : > { %v4289_v36 = vpop.f32.mrf.mxu1  ;;  %v3617_v6 = vadd.f32 %v3616_v19, %v8921_v9  ;;  %v4286_v50 = vadd.f32 %v4285_v48, %v3613_v60  ;;  %v3593_v19 = vadd.f32 %v3592_v17, %v8925_v11  ;;  %v4276_v60 = vadd.f32 %v4275_v56, %v3603_v37 }
 0x30d   : > { %v3618_v12 = vpop.f32.mrf.mxu0  ;;  %v4547_v56 = vmax.f32 %v4282_v3, 0.0 }
 0x30e   : > { %v3619_v2 = vadd.f32 %v3618_v12, %v8921_v9  ;;  %v4291_v29 = vpop.f32.mrf.mxu1  ;;  %v8926_v9 = vld [vmem:[#allocation17_spill] sm:$0xff]  ;;  %v4545_v25 = vmax.f32 %v4276_v60, 0.0 }
 0x30f   : > { %v3620_v61 = vpop.f32.mrf.mxu0  ;;  %v3599_v59 = vadd.f32 %v3598_v1, %v8926_v9  ;;  %v3597_v35 = vadd.f32 %v3596_v28, %v8926_v9  ;;  %v4266_v28 = vadd.f32 %v8524_v46, %v3593_v19  ;;  %v4544_v19 = vmax.f32 %v4274_v8, 0.0 }
 0x310   : > { %v3621_v40 = vadd.f32 %v3620_v61, %v8923_v24  ;;  %v4293_v49 = vpop.f32.mrf.mxu1  ;;  %v4292_v55 = vadd.f32 %v4291_v29, %v3619_v2  ;;  %v4290_v61 = vadd.f32 %v4289_v36, %v3617_v6  ;;  %v4284_v2 = vadd.f32 %v4283_v27, %v3611_v51 }
 0x311   : > { %v3622_v47 = vpop.f32.mrf.mxu0  ;;  %v4549_v29 = vmax.f32 %v4286_v50, 0.0  ;;  %v3589_v36 = vadd.f32 %v8515_v23, %v8927_v20  ;;  %v4272_v5 = vadd.f32 %v4271_v44, %v3599_v59  ;;  %v3587_v59 = vadd.f32 %v8509_v21, %v8927_v20  ;;  %v8932_v20 = vld [vmem:[#allocation3_spill] sm:$0xff] }
 0x312   : > { %v3623_v33 = vadd.f32 %v3622_v47, %v8923_v24  ;;  %v4294_v53 = vadd.f32 %v4293_v49, %v3621_v40  ;;  %v4295_v12 = vpop.f32.mrf.mxu1  ;;  %v4551_v49 = vmax.f32 %v4292_v55, 0.0  ;;  %v4550_v6 = vmax.f32 %v4290_v61, 0.0  ;;  %v8928_v55 = vld [vmem:[#allocation13_spill] sm:$0xff] }
 0x313   : > { %v4768_v10 = vpop.f32.mrf.mxu0  ;;  %v4548_v37 = vmax.f32 %v4284_v2, 0.0  ;;  %v3583_v23 = vadd.f32 %v8505_v38, %v8928_v55  ;;  %v4270_v44 = vadd.f32 %v8526_v57, %v3597_v35  ;;  %v4262_v58 = vadd.f32 %v8517_v26, %v3589_v36  ;;  %v8933_v36 = vld [vmem:[#allocation6_spill] sm:$0xff]  ;;  %v8934_v35 = vld [vmem:[#allocation8_spill] sm:$0xff] }
 0x314   : > { %v4296_v31 = vadd.f32 %v4295_v12, %v3623_v33  ;;  %v4769_v48 = vadd.f32 %v4768_v10, %v4688_v30  ;;  %v4809_v7 = vpop.f32.mrf.mxu1  ;;  %v4552_v24 = vmax.f32 %v4294_v53, 0.0  ;;  %v4679_v33 = vpack.c.bf16 %v4549_v29, %v4547_v56 }
 0x315   : > { %v4770_v40 = vpop.f32.mrf.mxu0  ;;  %v4546_v12 = vmax.f32 %v4280_v22, 0.0  ;;  %v4543_v9 = vmax.f32 %v4272_v5, 0.0  ;;  %v3581_v38 = vadd.f32 %v8499_v42, %v8928_v55  ;;  %v3573_v21 = vadd.f32 %v8485_v52, %v8915_v13  ;;  %v8935_v22 = vld [vmem:[#allocation2_spill] sm:$0xff] }
 0x316   : > { %v4553_v47 = vmax.f32 %v4296_v31, 0.0  ;;  %v4771_v17 = vadd.f32 %v4770_v40, %v4688_v30  ;;  %v8540_v16 = vadd.f32 %v4809_v7, %v4769_v48  ;;  %v4811_v1 = vpop.f32.mrf.mxu1  ;;  %v3591_v30 = vadd.f32 %v8519_v34, %v8925_v11  ;;  %v8929_v11 = vld [vmem:[#allocation27_spill] sm:$0xff] }
 0x317   : > { %v4772_v10 = vpop.f32.mrf.mxu0  ;;  %v4680_v51 = vpack.c.bf16 %v4552_v24, %v4550_v6  ;;  %v3579_v34 = vadd.f32 %v8493_v18, %v8929_v11  ;;  %v4678_v54 = vpack.c.bf16 %v4548_v37, %v4546_v12  ;;  %v4256_v57 = vadd.f32 %v8507_v0, %v3583_v23  ;;  %v8931_v24 = vld [vmem:[#allocation54_spill] sm:$0xff]  ;;  %v8936_v6 = vld [vmem:[#allocation31_spill] sm:$0xff] }
 0x318   : > { %v4681_v27 = vpack.c.bf16 %v4553_v47, %v4551_v49  ;;  %v8545_v43 = vadd.f32 %v4811_v1, %v4771_v17  ;;  %v4813_v53 = vpop.f32.mrf.mxu1  ;;  %v4264_v46 = vadd.f32 %v8522_v63, %v3591_v30  ;;  %v4541_v61 = vmax.f32 %v4266_v28, 0.0  ;;  %v8937_v10 = vld [vmem:[#allocation23_spill] sm:$0xff] }
 0x319   : > { %v4773_v50 = vpop.f32.mrf.mxu0  ;;  %v4677_v39 = vpack.c.bf16 %v4545_v25, %v4543_v9  ;;  %v3577_v18 = vadd.f32 %v8489_v41, %v8929_v11  ;;  %v4260_v26 = vadd.f32 %v8513_v62, %v3587_v59  ;;  %v4542_v31 = vmax.f32 %v4270_v44, 0.0  ;;  %v8930_v41 = vld [vmem:[#allocation50_spill] sm:$0xff] }
 0x31a   : > { %4873 = vmatprep.subr.bf16.mxu1 %v4681_v27  ;;  %v4814_v3 = vpop.f32.mrf.mxu1  ;;  %v3569_v42 = vadd.f32 %v8476_v45, %v8911_v32  ;;  %v4252_v63 = vadd.f32 %v8497_v15, %v3579_v34  ;;  %v4539_v48 = vmax.f32 %v4262_v58, 0.0  ;;  %v4254_v13 = vadd.f32 %v8503_v14, %v3581_v38 }
 0x31b   : > { %4874 = vmatpush2.bf16.msra.mxu1 %v4680_v51  ;;  %v4540_v52 = vmax.f32 %v4264_v46, 0.0  ;;  %v4676_v0 = vpack.c.bf16 %v4544_v19, %v4542_v31  ;;  %v4246_v7 = vadd.f32 %v8487_v4, %v3573_v21  ;;  %v4537_v60 = vmax.f32 %v4256_v57, 0.0 }
 0x31c   : > { %4875 = vmatprep.subr.bf16.mxu1 %v4679_v33  ;;  %v4675_v2 = vpack.c.bf16 %v4541_v61, %v4539_v48  ;;  %v4250_v29 = vadd.f32 %v8930_v41, %v3577_v18  ;;  %v4538_v62 = vmax.f32 %v4260_v26, 0.0  ;;  %v4242_v40 = vadd.f32 %v8931_v24, %v3569_v42 }
 0x31d   : > { %v4535_v49 = vmax.f32 %v4252_v63, 0.0  ;;  %v4536_v32 = vmax.f32 %v4254_v13, 0.0  ;;  %v4533_v15 = vmax.f32 %v4246_v7, 0.0 }
 0x31e   : > { %v4674_v45 = vpack.c.bf16 %v4540_v52, %v4538_v62  ;;  %v4534_v17 = vmax.f32 %v4250_v29, 0.0  ;;  %v4531_v14 = vmax.f32 %v4242_v40, 0.0 }
 0x31f   : > { %4876 = vmatpush2.bf16.msra.mxu1 %v4678_v54  ;;  %v4673_v47 = vpack.c.bf16 %v4537_v60, %v4535_v49 }
 0x320   : > { %4877 = vmatprep.subr.bf16.mxu1 %v4677_v39  ;;  %v4672_v1 = vpack.c.bf16 %v4536_v32, %v4534_v17  ;;  %v4671_v4 = vpack.c.bf16 %v4533_v15, %v4531_v14 }
 0x323   : > { %4878 = vmatpush2.bf16.msra.mxu1 %v4676_v0 }
 0x324   : > { %4879 = vmatprep.subr.bf16.mxu1 %v4675_v2 }
 0x327   : > { %4880 = vmatpush2.bf16.msra.mxu1 %v4674_v45 }
 0x328   : > { %4881 = vmatprep.subr.bf16.mxu1 %v4673_v47 }
 0x32b   : > { %4882 = vmatpush2.bf16.msra.mxu1 %v4672_v1 }
 0x32c   : > { %4883 = vmatprep.subr.bf16.mxu1 %v4671_v4 }
 0x32f   : > { %4884 = vmatpush2.bf16.msra.mxu1 %v8932_v20 }
 0x330   : > { %4885 = vmatprep.subr.bf16.mxu1 %v8933_v36 }
 0x333   : > { %4886 = vmatpush2.bf16.msra.mxu1 %v8934_v35 }
 0x334   : > { %4887 = vmatprep.subr.bf16.mxu1 %v8935_v22 }
 0x337   : > { %4888 = vmatpush2.bf16.msra.mxu1 %v8936_v6 }
 0x33a   : > { %4890 = vmatmul.mubr.bf16.vlgmr.msra.gmra.mxu1 %v8937_v10 }
 0x37a   : > { %v4850_v5 = vpop.f32.mrf.mxu0 }
 0x37b   : > { %v4851_v56 = vadd.f32 %v4850_v5, %v8540_v16 }
 0x37c   : > { %v4852_v27 = vpop.f32.mrf.mxu0 }
 0x37d   : > { %v4853_v53 = vadd.f32 %v4852_v27, %v8545_v43 }
 0x37e   : > { %v4854_v30 = vpop.f32.mrf.mxu0 }
 0x380   : > { %v4855_v8 = vpop.f32.mrf.mxu0 }
 0x3fa   : > { %v4891_v37 = vpop.f32.mrf.mxu1 }
 0x3fb   : > { %v4892_v51 = vadd.f32 %v4891_v37, %v4851_v56 }
 0x3fc   : > { %v4893_v50 = vpop.f32.mrf.mxu1 }
 0x3fd   : > { %v5331_v55 = vmul.f32 -1.442695, %v4892_v51  ;;  %v4894_v23 = vadd.f32 %v4893_v50, %v4853_v53 }
 0x3fe   : > { %v4895_v28 = vpop.f32.mrf.mxu1 }
 0x3ff   : > { %5847 = vpow2.f32 %v5331_v55  ;;  %v5332_v25 = vmul.f32 -1.442695, %v4894_v23 }
 0x400   : > { %v4896_v33 = vpop.f32.mrf.mxu1 }
 0x401   : > { %5849 = vpow2.f32 %v5332_v25 }
 0x40c   : > { %v5848_v3 = vpop.eup %5847 }
 0x40d   : > { %v4904_v59 = vadd.f32 1.0, %v5848_v3 }
 0x40e   : > { %v5850_v44 = vpop.eup %5849 }
 0x40f   : > { %v4905_v16 = vadd.f32 1.0, %v5850_v44  ;;  %5851 = vrcp.f32 %v4904_v59 }
 0x411   : > { %5853 = vrcp.f32 %v4905_v16 }
 0x41c   : > { %v5852_v43 = vpop.eup %5851 }
 0x41e   : > { %v5854_v12 = vpop.eup %5853 }
 0x41f   : > { %v4912_v11 = vcombine.low %v5852_v43, %v5854_v12 }
 0x421   : > { %4914 = vst [vmem:[%s262_s28] sm:$0xff] %v4912_v11 }
 0x422 PF: > { %s15_s20 = sadd.s32 1, %s5877_s20   ;;  %s8938_s18 = smov %s5873_s19 }
 0x423   : > { %p12_p5 = scmp.ge.s32.totalorder %s15_s20, 4   ;;  %s8939_s19 = smov %s8941_s21 }
 0x425   :  { %14 = sbr.rel (!%p12_p5) target bundleno = 2 (0x2), region = 70 }

</bundles_post_ra>
